<compile_context>
chip_gen: v6e
topology: v6e:2x2x1
jax: 0.10.0
libtpu: 0.0.40
codegen_flags: <defaults>
</compile_context>

<pallas_src>
import functools

import jax
import jax.numpy as jnp
from jax.experimental import pallas as pl
from jax.experimental.pallas import tpu as pltpu


COMPUTE_DTYPE = jnp.bfloat16        # MXU input dtype (accumulation is f32)


def _round_up(x, m):
    return (x + m - 1) // m * m


def _silu(v):
    return v * jax.nn.sigmoid(v)


# ---------------------------------------------------------------------------
# Generation-aware tile size / VMEM budget (perf review: bigger tiles + higher
# vmem_limit on v5e/v6e's 128 MiB VMEM, conservative settings for v7x / unknown)
# ---------------------------------------------------------------------------
def _vmem_capacity_bytes():
    try:
        info = pltpu.get_tpu_info()
        cap = getattr(info, "vmem_capacity_bytes", None)
        if cap:
            return int(cap)
    except Exception:
        pass
    return 64 * 1024 * 1024          # unknown -> assume smallest (v7x-safe)


_VMEM_CAP = _vmem_capacity_bytes()
VMEM_LIMIT = min(_VMEM_CAP * 3 // 4, 100 * 1024 * 1024)   # 48 MiB (v7x) / 96 MiB (v5e/v6e)
ROW_TILE = 512 if _VMEM_CAP >= 100 * 1024 * 1024 else 256


# ---------------------------------------------------------------------------
# Kernel 1: row-tiled fused MLP (Linear -> SiLU -> Linear) -- used for embed.
# ---------------------------------------------------------------------------
def _mlp2_kernel(x_ref, w1_ref, b1_ref, w2_ref, b2_ref, o_ref):
    h = jnp.dot(x_ref[...], w1_ref[...],
                preferred_element_type=jnp.float32) + b1_ref[...]
    h = _silu(h)                                           # f32 elementwise (v5e-safe)
    o = jnp.dot(h.astype(COMPUTE_DTYPE), w2_ref[...],
                preferred_element_type=jnp.float32) + b2_ref[...]
    o_ref[...] = o.astype(o_ref.dtype)


def mlp2(x, w1, b1, w2, b2, *, out_dtype=COMPUTE_DTYPE):
    rows, din = x.shape
    dmid = w1.shape[1]
    dout = w2.shape[1]
    tm = min(ROW_TILE, rows)
    assert rows % tm == 0, "caller must pre-pad rows to the row tile"

    return pl.pallas_call(
        _mlp2_kernel,
        grid=(rows // tm,),
        in_specs=[pl.BlockSpec((tm, din), lambda i: (i, 0)),
                  pl.BlockSpec((din, dmid), lambda i: (0, 0)),
                  pl.BlockSpec((1, dmid), lambda i: (0, 0)),
                  pl.BlockSpec((dmid, dout), lambda i: (0, 0)),
                  pl.BlockSpec((1, dout), lambda i: (0, 0))],
        out_specs=pl.BlockSpec((tm, dout), lambda i: (i, 0)),
        out_shape=jax.ShapeDtypeStruct((rows, dout), out_dtype),
        compiler_params=pltpu.CompilerParams(
            dimension_semantics=("parallel",),
            vmem_limit_bytes=VMEM_LIMIT),
    )(x, w1, b1, w2, b2)


# ---------------------------------------------------------------------------
# Kernel 2: fully fused GNN layer.
# Per edge tile: one-hot gather x[sender], x[receiver] from VMEM-resident x,
# edge_net MLP (split weights, no concat), one-hot scatter_add into a resident
# f32 accumulator.  Last step epilogue: node_net on cat(x, aggr) via split
# weights, consuming aggr straight from VMEM.
# ---------------------------------------------------------------------------
def _gnn_layer_kernel(snd_ref, rcvc_ref, rcvr_ref, x_ref, xe_ref,
                      we1s_ref, we1r_ref, we1e_ref, be1_ref, we2_ref, be2_ref,
                      wn1x_ref, wn1a_ref, bn1_ref, wn2_ref, bn2_ref,
                      newx_ref, acc_ref):
    step = pl.program_id(0)

    @pl.when(step == 0)
    def _():
        acc_ref[...] = jnp.zeros_like(acc_ref)

    x = x_ref[...]                                        # (N_pad, H) bf16, resident
    tm = snd_ref.shape[0]
    n_pad = x.shape[0]

    # ---- fused row gathers x[sender], x[receiver]: one-hot matmul on MXU ----
    lane_ids = jax.lax.broadcasted_iota(jnp.int32, (tm, n_pad), 1)
    oh_s = (snd_ref[...] == lane_ids).astype(COMPUTE_DTYPE)     # (tm, N_pad)
    oh_r = (rcvc_ref[...] == lane_ids).astype(COMPUTE_DTYPE)
    xs = jnp.dot(oh_s, x, preferred_element_type=jnp.float32)   # (tm, H) f32, exact
    xr = jnp.dot(oh_r, x, preferred_element_type=jnp.float32)

    # ---- edge_net: Linear(split weights; no concat) -> SiLU -> Linear -> SiLU
    h = (jnp.dot(xs.astype(COMPUTE_DTYPE), we1s_ref[...],
                 preferred_element_type=jnp.float32)
         + jnp.dot(xr.astype(COMPUTE_DTYPE), we1r_ref[...],
                   preferred_element_type=jnp.float32)
         + jnp.dot(xe_ref[...], we1e_ref[...],
                   preferred_element_type=jnp.float32)
         + be1_ref[...])
    h = _silu(h)
    m = jnp.dot(h.astype(COMPUTE_DTYPE), we2_ref[...],
                preferred_element_type=jnp.float32) + be2_ref[...]
    m = _silu(m)                                          # (tm, H) messages

    # ---- scatter_add over receiver into resident f32 accumulator -----------
    # One-hot built directly in (N_pad, tm) orientation from the lane-major
    # (1, tm) receiver row -> plain jnp.dot (no transposed-lhs contraction).
    # Padded edges carry receiver == -1 and therefore match no node row.
    sub_ids = jax.lax.broadcasted_iota(jnp.int32, (n_pad, tm), 0)
    oh_scatter = (rcvr_ref[...] == sub_ids).astype(COMPUTE_DTYPE)   # (N_pad, tm)
    acc_ref[...] += jnp.dot(oh_scatter, m.astype(COMPUTE_DTYPE),
                            preferred_element_type=jnp.float32)

    # ---- node_net fused in the epilogue: aggr never leaves VMEM -------------
    @pl.when(step == pl.num_programs(0) - 1)
    def _():
        hn = (jnp.dot(x, wn1x_ref[...], preferred_element_type=jnp.float32)
              + jnp.dot(acc_ref[...].astype(COMPUTE_DTYPE), wn1a_ref[...],
                        preferred_element_type=jnp.float32)
              + bn1_ref[...])
        hn = _silu(hn)
        out = jnp.dot(hn.astype(COMPUTE_DTYPE), wn2_ref[...],
                      preferred_element_type=jnp.float32) + bn2_ref[...]
        newx_ref[...] = out.astype(newx_ref.dtype)


def gnn_layer(x, xe, snd_col, rcv_col, rcv_row, layer_params):
    (we1s, we1r, we1e, be1, we2, be2, wn1x, wn1a, bn1, wn2, bn2) = layer_params
    n_pad, hidden = x.shape
    e_pad, ce = xe.shape
    tm = min(ROW_TILE, e_pad)
    assert e_pad % tm == 0, "caller must pre-pad edge rows to the row tile"

    def const(shape):
        return pl.BlockSpec(shape, lambda i: (0, 0))

    in_specs = [
        pl.BlockSpec((tm, 1), lambda i: (i, 0)),      # sender (gather, sublane-major)
        pl.BlockSpec((tm, 1), lambda i: (i, 0)),      # receiver (gather)
        pl.BlockSpec((1, tm), lambda i: (0, i)),      # receiver (scatter, lane-major)
        const((n_pad, hidden)),                       # x resident in VMEM
        pl.BlockSpec((tm, ce), lambda i: (i, 0)),     # edge features
        const(we1s.shape), const(we1r.shape), const(we1e.shape), const(be1.shape),
        const(we2.shape), const(be2.shape),
        const(wn1x.shape), const(wn1a.shape), const(bn1.shape),
        const(wn2.shape), const(bn2.shape),
    ]
    return pl.pallas_call(
        _gnn_layer_kernel,
        grid=(e_pad // tm,),
        in_specs=in_specs,
        out_specs=pl.BlockSpec((n_pad, hidden), lambda i: (0, 0)),
        out_shape=jax.ShapeDtypeStruct((n_pad, hidden), COMPUTE_DTYPE),
        scratch_shapes=[pltpu.VMEM((n_pad, hidden), jnp.float32)],
        compiler_params=pltpu.CompilerParams(
            dimension_semantics=("arbitrary",),
            vmem_limit_bytes=VMEM_LIMIT),
    )(snd_col, rcv_col, rcv_row, x, xe,
      we1s, we1r, we1e, be1, we2, be2, wn1x, wn1a, bn1, wn2, bn2)


# ---------------------------------------------------------------------------
# Kernel 3: pre_readout MLP fused with global_add_pool.
# Accumulates directly into the resident f32 output ref (no scratch copy).
# ---------------------------------------------------------------------------
def _mlp2_pool_kernel(bat_ref, x_ref, w1_ref, b1_ref, w2_ref, b2_ref, o_ref):
    step = pl.program_id(0)

    @pl.when(step == 0)
    def _():
        o_ref[...] = jnp.zeros_like(o_ref)

    h = jnp.dot(x_ref[...], w1_ref[...],
                preferred_element_type=jnp.float32) + b1_ref[...]
    h = _silu(h)
    y = jnp.dot(h.astype(COMPUTE_DTYPE), w2_ref[...],
                preferred_element_type=jnp.float32) + b2_ref[...]    # (tm, H) f32

    tm = x_ref.shape[0]
    g_pad = o_ref.shape[0]
    sub_ids = jax.lax.broadcasted_iota(jnp.int32, (g_pad, tm), 0)
    oh = (bat_ref[...] == sub_ids).astype(jnp.float32)               # (g_pad, tm)
    # tiny f32 matmul keeps pooling exact; padded nodes carry batch == -1
    o_ref[...] += jnp.dot(oh, y, preferred_element_type=jnp.float32)


def mlp2_pool(batch_row, x, w1, b1, w2, b2, num_out):
    n_pad, hidden = x.shape
    dmid = w1.shape[1]
    dout = w2.shape[1]
    tm = min(ROW_TILE, n_pad)
    assert n_pad % tm == 0, "caller must pre-pad node rows to the row tile"

    return pl.pallas_call(
        _mlp2_pool_kernel,
        grid=(n_pad // tm,),
        in_specs=[pl.BlockSpec((1, tm), lambda i: (0, i)),
                  pl.BlockSpec((tm, hidden), lambda i: (i, 0)),
                  pl.BlockSpec((hidden, dmid), lambda i: (0, 0)),
                  pl.BlockSpec((1, dmid), lambda i: (0, 0)),
                  pl.BlockSpec((dmid, dout), lambda i: (0, 0)),
                  pl.BlockSpec((1, dout), lambda i: (0, 0))],
        out_specs=pl.BlockSpec((num_out, dout), lambda i: (0, 0)),
        out_shape=jax.ShapeDtypeStruct((num_out, dout), jnp.float32),
        compiler_params=pltpu.CompilerParams(
            dimension_semantics=("arbitrary",),
            vmem_limit_bytes=VMEM_LIMIT),
    )(batch_row, x, w1, b1, w2, b2)


# ---------------------------------------------------------------------------
# Parameter initialization (deterministic, PyTorch nn.Linear default style)
# ---------------------------------------------------------------------------
def init_linear(key, fan_in, fan_out):
    k = 1.0 / jnp.sqrt(jnp.float32(fan_in))
    kw, kb = jax.random.split(key)
    w = jax.random.uniform(kw, (fan_in, fan_out), jnp.float32, -k, k)
    b = jax.random.uniform(kb, (fan_out,), jnp.float32, -k, k)
    return w, b


def init_gnn_params(key, in_channels, hidden, edge_channels, num_layers, out_channels):
    keys = jax.random.split(key, 8 + 4 * num_layers)
    it = iter(keys)
    p = {
        "embed": (*init_linear(next(it), in_channels, hidden),
                  *init_linear(next(it), hidden, hidden)),
        "pre_readout": (*init_linear(next(it), hidden, hidden),
                        *init_linear(next(it), hidden, hidden)),
        "readout": (*init_linear(next(it), hidden, hidden),
                    *init_linear(next(it), hidden, out_channels)),
        "layers": [],
    }
    for _ in range(num_layers):
        p["layers"].append({
            "edge": (*init_linear(next(it), 2 * hidden + edge_channels, hidden),
                     *init_linear(next(it), hidden, hidden)),
            "node": (*init_linear(next(it), 2 * hidden, hidden),
                     *init_linear(next(it), hidden, hidden)),
        })
    return p


def prepare_params(params, hidden):
    """One-time cast: weights -> bf16 (split concat blocks), biases -> (1,-1) f32."""
    def lin(w, b):
        return w.astype(COMPUTE_DTYPE), b.reshape(1, -1).astype(jnp.float32)

    p = {}
    w1, b1, w2, b2 = params["embed"]
    p["embed"] = (*lin(w1, b1), *lin(w2, b2))
    w1, b1, w2, b2 = params["pre_readout"]
    p["pre_readout"] = (*lin(w1, b1), *lin(w2, b2))
    p["readout"] = params["readout"]                       # stays f32 in XLA
    p["layers"] = []
    for lp in params["layers"]:
        we1, be1, we2, be2 = lp["edge"]
        wn1, bn1, wn2, bn2 = lp["node"]
        we1c, be1c = lin(we1, be1)
        we2c, be2c = lin(we2, be2)
        wn1c, bn1c = lin(wn1, bn1)
        wn2c, bn2c = lin(wn2, bn2)
        p["layers"].append((
            we1c[:hidden], we1c[hidden:2 * hidden], we1c[2 * hidden:], be1c,
            we2c, be2c,
            wn1c[:hidden], wn1c[hidden:], bn1c,
            wn2c, bn2c))
    return p


# ---------------------------------------------------------------------------
# GNN forward (glue in plain JAX, hot paths in Pallas kernels)
# ---------------------------------------------------------------------------
def gnn_forward(params, x_nodes, x_edges, edge_index, batch, num_graphs):
    num_nodes = x_nodes.shape[0]
    num_edges = x_edges.shape[0]

    # ---- pad rows once so every kernel sees tile-aligned row counts --------
    tm_n = min(ROW_TILE, _round_up(num_nodes, 8))
    tm_e = min(ROW_TILE, _round_up(num_edges, 8))
    n_pad = _round_up(num_nodes, tm_n)
    e_pad = _round_up(num_edges, tm_e)
    g_pad = _round_up(num_graphs, 8)

    xn = jnp.zeros((n_pad, x_nodes.shape[1]), COMPUTE_DTYPE)
    xn = xn.at[:num_nodes].set(x_nodes.astype(COMPUTE_DTYPE))
    xe = jnp.zeros((e_pad, x_edges.shape[1]), COMPUTE_DTYPE)
    xe = xe.at[:num_edges].set(x_edges.astype(COMPUTE_DTYPE))

    snd = edge_index[0].astype(jnp.int32)
    rcv = edge_index[1].astype(jnp.int32)
    # gather indices (sublane-major columns): pad -> 0 (masked out by scatter)
    snd_col = jnp.zeros((e_pad, 1), jnp.int32).at[:num_edges, 0].set(snd)
    rcv_col = jnp.zeros((e_pad, 1), jnp.int32).at[:num_edges, 0].set(rcv)
    # scatter index (lane-major row): pad -> -1 (matches no node)
    rcv_row = jnp.full((1, e_pad), -1, jnp.int32).at[0, :num_edges].set(rcv)
    # pooling index (lane-major row): pad -> -1 (matches no graph)
    bat_row = jnp.full((1, n_pad), -1, jnp.int32).at[0, :num_nodes].set(
        batch.astype(jnp.int32))

    # embed_nodes: row-tiled Linear -> SiLU -> Linear
    x = mlp2(xn, *params["embed"])

    # GNN layers: one fused kernel per layer
    # (gather + edge_net + scatter_add + node_net, aggr never leaves VMEM)
    for lp in params["layers"]:
        x = gnn_layer(x, xe, snd_col, rcv_col, rcv_row, lp)

    # pre_readout MLP fused with global_add_pool
    pooled = mlp2_pool(bat_row, x, *params["pre_readout"], g_pad)

    # Tiny (num_graphs, H) -> (num_graphs, 1) readout stays in plain XLA:
    # lane-sparse output + launch overhead make a pallas_call a net loss here.
    wr1, br1, wr2, br2 = params["readout"]
    pooled = pooled[:num_graphs]
    out = _silu(pooled @ wr1 + br1) @ wr2 + br2
    return jnp.squeeze(out)


# ---------------------------------------------------------------------------
# Pure-JAX f32 reference (silent correctness check)
# ---------------------------------------------------------------------------
def _ref_forward(params, x_nodes, x_edges, edge_index, batch, num_graphs):
    def mlp2_ref(x, w1, b1, w2, b2, final_silu=False):
        o = _silu(x @ w1 + b1) @ w2 + b2
        return _silu(o) if final_silu else o

    sender, receiver = edge_index[0], edge_index[1]
    x = mlp2_ref(x_nodes, *params["embed"])
    for lp in params["layers"]:
        state = jnp.concatenate([x[sender], x[receiver], x_edges], axis=1)
        msg = mlp2_ref(state, *lp["edge"], final_silu=True)
        aggr = jax.ops.segment_sum(msg, receiver, num_segments=x.shape[0])
        x = mlp2_ref(jnp.concatenate([x, aggr], axis=1), *lp["node"])
    x = mlp2_ref(x, *params["pre_readout"])
    pooled = jax.ops.segment_sum(x, batch, num_segments=num_graphs)
    return jnp.squeeze(mlp2_ref(pooled, *params["readout"]))


# ---------------------------------------------------------------------------
if __name__ == "__main__":
    # Small synthetic graph batch (hidden chosen MXU-friendly).
    IN_C, HIDDEN, EDGE_C, NUM_LAYERS, OUT_C = 16, 128, 16, 2, 1
    N_NODES, N_EDGES, N_GRAPHS = 256, 512, 4

    root = jax.random.PRNGKey(0)
    k_params, k_xn, k_xe, k_s, k_r = jax.random.split(root, 5)

    params_f32 = init_gnn_params(k_params, IN_C, HIDDEN, EDGE_C, NUM_LAYERS, OUT_C)
    params = prepare_params(params_f32, HIDDEN)   # one-time bf16 weight cast / splits

    x_nodes = jax.random.normal(k_xn, (N_NODES, IN_C), jnp.float32)
    x_edges = jax.random.normal(k_xe, (N_EDGES, EDGE_C), jnp.float32)
    sender = jax.random.randint(k_s, (N_EDGES,), 0, N_NODES, jnp.int32)
    receiver = jax.random.randint(k_r, (N_EDGES,), 0, N_NODES, jnp.int32)
    edge_index = jnp.stack([sender, receiver], axis=0)          # (2, E)
    batch = (jnp.arange(N_NODES, dtype=jnp.int32) // (N_NODES // N_GRAPHS))

    fwd = jax.jit(functools.partial(gnn_forward, num_graphs=N_GRAPHS))
    out = fwd(params, x_nodes, x_edges, edge_index, batch)
    jax.block_until_ready(out)

    ref = _ref_forward(params_f32, x_nodes, x_edges, edge_index, batch, N_GRAPHS)
    assert out.shape == ref.shape == (N_GRAPHS,)
    # bf16 MXU inputs (f32 accumulation) drift slightly vs. the pure-f32 ref.
    err = float(jnp.max(jnp.abs(out.astype(jnp.float32) - ref) / (jnp.abs(ref) + 1.0)))
    assert err < 1e-1, f"max relative error too large: {err}"

    print("KERNEL_OK")
</pallas_src>

<mosaic_0001>
module attributes {stable_mosaic.version = 11 : i64} {
  func.func @_mlp2_kernel(%arg0: i32, %arg1: memref<256x16xbf16, #tpu.memory_space<vmem>>, %arg2: memref<16x128xbf16, #tpu.memory_space<vmem>>, %arg3: memref<1x128xf32, #tpu.memory_space<vmem>>, %arg4: memref<128x128xbf16, #tpu.memory_space<vmem>>, %arg5: memref<1x128xf32, #tpu.memory_space<vmem>>, %arg6: memref<256x128xbf16, #tpu.memory_space<vmem>>) attributes {dimension_semantics = [#tpu.dimension_semantics<parallel>], iteration_bounds = array<i64: 1>, scalar_prefetch = 0 : i64, scratch_operands = 0 : i64, tpu.core_type = #tpu.core_type<tc>, window_params = [{transform_indices = @transform_0, window_bounds = array<i64: 256, 16>}, {pipeline_mode = #tpu.pipeline_mode<synchronous>, transform_indices = @transform_1, window_bounds = array<i64: 16, 128>}, {pipeline_mode = #tpu.pipeline_mode<synchronous>, transform_indices = @transform_2, window_bounds = array<i64: 1, 128>}, {pipeline_mode = #tpu.pipeline_mode<synchronous>, transform_indices = @transform_3, window_bounds = array<i64: 128, 128>}, {pipeline_mode = #tpu.pipeline_mode<synchronous>, transform_indices = @transform_4, window_bounds = array<i64: 1, 128>}, {transform_indices = @transform_5, window_bounds = array<i64: 256, 128>}]} {
    %c0 = arith.constant 0 : index
    %c0_0 = arith.constant 0 : index
    %0 = vector.load %arg1[%c0, %c0_0] : memref<256x16xbf16, #tpu.memory_space<vmem>>, vector<256x16xbf16>
    %c0_1 = arith.constant 0 : index
    %c0_2 = arith.constant 0 : index
    %1 = vector.load %arg2[%c0_1, %c0_2] : memref<16x128xbf16, #tpu.memory_space<vmem>>, vector<16x128xbf16>
    %cst = arith.constant dense<0.000000e+00> : vector<256x128xf32>
    %2 = tpu.matmul %0, %1, %cst {dimension_numbers = #tpu.dot_dimension_numbers<[1], [0], [0], [1], [0, 0, 1, 1], [], []>} : vector<256x16xbf16>, vector<16x128xbf16>, vector<256x128xf32> -> vector<256x128xf32>
    %c0_3 = arith.constant 0 : index
    %c0_4 = arith.constant 0 : index
    %3 = vector.load %arg3[%c0_3, %c0_4] : memref<1x128xf32, #tpu.memory_space<vmem>>, vector<1x128xf32>
    %4 = vector.broadcast %3 : vector<1x128xf32> to vector<256x128xf32>
    %5 = arith.addf %2, %4 : vector<256x128xf32>
    %6 = arith.negf %5 : vector<256x128xf32>
    %7 = math.exp %6 : vector<256x128xf32>
    %cst_5 = arith.constant 1.000000e+00 : f32
    %8 = vector.broadcast %cst_5 : f32 to vector<256x128xf32>
    %9 = arith.addf %8, %7 : vector<256x128xf32>
    %10 = arith.divf %8, %9 : vector<256x128xf32>
    %11 = arith.mulf %5, %10 : vector<256x128xf32>
    %12 = arith.truncf %11 : vector<256x128xf32> to vector<256x128xbf16>
    %c0_6 = arith.constant 0 : index
    %c0_7 = arith.constant 0 : index
    %13 = vector.load %arg4[%c0_6, %c0_7] : memref<128x128xbf16, #tpu.memory_space<vmem>>, vector<128x128xbf16>
    %cst_8 = arith.constant dense<0.000000e+00> : vector<256x128xf32>
    %14 = tpu.matmul %12, %13, %cst_8 {dimension_numbers = #tpu.dot_dimension_numbers<[1], [0], [0], [1], [0, 0, 1, 1], [], []>} : vector<256x128xbf16>, vector<128x128xbf16>, vector<256x128xf32> -> vector<256x128xf32>
    %c0_9 = arith.constant 0 : index
    %c0_10 = arith.constant 0 : index
    %15 = vector.load %arg5[%c0_9, %c0_10] : memref<1x128xf32, #tpu.memory_space<vmem>>, vector<1x128xf32>
    %16 = vector.broadcast %15 : vector<1x128xf32> to vector<256x128xf32>
    %17 = arith.addf %14, %16 : vector<256x128xf32>
    %18 = arith.truncf %17 : vector<256x128xf32> to vector<256x128xbf16>
    %c0_11 = arith.constant 0 : index
    %c0_12 = arith.constant 0 : index
    %19 = vector.load %arg6[%c0_11, %c0_12] : memref<256x128xbf16, #tpu.memory_space<vmem>>, vector<256x128xbf16>
    tpu.vector_store %arg6[%c0_11, %c0_12], %18 {strides = array<i32>} : memref<256x128xbf16, #tpu.memory_space<vmem>>, vector<256x128xbf16>,
    return
  }
  func.func @transform_0(%arg0: i32) -> (i32, i32) {
    %c0_i32 = arith.constant 0 : i32
    %c0_i32_0 = arith.constant 0 : i32
    return %arg0, %c0_i32 : i32, i32
  }
  func.func @transform_1(%arg0: i32) -> (i32, i32) {
    %c0_i32 = arith.constant 0 : i32
    %c0_i32_0 = arith.constant 0 : i32
    %c0_i32_1 = arith.constant 0 : i32
    return %c0_i32, %c0_i32_0 : i32, i32
  }
  func.func @transform_2(%arg0: i32) -> (i32, i32) {
    %c0_i32 = arith.constant 0 : i32
    %c0_i32_0 = arith.constant 0 : i32
    %c0_i32_1 = arith.constant 0 : i32
    return %c0_i32, %c0_i32_0 : i32, i32
  }
  func.func @transform_3(%arg0: i32) -> (i32, i32) {
    %c0_i32 = arith.constant 0 : i32
    %c0_i32_0 = arith.constant 0 : i32
    %c0_i32_1 = arith.constant 0 : i32
    return %c0_i32, %c0_i32_0 : i32, i32
  }
  func.func @transform_4(%arg0: i32) -> (i32, i32) {
    %c0_i32 = arith.constant 0 : i32
    %c0_i32_0 = arith.constant 0 : i32
    %c0_i32_1 = arith.constant 0 : i32
    return %c0_i32, %c0_i32_0 : i32, i32
  }
  func.func @transform_5(%arg0: i32) -> (i32, i32) {
    %c0_i32 = arith.constant 0 : i32
    %c0_i32_0 = arith.constant 0 : i32
    return %arg0, %c0_i32 : i32, i32
  }
}

module attributes {stable_mosaic.version = 11 : i64} {
  func.func @_mlp2_pool_kernel(%arg0: i32, %arg1: memref<1x256xi32, #tpu.memory_space<vmem>>, %arg2: memref<256x128xbf16, #tpu.memory_space<vmem>>, %arg3: memref<128x128xbf16, #tpu.memory_space<vmem>>, %arg4: memref<1x128xf32, #tpu.memory_space<vmem>>, %arg5: memref<128x128xbf16, #tpu.memory_space<vmem>>, %arg6: memref<1x128xf32, #tpu.memory_space<vmem>>, %arg7: memref<8x128xf32, #tpu.memory_space<vmem>>) attributes {dimension_semantics = [#tpu.dimension_semantics<arbitrary>], iteration_bounds = array<i64: 1>, scalar_prefetch = 0 : i64, scratch_operands = 0 : i64, tpu.core_type = #tpu.core_type<tc>, window_params = [{transform_indices = @transform_0, window_bounds = array<i64: 1, 256>}, {transform_indices = @transform_1, window_bounds = array<i64: 256, 128>}, {pipeline_mode = #tpu.pipeline_mode<synchronous>, transform_indices = @transform_2, window_bounds = array<i64: 128, 128>}, {pipeline_mode = #tpu.pipeline_mode<synchronous>, transform_indices = @transform_3, window_bounds = array<i64: 1, 128>}, {pipeline_mode = #tpu.pipeline_mode<synchronous>, transform_indices = @transform_4, window_bounds = array<i64: 128, 128>}, {pipeline_mode = #tpu.pipeline_mode<synchronous>, transform_indices = @transform_5, window_bounds = array<i64: 1, 128>}, {pipeline_mode = #tpu.pipeline_mode<synchronous>, transform_indices = @transform_6, window_bounds = array<i64: 8, 128>}]} {
    %c0_i32 = arith.constant 0 : i32
    %0 = arith.cmpi eq, %arg0, %c0_i32 : i32
    %1 = arith.extui %0 : i1 to i32
    %c0_i32_0 = arith.constant 0 : i32
    %2 = arith.cmpi ne, %1, %c0_i32_0 : i32
    scf.if %2 {
      %cst_19 = arith.constant 0.000000e+00 : f32
      %31 = vector.broadcast %cst_19 : f32 to vector<8x128xf32>
      %c0_20 = arith.constant 0 : index
      %c0_21 = arith.constant 0 : index
      %32 = vector.load %arg7[%c0_20, %c0_21] : memref<8x128xf32, #tpu.memory_space<vmem>>, vector<8x128xf32>
      tpu.vector_store %arg7[%c0_20, %c0_21], %31 {strides = array<i32>} : memref<8x128xf32, #tpu.memory_space<vmem>>, vector<8x128xf32>,
    } else {
    }
    %c0 = arith.constant 0 : index
    %c0_1 = arith.constant 0 : index
    %3 = vector.load %arg2[%c0, %c0_1] : memref<256x128xbf16, #tpu.memory_space<vmem>>, vector<256x128xbf16>
    %c0_2 = arith.constant 0 : index
    %c0_3 = arith.constant 0 : index
    %4 = vector.load %arg3[%c0_2, %c0_3] : memref<128x128xbf16, #tpu.memory_space<vmem>>, vector<128x128xbf16>
    %cst = arith.constant dense<0.000000e+00> : vector<256x128xf32>
    %5 = tpu.matmul %3, %4, %cst {dimension_numbers = #tpu.dot_dimension_numbers<[1], [0], [0], [1], [0, 0, 1, 1], [], []>} : vector<256x128xbf16>, vector<128x128xbf16>, vector<256x128xf32> -> vector<256x128xf32>
    %c0_4 = arith.constant 0 : index
    %c0_5 = arith.constant 0 : index
    %6 = vector.load %arg4[%c0_4, %c0_5] : memref<1x128xf32, #tpu.memory_space<vmem>>, vector<1x128xf32>
    %7 = vector.broadcast %6 : vector<1x128xf32> to vector<256x128xf32>
    %8 = arith.addf %5, %7 : vector<256x128xf32>
    %9 = arith.negf %8 : vector<256x128xf32>
    %10 = math.exp %9 : vector<256x128xf32>
    %cst_6 = arith.constant 1.000000e+00 : f32
    %11 = vector.broadcast %cst_6 : f32 to vector<256x128xf32>
    %12 = arith.addf %11, %10 : vector<256x128xf32>
    %13 = arith.divf %11, %12 : vector<256x128xf32>
    %14 = arith.mulf %8, %13 : vector<256x128xf32>
    %15 = arith.truncf %14 : vector<256x128xf32> to vector<256x128xbf16>
    %c0_7 = arith.constant 0 : index
    %c0_8 = arith.constant 0 : index
    %16 = vector.load %arg5[%c0_7, %c0_8] : memref<128x128xbf16, #tpu.memory_space<vmem>>, vector<128x128xbf16>
    %cst_9 = arith.constant dense<0.000000e+00> : vector<256x128xf32>
    %17 = tpu.matmul %15, %16, %cst_9 {dimension_numbers = #tpu.dot_dimension_numbers<[1], [0], [0], [1], [0, 0, 1, 1], [], []>} : vector<256x128xbf16>, vector<128x128xbf16>, vector<256x128xf32> -> vector<256x128xf32>
    %c0_10 = arith.constant 0 : index
    %c0_11 = arith.constant 0 : index
    %18 = vector.load %arg6[%c0_10, %c0_11] : memref<1x128xf32, #tpu.memory_space<vmem>>, vector<1x128xf32>
    %19 = vector.broadcast %18 : vector<1x128xf32> to vector<256x128xf32>
    %20 = arith.addf %17, %19 : vector<256x128xf32>
    %21 = tpu.iota {dimensions = array<i32: 0>} : vector<8x256xi32>
    %c0_12 = arith.constant 0 : index
    %c0_13 = arith.constant 0 : index
    %22 = vector.load %arg1[%c0_12, %c0_13] : memref<1x256xi32, #tpu.memory_space<vmem>>, vector<1x256xi32>
    %23 = vector.broadcast %22 : vector<1x256xi32> to vector<8x256xi32>
    %24 = arith.cmpi eq, %23, %21 : vector<8x256xi32>
    %25 = arith.extui %24 : vector<8x256xi1> to vector<8x256xi32>
    %26 = arith.sitofp %25 : vector<8x256xi32> to vector<8x256xf32>
    %c0_14 = arith.constant 0 : index
    %c0_15 = arith.constant 0 : index
    %27 = vector.load %arg7[%c0_14, %c0_15] : memref<8x128xf32, #tpu.memory_space<vmem>>, vector<8x128xf32>
    %cst_16 = arith.constant dense<0.000000e+00> : vector<8x128xf32>
    %28 = tpu.matmul %26, %20, %cst_16 {dimension_numbers = #tpu.dot_dimension_numbers<[1], [0], [0], [1], [0, 0, 1, 1], [], []>} : vector<8x256xf32>, vector<256x128xf32>, vector<8x128xf32> -> vector<8x128xf32>
    %29 = arith.addf %27, %28 : vector<8x128xf32>
    %c0_17 = arith.constant 0 : index
    %c0_18 = arith.constant 0 : index
    %30 = vector.load %arg7[%c0_17, %c0_18] : memref<8x128xf32, #tpu.memory_space<vmem>>, vector<8x128xf32>
    tpu.vector_store %arg7[%c0_17, %c0_18], %29 {strides = array<i32>} : memref<8x128xf32, #tpu.memory_space<vmem>>, vector<8x128xf32>,
    return
  }
  func.func @transform_0(%arg0: i32) -> (i32, i32) {
    %c0_i32 = arith.constant 0 : i32
    %c0_i32_0 = arith.constant 0 : i32
    return %c0_i32, %arg0 : i32, i32
  }
  func.func @transform_1(%arg0: i32) -> (i32, i32) {
    %c0_i32 = arith.constant 0 : i32
    %c0_i32_0 = arith.constant 0 : i32
    return %arg0, %c0_i32 : i32, i32
  }
  func.func @transform_2(%arg0: i32) -> (i32, i32) {
    %c0_i32 = arith.constant 0 : i32
    %c0_i32_0 = arith.constant 0 : i32
    %c0_i32_1 = arith.constant 0 : i32
    return %c0_i32, %c0_i32_0 : i32, i32
  }
  func.func @transform_3(%arg0: i32) -> (i32, i32) {
    %c0_i32 = arith.constant 0 : i32
    %c0_i32_0 = arith.constant 0 : i32
    %c0_i32_1 = arith.constant 0 : i32
    return %c0_i32, %c0_i32_0 : i32, i32
  }
  func.func @transform_4(%arg0: i32) -> (i32, i32) {
    %c0_i32 = arith.constant 0 : i32
    %c0_i32_0 = arith.constant 0 : i32
    %c0_i32_1 = arith.constant 0 : i32
    return %c0_i32, %c0_i32_0 : i32, i32
  }
  func.func @transform_5(%arg0: i32) -> (i32, i32) {
    %c0_i32 = arith.constant 0 : i32
    %c0_i32_0 = arith.constant 0 : i32
    %c0_i32_1 = arith.constant 0 : i32
    return %c0_i32, %c0_i32_0 : i32, i32
  }
  func.func @transform_6(%arg0: i32) -> (i32, i32) {
    %c0_i32 = arith.constant 0 : i32
    %c0_i32_0 = arith.constant 0 : i32
    %c0_i32_1 = arith.constant 0 : i32
    return %c0_i32, %c0_i32_0 : i32, i32
  }
}

module attributes {stable_mosaic.version = 11 : i64} {
  func.func @_gnn_layer_kernel(%arg0: i32, %arg1: memref<256x1xi32, #tpu.memory_space<vmem>>, %arg2: memref<256x1xi32, #tpu.memory_space<vmem>>, %arg3: memref<1x256xi32, #tpu.memory_space<vmem>>, %arg4: memref<256x128xbf16, #tpu.memory_space<vmem>>, %arg5: memref<256x16xbf16, #tpu.memory_space<vmem>>, %arg6: memref<128x128xbf16, #tpu.memory_space<vmem>>, %arg7: memref<128x128xbf16, #tpu.memory_space<vmem>>, %arg8: memref<16x128xbf16, #tpu.memory_space<vmem>>, %arg9: memref<1x128xf32, #tpu.memory_space<vmem>>, %arg10: memref<128x128xbf16, #tpu.memory_space<vmem>>, %arg11: memref<1x128xf32, #tpu.memory_space<vmem>>, %arg12: memref<128x128xbf16, #tpu.memory_space<vmem>>, %arg13: memref<128x128xbf16, #tpu.memory_space<vmem>>, %arg14: memref<1x128xf32, #tpu.memory_space<vmem>>, %arg15: memref<128x128xbf16, #tpu.memory_space<vmem>>, %arg16: memref<1x128xf32, #tpu.memory_space<vmem>>, %arg17: memref<256x128xbf16, #tpu.memory_space<vmem>>, %arg18: memref<256x128xf32, #tpu.memory_space<vmem>>) attributes {dimension_semantics = [#tpu.dimension_semantics<arbitrary>], iteration_bounds = array<i64: 2>, scalar_prefetch = 0 : i64, scratch_operands = 1 : i64, tpu.core_type = #tpu.core_type<tc>, window_params = [{transform_indices = @transform_0, window_bounds = array<i64: 256, 1>}, {transform_indices = @transform_1, window_bounds = array<i64: 256, 1>}, {transform_indices = @transform_2, window_bounds = array<i64: 1, 256>}, {pipeline_mode = #tpu.pipeline_mode<synchronous>, transform_indices = @transform_3, window_bounds = array<i64: 256, 128>}, {transform_indices = @transform_4, window_bounds = array<i64: 256, 16>}, {pipeline_mode = #tpu.pipeline_mode<synchronous>, transform_indices = @transform_5, window_bounds = array<i64: 128, 128>}, {pipeline_mode = #tpu.pipeline_mode<synchronous>, transform_indices = @transform_6, window_bounds = array<i64: 128, 128>}, {pipeline_mode = #tpu.pipeline_mode<synchronous>, transform_indices = @transform_7, window_bounds = array<i64: 16, 128>}, {pipeline_mode = #tpu.pipeline_mode<synchronous>, transform_indices = @transform_8, window_bounds = array<i64: 1, 128>}, {pipeline_mode = #tpu.pipeline_mode<synchronous>, transform_indices = @transform_9, window_bounds = array<i64: 128, 128>}, {pipeline_mode = #tpu.pipeline_mode<synchronous>, transform_indices = @transform_10, window_bounds = array<i64: 1, 128>}, {pipeline_mode = #tpu.pipeline_mode<synchronous>, transform_indices = @transform_11, window_bounds = array<i64: 128, 128>}, {pipeline_mode = #tpu.pipeline_mode<synchronous>, transform_indices = @transform_12, window_bounds = array<i64: 128, 128>}, {pipeline_mode = #tpu.pipeline_mode<synchronous>, transform_indices = @transform_13, window_bounds = array<i64: 1, 128>}, {pipeline_mode = #tpu.pipeline_mode<synchronous>, transform_indices = @transform_14, window_bounds = array<i64: 128, 128>}, {pipeline_mode = #tpu.pipeline_mode<synchronous>, transform_indices = @transform_15, window_bounds = array<i64: 1, 128>}, {pipeline_mode = #tpu.pipeline_mode<synchronous>, transform_indices = @transform_16, window_bounds = array<i64: 256, 128>}]} {
    %c0_i32 = arith.constant 0 : i32
    %0 = arith.cmpi eq, %arg0, %c0_i32 : i32
    %1 = arith.extui %0 : i1 to i32
    %c0_i32_0 = arith.constant 0 : i32
    %2 = arith.cmpi ne, %1, %c0_i32_0 : i32
    scf.if %2 {
      %cst_35 = arith.constant 0.000000e+00 : f32
      %66 = vector.broadcast %cst_35 : f32 to vector<256x128xf32>
      %c0_36 = arith.constant 0 : index
      %c0_37 = arith.constant 0 : index
      %67 = vector.load %arg18[%c0_36, %c0_37] : memref<256x128xf32, #tpu.memory_space<vmem>>, vector<256x128xf32>
      tpu.vector_store %arg18[%c0_36, %c0_37], %66 {strides = array<i32>} : memref<256x128xf32, #tpu.memory_space<vmem>>, vector<256x128xf32>,
    } else {
    }
    %c0 = arith.constant 0 : index
    %c0_1 = arith.constant 0 : index
    %3 = vector.load %arg4[%c0, %c0_1] : memref<256x128xbf16, #tpu.memory_space<vmem>>, vector<256x128xbf16>
    %4 = tpu.iota {dimensions = array<i32: 1>} : vector<256x256xi32>
    %c0_2 = arith.constant 0 : index
    %c0_3 = arith.constant 0 : index
    %5 = vector.load %arg1[%c0_2, %c0_3] : memref<256x1xi32, #tpu.memory_space<vmem>>, vector<256x1xi32>
    %6 = vector.broadcast %5 : vector<256x1xi32> to vector<256x256xi32>
    %7 = arith.cmpi eq, %6, %4 : vector<256x256xi32>
    %8 = arith.extui %7 : vector<256x256xi1> to vector<256x256xi32>
    %9 = arith.sitofp %8 : vector<256x256xi32> to vector<256x256xf32>
    %10 = arith.truncf %9 : vector<256x256xf32> to vector<256x256xbf16>
    %c0_4 = arith.constant 0 : index
    %c0_5 = arith.constant 0 : index
    %11 = vector.load %arg2[%c0_4, %c0_5] : memref<256x1xi32, #tpu.memory_space<vmem>>, vector<256x1xi32>
    %12 = vector.broadcast %11 : vector<256x1xi32> to vector<256x256xi32>
    %13 = arith.cmpi eq, %12, %4 : vector<256x256xi32>
    %14 = arith.extui %13 : vector<256x256xi1> to vector<256x256xi32>
    %15 = arith.sitofp %14 : vector<256x256xi32> to vector<256x256xf32>
    %16 = arith.truncf %15 : vector<256x256xf32> to vector<256x256xbf16>
    %cst = arith.constant dense<0.000000e+00> : vector<256x128xf32>
    %17 = tpu.matmul %10, %3, %cst {dimension_numbers = #tpu.dot_dimension_numbers<[1], [0], [0], [1], [0, 0, 1, 1], [], []>} : vector<256x256xbf16>, vector<256x128xbf16>, vector<256x128xf32> -> vector<256x128xf32>
    %cst_6 = arith.constant dense<0.000000e+00> : vector<256x128xf32>
    %18 = tpu.matmul %16, %3, %cst_6 {dimension_numbers = #tpu.dot_dimension_numbers<[1], [0], [0], [1], [0, 0, 1, 1], [], []>} : vector<256x256xbf16>, vector<256x128xbf16>, vector<256x128xf32> -> vector<256x128xf32>
    %19 = arith.truncf %17 : vector<256x128xf32> to vector<256x128xbf16>
    %c0_7 = arith.constant 0 : index
    %c0_8 = arith.constant 0 : index
    %20 = vector.load %arg6[%c0_7, %c0_8] : memref<128x128xbf16, #tpu.memory_space<vmem>>, vector<128x128xbf16>
    %cst_9 = arith.constant dense<0.000000e+00> : vector<256x128xf32>
    %21 = tpu.matmul %19, %20, %cst_9 {dimension_numbers = #tpu.dot_dimension_numbers<[1], [0], [0], [1], [0, 0, 1, 1], [], []>} : vector<256x128xbf16>, vector<128x128xbf16>, vector<256x128xf32> -> vector<256x128xf32>
    %22 = arith.truncf %18 : vector<256x128xf32> to vector<256x128xbf16>
    %c0_10 = arith.constant 0 : index
    %c0_11 = arith.constant 0 : index
    %23 = vector.load %arg7[%c0_10, %c0_11] : memref<128x128xbf16, #tpu.memory_space<vmem>>, vector<128x128xbf16>
    %cst_12 = arith.constant dense<0.000000e+00> : vector<256x128xf32>
    %24 = tpu.matmul %22, %23, %cst_12 {dimension_numbers = #tpu.dot_dimension_numbers<[1], [0], [0], [1], [0, 0, 1, 1], [], []>} : vector<256x128xbf16>, vector<128x128xbf16>, vector<256x128xf32> -> vector<256x128xf32>
    %25 = arith.addf %21, %24 : vector<256x128xf32>
    %c0_13 = arith.constant 0 : index
    %c0_14 = arith.constant 0 : index
    %26 = vector.load %arg5[%c0_13, %c0_14] : memref<256x16xbf16, #tpu.memory_space<vmem>>, vector<256x16xbf16>
    %c0_15 = arith.constant 0 : index
    %c0_16 = arith.constant 0 : index
    %27 = vector.load %arg8[%c0_15, %c0_16] : memref<16x128xbf16, #tpu.memory_space<vmem>>, vector<16x128xbf16>
    %cst_17 = arith.constant dense<0.000000e+00> : vector<256x128xf32>
    %28 = tpu.matmul %26, %27, %cst_17 {dimension_numbers = #tpu.dot_dimension_numbers<[1], [0], [0], [1], [0, 0, 1, 1], [], []>} : vector<256x16xbf16>, vector<16x128xbf16>, vector<256x128xf32> -> vector<256x128xf32>
    %29 = arith.addf %25, %28 : vector<256x128xf32>
    %c0_18 = arith.constant 0 : index
    %c0_19 = arith.constant 0 : index
    %30 = vector.load %arg9[%c0_18, %c0_19] : memref<1x128xf32, #tpu.memory_space<vmem>>, vector<1x128xf32>
    %31 = vector.broadcast %30 : vector<1x128xf32> to vector<256x128xf32>
    %32 = arith.addf %29, %31 : vector<256x128xf32>
    %33 = arith.negf %32 : vector<256x128xf32>
    %34 = math.exp %33 : vector<256x128xf32>
    %cst_20 = arith.constant 1.000000e+00 : f32
    %35 = vector.broadcast %cst_20 : f32 to vector<256x128xf32>
    %36 = arith.addf %35, %34 : vector<256x128xf32>
    %37 = arith.divf %35, %36 : vector<256x128xf32>
    %38 = arith.mulf %32, %37 : vector<256x128xf32>
    %39 = arith.truncf %38 : vector<256x128xf32> to vector<256x128xbf16>
    %c0_21 = arith.constant 0 : index
    %c0_22 = arith.constant 0 : index
    %40 = vector.load %arg10[%c0_21, %c0_22] : memref<128x128xbf16, #tpu.memory_space<vmem>>, vector<128x128xbf16>
    %cst_23 = arith.constant dense<0.000000e+00> : vector<256x128xf32>
    %41 = tpu.matmul %39, %40, %cst_23 {dimension_numbers = #tpu.dot_dimension_numbers<[1], [0], [0], [1], [0, 0, 1, 1], [], []>} : vector<256x128xbf16>, vector<128x128xbf16>, vector<256x128xf32> -> vector<256x128xf32>
    %c0_24 = arith.constant 0 : index
    %c0_25 = arith.constant 0 : index
    %42 = vector.load %arg11[%c0_24, %c0_25] : memref<1x128xf32, #tpu.memory_space<vmem>>, vector<1x128xf32>
    %43 = vector.broadcast %42 : vector<1x128xf32> to vector<256x128xf32>
    %44 = arith.addf %41, %43 : vector<256x128xf32>
    %45 = arith.negf %44 : vector<256x128xf32>
    %46 = math.exp %45 : vector<256x128xf32>
    %cst_26 = arith.constant 1.000000e+00 : f32
    %47 = vector.broadcast %cst_26 : f32 to vector<256x128xf32>
    %48 = arith.addf %47, %46 : vector<256x128xf32>
    %49 = arith.divf %47, %48 : vector<256x128xf32>
    %50 = arith.mulf %44, %49 : vector<256x128xf32>
    %51 = tpu.iota {dimensions = array<i32: 0>} : vector<256x256xi32>
    %c0_27 = arith.constant 0 : index
    %c0_28 = arith.constant 0 : index
    %52 = vector.load %arg3[%c0_27, %c0_28] : memref<1x256xi32, #tpu.memory_space<vmem>>, vector<1x256xi32>
    %53 = vector.broadcast %52 : vector<1x256xi32> to vector<256x256xi32>
    %54 = arith.cmpi eq, %53, %51 : vector<256x256xi32>
    %55 = arith.extui %54 : vector<256x256xi1> to vector<256x256xi32>
    %56 = arith.sitofp %55 : vector<256x256xi32> to vector<256x256xf32>
    %57 = arith.truncf %56 : vector<256x256xf32> to vector<256x256xbf16>
    %c0_29 = arith.constant 0 : index
    %c0_30 = arith.constant 0 : index
    %58 = vector.load %arg18[%c0_29, %c0_30] : memref<256x128xf32, #tpu.memory_space<vmem>>, vector<256x128xf32>
    %59 = arith.truncf %50 : vector<256x128xf32> to vector<256x128xbf16>
    %cst_31 = arith.constant dense<0.000000e+00> : vector<256x128xf32>
    %60 = tpu.matmul %57, %59, %cst_31 {dimension_numbers = #tpu.dot_dimension_numbers<[1], [0], [0], [1], [0, 0, 1, 1], [], []>} : vector<256x256xbf16>, vector<256x128xbf16>, vector<256x128xf32> -> vector<256x128xf32>
    %61 = arith.addf %58, %60 : vector<256x128xf32>
    %c0_32 = arith.constant 0 : index
    %c0_33 = arith.constant 0 : index
    %62 = vector.load %arg18[%c0_32, %c0_33] : memref<256x128xf32, #tpu.memory_space<vmem>>, vector<256x128xf32>
    tpu.vector_store %arg18[%c0_32, %c0_33], %61 {strides = array<i32>} : memref<256x128xf32, #tpu.memory_space<vmem>>, vector<256x128xf32>,
    %c1_i32 = arith.constant 1 : i32
    %63 = arith.cmpi eq, %arg0, %c1_i32 : i32
    %64 = arith.extui %63 : i1 to i32
    %c0_i32_34 = arith.constant 0 : i32
    %65 = arith.cmpi ne, %64, %c0_i32_34 : i32
    scf.if %65 {
      %c0_35 = arith.constant 0 : index
      %c0_36 = arith.constant 0 : index
      %66 = vector.load %arg12[%c0_35, %c0_36] : memref<128x128xbf16, #tpu.memory_space<vmem>>, vector<128x128xbf16>
      %cst_37 = arith.constant dense<0.000000e+00> : vector<256x128xf32>
      %67 = tpu.matmul %3, %66, %cst_37 {dimension_numbers = #tpu.dot_dimension_numbers<[1], [0], [0], [1], [0, 0, 1, 1], [], []>} : vector<256x128xbf16>, vector<128x128xbf16>, vector<256x128xf32> -> vector<256x128xf32>
      %c0_38 = arith.constant 0 : index
      %c0_39 = arith.constant 0 : index
      %68 = vector.load %arg18[%c0_38, %c0_39] : memref<256x128xf32, #tpu.memory_space<vmem>>, vector<256x128xf32>
      %69 = arith.truncf %68 : vector<256x128xf32> to vector<256x128xbf16>
      %c0_40 = arith.constant 0 : index
      %c0_41 = arith.constant 0 : index
      %70 = vector.load %arg13[%c0_40, %c0_41] : memref<128x128xbf16, #tpu.memory_space<vmem>>, vector<128x128xbf16>
      %cst_42 = arith.constant dense<0.000000e+00> : vector<256x128xf32>
      %71 = tpu.matmul %69, %70, %cst_42 {dimension_numbers = #tpu.dot_dimension_numbers<[1], [0], [0], [1], [0, 0, 1, 1], [], []>} : vector<256x128xbf16>, vector<128x128xbf16>, vector<256x128xf32> -> vector<256x128xf32>
      %72 = arith.addf %67, %71 : vector<256x128xf32>
      %c0_43 = arith.constant 0 : index
      %c0_44 = arith.constant 0 : index
      %73 = vector.load %arg14[%c0_43, %c0_44] : memref<1x128xf32, #tpu.memory_space<vmem>>, vector<1x128xf32>
      %74 = vector.broadcast %73 : vector<1x128xf32> to vector<256x128xf32>
      %75 = arith.addf %72, %74 : vector<256x128xf32>
      %76 = arith.negf %75 : vector<256x128xf32>
      %77 = math.exp %76 : vector<256x128xf32>
      %cst_45 = arith.constant 1.000000e+00 : f32
      %78 = vector.broadcast %cst_45 : f32 to vector<256x128xf32>
      %79 = arith.addf %78, %77 : vector<256x128xf32>
      %80 = arith.divf %78, %79 : vector<256x128xf32>
      %81 = arith.mulf %75, %80 : vector<256x128xf32>
      %82 = arith.truncf %81 : vector<256x128xf32> to vector<256x128xbf16>
      %c0_46 = arith.constant 0 : index
      %c0_47 = arith.constant 0 : index
      %83 = vector.load %arg15[%c0_46, %c0_47] : memref<128x128xbf16, #tpu.memory_space<vmem>>, vector<128x128xbf16>
      %cst_48 = arith.constant dense<0.000000e+00> : vector<256x128xf32>
      %84 = tpu.matmul %82, %83, %cst_48 {dimension_numbers = #tpu.dot_dimension_numbers<[1], [0], [0], [1], [0, 0, 1, 1], [], []>} : vector<256x128xbf16>, vector<128x128xbf16>, vector<256x128xf32> -> vector<256x128xf32>
      %c0_49 = arith.constant 0 : index
      %c0_50 = arith.constant 0 : index
      %85 = vector.load %arg16[%c0_49, %c0_50] : memref<1x128xf32, #tpu.memory_space<vmem>>, vector<1x128xf32>
      %86 = vector.broadcast %85 : vector<1x128xf32> to vector<256x128xf32>
      %87 = arith.addf %84, %86 : vector<256x128xf32>
      %88 = arith.truncf %87 : vector<256x128xf32> to vector<256x128xbf16>
      %c0_51 = arith.constant 0 : index
      %c0_52 = arith.constant 0 : index
      %89 = vector.load %arg17[%c0_51, %c0_52] : memref<256x128xbf16, #tpu.memory_space<vmem>>, vector<256x128xbf16>
      tpu.vector_store %arg17[%c0_51, %c0_52], %88 {strides = array<i32>} : memref<256x128xbf16, #tpu.memory_space<vmem>>, vector<256x128xbf16>,
    } else {
    }
    return
  }
  func.func @transform_0(%arg0: i32) -> (i32, i32) {
    %c0_i32 = arith.constant 0 : i32
    %c0_i32_0 = arith.constant 0 : i32
    return %arg0, %c0_i32 : i32, i32
  }
  func.func @transform_1(%arg0: i32) -> (i32, i32) {
    %c0_i32 = arith.constant 0 : i32
    %c0_i32_0 = arith.constant 0 : i32
    return %arg0, %c0_i32 : i32, i32
  }
  func.func @transform_2(%arg0: i32) -> (i32, i32) {
    %c0_i32 = arith.constant 0 : i32
    %c0_i32_0 = arith.constant 0 : i32
    return %c0_i32, %arg0 : i32, i32
  }
  func.func @transform_3(%arg0: i32) -> (i32, i32) {
    %c0_i32 = arith.constant 0 : i32
    %c0_i32_0 = arith.constant 0 : i32
    %c0_i32_1 = arith.constant 0 : i32
    return %c0_i32, %c0_i32_0 : i32, i32
  }
  func.func @transform_4(%arg0: i32) -> (i32, i32) {
    %c0_i32 = arith.constant 0 : i32
    %c0_i32_0 = arith.constant 0 : i32
    return %arg0, %c0_i32 : i32, i32
  }
  func.func @transform_5(%arg0: i32) -> (i32, i32) {
    %c0_i32 = arith.constant 0 : i32
    %c0_i32_0 = arith.constant 0 : i32
    %c0_i32_1 = arith.constant 0 : i32
    return %c0_i32, %c0_i32_0 : i32, i32
  }
  func.func @transform_6(%arg0: i32) -> (i32, i32) {
    %c0_i32 = arith.constant 0 : i32
    %c0_i32_0 = arith.constant 0 : i32
    %c0_i32_1 = arith.constant 0 : i32
    return %c0_i32, %c0_i32_0 : i32, i32
  }
  func.func @transform_7(%arg0: i32) -> (i32, i32) {
    %c0_i32 = arith.constant 0 : i32
    %c0_i32_0 = arith.constant 0 : i32
    %c0_i32_1 = arith.constant 0 : i32
    return %c0_i32, %c0_i32_0 : i32, i32
  }
  func.func @transform_8(%arg0: i32) -> (i32, i32) {
    %c0_i32 = arith.constant 0 : i32
    %c0_i32_0 = arith.constant 0 : i32
    %c0_i32_1 = arith.constant 0 : i32
    return %c0_i32, %c0_i32_0 : i32, i32
  }
  func.func @transform_9(%arg0: i32) -> (i32, i32) {
    %c0_i32 = arith.constant 0 : i32
    %c0_i32_0 = arith.constant 0 : i32
    %c0_i32_1 = arith.constant 0 : i32
    return %c0_i32, %c0_i32_0 : i32, i32
  }
  func.func @transform_10(%arg0: i32) -> (i32, i32) {
    %c0_i32 = arith.constant 0 : i32
    %c0_i32_0 = arith.constant 0 : i32
    %c0_i32_1 = arith.constant 0 : i32
    return %c0_i32, %c0_i32_0 : i32, i32
  }
  func.func @transform_11(%arg0: i32) -> (i32, i32) {
    %c0_i32 = arith.constant 0 : i32
    %c0_i32_0 = arith.constant 0 : i32
    %c0_i32_1 = arith.constant 0 : i32
    return %c0_i32, %c0_i32_0 : i32, i32
  }
  func.func @transform_12(%arg0: i32) -> (i32, i32) {
    %c0_i32 = arith.constant 0 : i32
    %c0_i32_0 = arith.constant 0 : i32
    %c0_i32_1 = arith.constant 0 : i32
    return %c0_i32, %c0_i32_0 : i32, i32
  }
  func.func @transform_13(%arg0: i32) -> (i32, i32) {
    %c0_i32 = arith.constant 0 : i32
    %c0_i32_0 = arith.constant 0 : i32
    %c0_i32_1 = arith.constant 0 : i32
    return %c0_i32, %c0_i32_0 : i32, i32
  }
  func.func @transform_14(%arg0: i32) -> (i32, i32) {
    %c0_i32 = arith.constant 0 : i32
    %c0_i32_0 = arith.constant 0 : i32
    %c0_i32_1 = arith.constant 0 : i32
    return %c0_i32, %c0_i32_0 : i32, i32
  }
  func.func @transform_15(%arg0: i32) -> (i32, i32) {
    %c0_i32 = arith.constant 0 : i32
    %c0_i32_0 = arith.constant 0 : i32
    %c0_i32_1 = arith.constant 0 : i32
    return %c0_i32, %c0_i32_0 : i32, i32
  }
  func.func @transform_16(%arg0: i32) -> (i32, i32) {
    %c0_i32 = arith.constant 0 : i32
    %c0_i32_0 = arith.constant 0 : i32
    %c0_i32_1 = arith.constant 0 : i32
    return %c0_i32, %c0_i32_0 : i32, i32
  }
}

</mosaic_0001>

<bundles_post_ra>
// kernel: gnn_forward.4
= control target key start
LH: loop header
LB: loop body
LE: loop exit
PB: predicated region body
PF: predicated region fallthrough
CT: control target
= control target key end

     0   :  { %vm148_vm0 = vcmask 130048   ;;  %s1891_s1 = inlined_call_operand.vmem [shape: bf16[16,128], index: 1, kind: input, shape index: {}]   ;;  %s1892_s0 = inlined_call_operand.vmem [shape: bf16[256,16], index: 0, kind: input, shape index: {}]   ;;  %s1893_s3 = inlined_call_operand.vmem [shape: bf16[128,128], index: 3, kind: input, shape index: {}]   ;;  %s1894_s2 = inlined_call_operand.vmem [shape: f32[1,128], index: 2, kind: input, shape index: {}]   ;;  %s1895_s4 = inlined_call_operand.vmem [shape: f32[1,128], index: 4, kind: input, shape index: {}]   ;;  %s1896_s5 = inlined_call_operand.vmem [shape: bf16[256,128], index: 5, kind: output, shape index: {}]  }
   0x1   :  { %v1367_v0 = vld [vmem:[%s1891_s1] sm:$0xff]   ;;  %v1369_v2 = vld [vmem:[%s1892_s0 + $0x8] sm:$0xff]   ;;  %v1370_v3 = vld [vmem:[%s1892_s0 + $0x10] sm:$0xff]  }
   0x2   :  { %v1368_v1 = vld [vmem:[%s1892_s0] sm:$0xff]   ;;  %1269 = vmatprep.subr.bf16.mxu0 %v1367_v0  ;;  %v1371_v4 = vld [vmem:[%s1892_s0 + $0x18] sm:$0xff]   ;;  %v1373_v6 = vld [vmem:[%s1892_s0 + $0x28] sm:$0xff]  }
   0x3   :  { %1270 = vmatpush3.bf16.msra.mxu0 %v1367_v0  ;;  %1271 = vmatprep.mubr.msk.bf16.mxu0 %vm148_vm0, %v1368_v1  ;;  %v1372_v5 = vld [vmem:[%s1892_s0 + $0x20] sm:$0xff]   ;;  %v1374_v7 = vld [vmem:[%s1892_s0 + $0x30] sm:$0xff]   ;;  %v1375_v8 = vld [vmem:[%s1892_s0 + $0x38] sm:$0xff]  }
   0x4   :  { %v1376_v9 = vld [vmem:[%s1892_s0 + $0x40] sm:$0xff]   ;;  %v1377_v10 = vld [vmem:[%s1892_s0 + $0x48] sm:$0xff]   ;;  %v1378_v11 = vld [vmem:[%s1892_s0 + $0x50] sm:$0xff]  }
   0x5   :  { %v1379_v12 = vld [vmem:[%s1892_s0 + $0x58] sm:$0xff]   ;;  %v1380_v13 = vld [vmem:[%s1892_s0 + $0x60] sm:$0xff]   ;;  %v1381_v14 = vld [vmem:[%s1892_s0 + $0x68] sm:$0xff]  }
   0x6   :  { %1272 = vmatmul.mubr.msk.bf16.vlgmr.msra.gmra.mxu0 %vm148_vm0, %v1369_v2  ;;  %v1382_v15 = vld [vmem:[%s1892_s0 + $0x70] sm:$0xff]   ;;  %v1383_v16 = vld [vmem:[%s1892_s0 + $0x78] sm:$0xff]   ;;  %v1386_v19 = vld [vmem:[%s1893_s3 + $0x28] sm:$0xff]  }
   0x7   :  { %1275 = vmatprep.mubr.msk.bf16.mxu0 %vm148_vm0, %v1370_v3  ;;  %v1384_v17 = vld [vmem:[%s1893_s3 + $0x38] sm:$0xff]   ;;  %v1385_v18 = vld [vmem:[%s1893_s3 + $0x30] sm:$0xff]   ;;  %v1387_v20 = vld [vmem:[%s1893_s3 + $0x20] sm:$0xff]  }
   0x8   :  { %1303 = vmatprep.subr.bf16.mxu0 %v1384_v17  ;;  %1351 = vmatprep.subr.bf16.mxu1 %v1384_v17  ;;  %v1388_v21 = vld [vmem:[%s1893_s3 + $0x18] sm:$0xff]   ;;  %v1389_v22 = vld [vmem:[%s1893_s3 + $0x10] sm:$0xff]   ;;  %v1390_v23 = vld [vmem:[%s1893_s3 + $0x8] sm:$0xff]  }
   0x9   :  { %1304 = vmatpush3.bf16.msra.mxu0 %v1384_v17  ;;  %1359 = vmatpush3.bf16.msra.mxu1 %v1384_v17  ;;  %v1391_v24 = vld [vmem:[%s1893_s3] sm:$0xff]  }
   0xa   :  { %1305 = vmatprep.subr.bf16.mxu0 %v1385_v18  ;;  %1352 = vmatprep.subr.bf16.mxu1 %v1385_v18  ;;  %v1644_v25 = vld [vmem:[%s1894_s2] ss:$0 sm:$0xff] }
   0xd   :  { %1306 = vmatpush3.bf16.msra.mxu0 %v1385_v18  ;;  %1360 = vmatpush3.bf16.msra.mxu1 %v1385_v18 }
   0xe   :  { %1276 = vmatmul.mubr.msk.bf16.gmra.mxu0 %vm148_vm0, %v1371_v4  ;;  %1307 = vmatprep.subr.bf16.mxu0 %v1386_v19 }
   0xf   :  { %1279 = vmatprep.mubr.msk.bf16.mxu0 %vm148_vm0, %v1372_v5  ;;  %1353 = vmatprep.subr.bf16.mxu1 %v1386_v19 }
  0x11   :  { %1308 = vmatpush3.bf16.msra.mxu0 %v1386_v19  ;;  %1361 = vmatpush3.bf16.msra.mxu1 %v1386_v19 }
  0x12   :  { %1309 = vmatprep.subr.bf16.mxu0 %v1387_v20  ;;  %1354 = vmatprep.subr.bf16.mxu1 %v1387_v20 }
  0x15   :  { %1310 = vmatpush3.bf16.msra.mxu0 %v1387_v20  ;;  %1362 = vmatpush3.bf16.msra.mxu1 %v1387_v20 }
  0x16   :  { %1280 = vmatmul.mubr.msk.bf16.gmra.mxu0 %vm148_vm0, %v1373_v6  ;;  %1311 = vmatprep.subr.bf16.mxu0 %v1388_v21 }
  0x17   :  { %1283 = vmatprep.mubr.msk.bf16.mxu0 %vm148_vm0, %v1374_v7  ;;  %1355 = vmatprep.subr.bf16.mxu1 %v1388_v21 }
  0x19   :  { %1312 = vmatpush3.bf16.msra.mxu0 %v1388_v21  ;;  %1363 = vmatpush3.bf16.msra.mxu1 %v1388_v21 }
  0x1a   :  { %1313 = vmatprep.subr.bf16.mxu0 %v1389_v22  ;;  %1356 = vmatprep.subr.bf16.mxu1 %v1389_v22 }
  0x1d   :  { %1314 = vmatpush3.bf16.msra.mxu0 %v1389_v22  ;;  %1364 = vmatpush3.bf16.msra.mxu1 %v1389_v22 }
  0x1e   :  { %1284 = vmatmul.mubr.msk.bf16.gmra.mxu0 %vm148_vm0, %v1375_v8  ;;  %1315 = vmatprep.subr.bf16.mxu0 %v1390_v23 }
  0x1f   :  { %1287 = vmatprep.mubr.msk.bf16.mxu0 %vm148_vm0, %v1376_v9  ;;  %1357 = vmatprep.subr.bf16.mxu1 %v1390_v23 }
  0x21   :  { %1316 = vmatpush3.bf16.msra.mxu0 %v1390_v23  ;;  %1365 = vmatpush3.bf16.msra.mxu1 %v1390_v23 }
  0x22   :  { %1317 = vmatprep.subr.bf16.mxu0 %v1391_v24  ;;  %1358 = vmatprep.subr.bf16.mxu1 %v1391_v24 }
  0x25   :  { %1318 = vmatpush3.bf16.msra.mxu0 %v1391_v24  ;;  %1366 = vmatpush3.bf16.msra.mxu1 %v1391_v24 }
  0x26   :  { %1288 = vmatmul.mubr.msk.bf16.gmra.mxu0 %vm148_vm0, %v1377_v10 }
  0x27   :  { %1291 = vmatprep.mubr.msk.bf16.mxu0 %vm148_vm0, %v1378_v11 }
  0x2e   :  { %1292 = vmatmul.mubr.msk.bf16.gmra.mxu0 %vm148_vm0, %v1379_v12 }
  0x2f   :  { %1295 = vmatprep.mubr.msk.bf16.mxu0 %vm148_vm0, %v1380_v13 }
  0x36   :  { %1296 = vmatmul.mubr.msk.bf16.gmra.mxu0 %vm148_vm0, %v1381_v14 }
  0x37   :  { %1299 = vmatprep.mubr.msk.bf16.mxu0 %vm148_vm0, %v1382_v15 }
  0x3e   :  { %1300 = vmatmul.mubr.msk.bf16.gmra.mxu0 %vm148_vm0, %v1383_v16 }
  0xc6   :  { %v1273_v26 = vpop.f32.mrf.mxu0 }
  0xc7   :  { %v1647_v27 = vadd.f32 %v1273_v26, %v1644_v25 }
  0xc8   :  { %v231_v28 = vpop.f32.mrf.mxu0 }
  0xc9   :  { %v1030_v29 = vmul.f32 -1.442695, %v1647_v27  ;;  %v1651_v30 = vadd.f32 %v1644_v25, %v231_v28 }
  0xca   :  { %v1274_v31 = vpop.f32.mrf.mxu0 }
  0xcb   :  { %1392 = vpow2.f32 %v1030_v29  ;;  %v1028_v32 = vmul.f32 -1.442695, %v1651_v30  ;;  %v1655_v33 = vadd.f32 %v1274_v31, %v1644_v25 }
  0xcc   :  { %v234_v34 = vpop.f32.mrf.mxu0 }
  0xcd   :  { %1394 = vpow2.f32 %v1028_v32  ;;  %v1031_v35 = vmul.f32 -1.442695, %v1655_v33  ;;  %v1659_v36 = vadd.f32 %v1644_v25, %v234_v34 }
  0xce   :  { %v1277_v37 = vpop.f32.mrf.mxu0 }
  0xcf   :  { %1396 = vpow2.f32 %v1031_v35  ;;  %v1029_v38 = vmul.f32 -1.442695, %v1659_v36  ;;  %v1663_v39 = vadd.f32 %v1277_v37, %v1644_v25 }
  0xd0   :  { %v247_v40 = vpop.f32.mrf.mxu0 }
  0xd1   :  { %1398 = vpow2.f32 %v1029_v38  ;;  %v1034_v41 = vmul.f32 -1.442695, %v1663_v39  ;;  %v1667_v42 = vadd.f32 %v1644_v25, %v247_v40 }
  0xd2   :  { %v1278_v43 = vpop.f32.mrf.mxu0 }
  0xd3   :  { %1400 = vpow2.f32 %v1034_v41  ;;  %v1032_v44 = vmul.f32 -1.442695, %v1667_v42  ;;  %v1671_v45 = vadd.f32 %v1278_v43, %v1644_v25 }
  0xd4   :  { %v250_v46 = vpop.f32.mrf.mxu0 }
  0xd5   :  { %1402 = vpow2.f32 %v1032_v44  ;;  %v1035_v47 = vmul.f32 -1.442695, %v1671_v45  ;;  %v1675_v48 = vadd.f32 %v1644_v25, %v250_v46 }
  0xd6   :  { %v1281_v49 = vpop.f32.mrf.mxu0 }
  0xd7   :  { %1404 = vpow2.f32 %v1035_v47  ;;  %v1033_v50 = vmul.f32 -1.442695, %v1675_v48  ;;  %v1679_v51 = vadd.f32 %v1281_v49, %v1644_v25 }
  0xd8   :  { %v1393_v52 = vpop.eup %1392  ;;  %v263_v53 = vpop.f32.mrf.mxu0 }
  0xd9   :  { %v456_v54 = vadd.f32 1.0, %v1393_v52  ;;  %1406 = vpow2.f32 %v1033_v50  ;;  %v1038_v55 = vmul.f32 -1.442695, %v1679_v51  ;;  %v1683_v56 = vadd.f32 %v1644_v25, %v263_v53 }
  0xda   :  { %v1395_v57 = vpop.eup %1394  ;;  %v1282_v58 = vpop.f32.mrf.mxu0 }
  0xdb   :  { %1408 = vrcp.f32 %v456_v54  ;;  %v454_v59 = vadd.f32 1.0, %v1395_v57  ;;  %v1036_v60 = vmul.f32 -1.442695, %v1683_v56  ;;  %v1687_v61 = vadd.f32 %v1282_v58, %v1644_v25 }
  0xdc   :  { %v1397_v62 = vpop.eup %1396  ;;  %1410 = vpow2.f32 %v1038_v55  ;;  %v266_v63 = vpop.f32.mrf.mxu0 }
  0xdd   :  { %1412 = vrcp.f32 %v454_v59  ;;  %v457_v0 = vadd.f32 1.0, %v1397_v62  ;;  %v1039_v1 = vmul.f32 -1.442695, %v1687_v61  ;;  %v1691_v2 = vadd.f32 %v1644_v25, %v266_v63 }
  0xde   :  { %v1399_v3 = vpop.eup %1398  ;;  %1414 = vpow2.f32 %v1036_v60  ;;  %v1285_v4 = vpop.f32.mrf.mxu0 }
  0xdf   :  { %1416 = vrcp.f32 %v457_v0  ;;  %v455_v5 = vadd.f32 1.0, %v1399_v3  ;;  %v1037_v6 = vmul.f32 -1.442695, %v1691_v2  ;;  %v1695_v7 = vadd.f32 %v1285_v4, %v1644_v25 }
  0xe0   :  { %v1401_v8 = vpop.eup %1400  ;;  %1418 = vpow2.f32 %v1039_v1  ;;  %v279_v9 = vpop.f32.mrf.mxu0 }
  0xe1   :  { %1420 = vrcp.f32 %v455_v5  ;;  %v460_v10 = vadd.f32 1.0, %v1401_v8  ;;  %v1042_v11 = vmul.f32 -1.442695, %v1695_v7  ;;  %v1699_v12 = vadd.f32 %v1644_v25, %v279_v9 }
  0xe2   :  { %v1403_v13 = vpop.eup %1402  ;;  %1422 = vpow2.f32 %v1037_v6  ;;  %v1286_v14 = vpop.f32.mrf.mxu0 }
  0xe3   :  { %1424 = vrcp.f32 %v460_v10  ;;  %v458_v15 = vadd.f32 1.0, %v1403_v13  ;;  %v1040_v16 = vmul.f32 -1.442695, %v1699_v12  ;;  %v1703_v17 = vadd.f32 %v1286_v14, %v1644_v25 }
  0xe4   :  { %v1405_v18 = vpop.eup %1404  ;;  %1426 = vpow2.f32 %v1042_v11  ;;  %v282_v19 = vpop.f32.mrf.mxu0 }
  0xe5   :  { %1428 = vrcp.f32 %v458_v15  ;;  %v461_v20 = vadd.f32 1.0, %v1405_v18  ;;  %v1043_v21 = vmul.f32 -1.442695, %v1703_v17  ;;  %v1707_v22 = vadd.f32 %v1644_v25, %v282_v19 }
  0xe6   :  { %v1407_v23 = vpop.eup %1406  ;;  %1430 = vpow2.f32 %v1040_v16  ;;  %v1289_v24 = vpop.f32.mrf.mxu0 }
  0xe7   :  { %1432 = vrcp.f32 %v461_v20  ;;  %v459_v26 = vadd.f32 1.0, %v1407_v23  ;;  %v1041_v28 = vmul.f32 -1.442695, %v1707_v22  ;;  %v1711_v29 = vadd.f32 %v1289_v24, %v1644_v25 }
  0xe8   :  { %v1409_v31 = vpop.eup %1408  ;;  %1434 = vpow2.f32 %v1043_v21  ;;  %v295_v32 = vpop.f32.mrf.mxu0 }
  0xe9   :  { %v1411_v34 = vpop.eup %1410  ;;  %1436 = vrcp.f32 %v459_v26  ;;  %v1046_v35 = vmul.f32 -1.442695, %v1711_v29  ;;  %v1715_v37 = vadd.f32 %v1644_v25, %v295_v32  ;;  %v552_v3 = vmul.f32 %v1409_v31, %v1647_v27 }
  0xea   :  { %v1413_v38 = vpop.eup %1412  ;;  %v464_v40 = vadd.f32 1.0, %v1411_v34  ;;  %1438 = vpow2.f32 %v1041_v28  ;;  %v1290_v41 = vpop.f32.mrf.mxu0 }
  0xeb   :  { %v1415_v43 = vpop.eup %1414  ;;  %1440 = vpow2.f32 %v1046_v35  ;;  %v1044_v44 = vmul.f32 -1.442695, %v1715_v37  ;;  %v1719_v46 = vadd.f32 %v1290_v41, %v1644_v25  ;;  %v550_v62 = vmul.f32 %v1413_v38, %v1651_v30 }
  0xec   :  { %v1417_v47 = vpop.eup %1416  ;;  %1442 = vrcp.f32 %v464_v40  ;;  %v462_v49 = vadd.f32 1.0, %v1415_v43  ;;  %v298_v50 = vpop.f32.mrf.mxu0 }
  0xed   :  { %v1419_v52 = vpop.eup %1418  ;;  %1444 = vpow2.f32 %v1044_v44  ;;  %v1047_v53 = vmul.f32 -1.442695, %v1719_v46  ;;  %v1723_v54 = vadd.f32 %v1644_v25, %v298_v50  ;;  %v553_v57 = vmul.f32 %v1417_v47, %v1655_v33 }
  0xee   :  { %v1421_v55 = vpop.eup %1420  ;;  %1446 = vrcp.f32 %v462_v49  ;;  %v465_v58 = vadd.f32 1.0, %v1419_v52  ;;  %v1293_v59 = vpop.f32.mrf.mxu0 }
  0xef   :  { %v1423_v60 = vpop.eup %1422  ;;  %v551_v63 = vmul.f32 %v1421_v55, %v1659_v36  ;;  %1448 = vpow2.f32 %v1047_v53  ;;  %v1045_v0 = vmul.f32 -1.442695, %v1723_v54  ;;  %v1731_v5 = vadd.f32 %v1293_v59, %v1644_v25 }
  0xf0   :  { %v1425_v1 = vpop.eup %1424  ;;  %1450 = vrcp.f32 %v465_v58  ;;  %v463_v4 = vadd.f32 1.0, %v1423_v60  ;;  %v311_v33 = vpop.f32.mrf.mxu0  ;;  %v583_v36 = vpack.c.bf16 %v553_v57, %v552_v3 }
  0xf1   :  { %v1427_v6 = vpop.eup %1426  ;;  %1452 = vpow2.f32 %v1045_v0  ;;  %v1734_v8 = vadd.f32 %v1644_v25, %v311_v33  ;;  %v582_v30 = vpack.c.bf16 %v551_v63, %v550_v62  ;;  %v1050_v11 = vmul.f32 -1.442695, %v1731_v5 }
  0xf2   :  { %v1429_v9 = vpop.eup %1428  ;;  %1454 = vrcp.f32 %v463_v4  ;;  %v468_v10 = vadd.f32 1.0, %v1427_v6  ;;  %v1294_v13 = vpop.f32.mrf.mxu0  ;;  %v556_v49 = vmul.f32 %v1425_v1, %v1663_v39 }
  0xf3   :  { %v1431_v27 = vpop.eup %1430  ;;  %v1048_v14 = vmul.f32 -1.442695, %v1734_v8  ;;  %v1739_v15 = vadd.f32 %v1294_v13, %v1644_v25  ;;  %1319 = vmatprep.mubr.bf16.mxu0 %v582_v30  ;;  %v554_v44 = vmul.f32 %v1429_v9, %v1667_v42 }
  0xf4   :  { %v1433_v16 = vpop.eup %1432  ;;  %1456 = vrcp.f32 %v468_v10  ;;  %v466_v18 = vadd.f32 1.0, %v1431_v27  ;;  %v314_v19 = vpop.f32.mrf.mxu0  ;;  %1320 = vmatmul.mubr.bf16.vlgmr.msra.gmra.mxu0 %v583_v36 }
  0xf5   :  { %v1435_v20 = vpop.eup %1434  ;;  %1458 = vpow2.f32 %v1050_v11  ;;  %v1051_v21 = vmul.f32 -1.442695, %v1739_v15  ;;  %v1743_v23 = vadd.f32 %v1644_v25, %v314_v19  ;;  %v557_v32 = vmul.f32 %v1433_v16, %v1671_v45 }
  0xf6   :  { %v1437_v24 = vpop.eup %1436  ;;  %1460 = vrcp.f32 %v466_v18  ;;  %v469_v26 = vadd.f32 1.0, %v1435_v20  ;;  %v1297_v28 = vpop.f32.mrf.mxu0 }
  0xf7   :  { %v1439_v31 = vpop.eup %1438  ;;  %1462 = vpow2.f32 %v1048_v14  ;;  %v1747_v34 = vadd.f32 %v1297_v28, %v1644_v25  ;;  %v555_v35 = vmul.f32 %v1437_v24, %v1675_v48  ;;  %v1049_v41 = vmul.f32 -1.442695, %v1743_v23 }
  0xf8   :  { %v1441_v38 = vpop.eup %1440  ;;  %1464 = vrcp.f32 %v469_v26  ;;  %v467_v40 = vadd.f32 1.0, %v1439_v31  ;;  %v327_v43 = vpop.f32.mrf.mxu0  ;;  %v585_v42 = vpack.c.bf16 %v557_v32, %v556_v49 }
  0xf9   :  { %v1443_v47 = vpop.eup %1442  ;;  %v472_v50 = vadd.f32 1.0, %v1441_v38  ;;  %1466 = vpow2.f32 %v1051_v21  ;;  %v1754_v45 = vadd.f32 %v1644_v25, %v327_v43  ;;  %v1054_v48 = vmul.f32 -1.442695, %v1747_v34 }
  0xfa   :  { %v1445_v52 = vpop.eup %1444  ;;  %1468 = vrcp.f32 %v467_v40  ;;  %v1298_v53 = vpop.f32.mrf.mxu0  ;;  %v584_v55 = vpack.c.bf16 %v555_v35, %v554_v44 }
  0xfb   :  { %v1447_v57 = vpop.eup %1446  ;;  %1470 = vrcp.f32 %v472_v50  ;;  %v470_v58 = vadd.f32 1.0, %v1445_v52  ;;  %v1758_v59 = vadd.f32 %v1298_v53, %v1644_v25  ;;  %v1052_v39 = vmul.f32 -1.442695, %v1754_v45 }
  0xfc   :  { %v1449_v60 = vpop.eup %1448  ;;  %1472 = vpow2.f32 %v1049_v41  ;;  %1323 = vmatprep.mubr.bf16.mxu1 %v584_v55  ;;  %v330_v62 = vpop.f32.mrf.mxu0  ;;  %v558_v11 = vmul.f32 %v1447_v57, %v1683_v56 }
  0xfd   :  { %v1451_v63 = vpop.eup %1450  ;;  %1474 = vrcp.f32 %v470_v58  ;;  %v473_v0 = vadd.f32 1.0, %v1449_v60  ;;  %v1762_v1 = vadd.f32 %v1644_v25, %v330_v62  ;;  %1324 = vmatmul.mubr.bf16.vlgmr.msra.gmra.mxu1 %v585_v42  ;;  %v1055_v33 = vmul.f32 -1.442695, %v1758_v59 }
  0xfe   :  { %v1453_v3 = vpop.eup %1452  ;;  %v561_v4 = vmul.f32 %v1451_v63, %v1687_v61  ;;  %1476 = vpow2.f32 %v1054_v48  ;;  %v1301_v6 = vpop.f32.mrf.mxu0  ;;  %v560_v61 = vmul.f32 %v1443_v47, %v1679_v51 }
  0xff   :  { %v1455_v30 = vpop.eup %1454  ;;  %1478 = vrcp.f32 %v473_v0  ;;  %v471_v9 = vadd.f32 1.0, %v1453_v3  ;;  %v1053_v36 = vmul.f32 -1.442695, %v1762_v1  ;;  %v1768_v10 = vadd.f32 %v1301_v6, %v1644_v25 }
 0x100   :  { %v559_v13 = vmul.f32 %v1455_v30, %v1691_v2  ;;  %1480 = vpow2.f32 %v1052_v39  ;;  %v343_v27 = vpop.f32.mrf.mxu0  ;;  %v587_v26 = vpack.c.bf16 %v561_v4, %v560_v61 }
 0x101   :  { %v1457_v14 = vpop.eup %1456  ;;  %1482 = vrcp.f32 %v471_v9  ;;  %v1058_v16 = vmul.f32 -1.442695, %v1768_v10  ;;  %v1775_v18 = vadd.f32 %v1644_v25, %v343_v27 }
 0x102   :  { %v1459_v19 = vpop.eup %1458  ;;  %1484 = vpow2.f32 %v1055_v33  ;;  %v1302_v20 = vpop.f32.mrf.mxu0  ;;  %v586_v21 = vpack.c.bf16 %v559_v13, %v558_v11 }
 0x103   :  { %v1461_v24 = vpop.eup %1460  ;;  %1486 = vpow2.f32 %v1053_v36  ;;  %v1056_v56 = vmul.f32 -1.442695, %v1775_v18  ;;  %v1779_v2 = vadd.f32 %v1302_v20, %v1644_v25  ;;  %v476_v41 = vadd.f32 1.0, %v1459_v19 }
 0x104   :  { %v1463_v28 = vpop.eup %1462  ;;  %1327 = vmatprep.mubr.bf16.mxu1 %v586_v21  ;;  %v346_v51 = vpop.f32.mrf.mxu0  ;;  %1488 = vpow2.f32 %v1058_v16  ;;  %v562_v52 = vmul.f32 %v1461_v24, %v1699_v12 }
 0x105   :  { %v1465_v31 = vpop.eup %1464  ;;  %v474_v32 = vadd.f32 1.0, %v1463_v28  ;;  %v1059_v35 = vmul.f32 -1.442695, %v1779_v2  ;;  %v1783_v38 = vadd.f32 %v1644_v25, %v346_v51  ;;  %1328 = vmatmul.mubr.bf16.gmra.mxu1 %v587_v26  ;;  %1490 = vpow2.f32 %v1056_v56 }
 0x106   :  { %v1467_v40 = vpop.eup %1466  ;;  %v565_v44 = vmul.f32 %v1465_v31, %v1703_v17  ;;  %v564_v25 = vmul.f32 %v1457_v14, %v1695_v7 }
 0x107   :  { %v1469_v43 = vpop.eup %1468  ;;  %1492 = vrcp.f32 %v474_v32  ;;  %v477_v47 = vadd.f32 1.0, %v1467_v40  ;;  %v1057_v49 = vmul.f32 -1.442695, %v1783_v38 }
 0x108   :  { %v1471_v50 = vpop.eup %1470  ;;  %v563_v48 = vmul.f32 %v1469_v43, %v1707_v22  ;;  %1494 = vpow2.f32 %v1059_v35  ;;  %v589_v17 = vpack.c.bf16 %v565_v44, %v564_v25  ;;  %v1809_v25 = vld [vmem:[%s1895_s4] ss:$0 sm:$0xff] }
 0x109   :  { %v1473_v53 = vpop.eup %1472  ;;  %1496 = vrcp.f32 %v477_v47  ;;  %v568_v6 = vmul.f32 %v1471_v50, %v1711_v29 }
 0x10a   :  { %v1475_v55 = vpop.eup %1474  ;;  %v475_v57 = vadd.f32 1.0, %v1473_v53  ;;  %1498 = vpow2.f32 %v1057_v49  ;;  %v588_v58 = vpack.c.bf16 %v563_v48, %v562_v52 }
 0x10b   :  { %v1477_v42 = vpop.eup %1476  ;;  %1500 = vrcp.f32 %v476_v41  ;;  %v566_v0 = vmul.f32 %v1475_v55, %v1715_v37 }
 0x10c   :  { %v1479_v60 = vpop.eup %1478  ;;  %1502 = vrcp.f32 %v475_v57  ;;  %v480_v39 = vadd.f32 1.0, %v1477_v42  ;;  %1331 = vmatprep.mubr.bf16.mxu1 %v588_v58 }
 0x10d   :  { %v1481_v62 = vpop.eup %1480  ;;  %1332 = vmatmul.mubr.bf16.gmra.mxu1 %v589_v17  ;;  %v569_v7 = vmul.f32 %v1479_v60, %v1719_v46 }
 0x10e   :  { %v1483_v12 = vpop.eup %1482  ;;  %v478_v22 = vadd.f32 1.0, %v1481_v62  ;;  %1504 = vrcp.f32 %v480_v39 }
 0x10f   :  { %v1485_v63 = vpop.eup %1484  ;;  %v567_v3 = vmul.f32 %v1483_v12, %v1723_v54  ;;  %v591_v13 = vpack.c.bf16 %v569_v7, %v568_v6 }
 0x110   :  { %v1487_v4 = vpop.eup %1486  ;;  %v481_v33 = vadd.f32 1.0, %v1485_v63  ;;  %1506 = vrcp.f32 %v478_v22 }
 0x111   :  { %v479_v30 = vadd.f32 1.0, %v1487_v4  ;;  %v590_v9 = vpack.c.bf16 %v567_v3, %v566_v0  ;;  %v1489_v36 = vpop.eup %1488 }
 0x112   :  { %1508 = vrcp.f32 %v481_v33  ;;  %v1491_v11 = vpop.eup %1490  ;;  %v484_v16 = vadd.f32 1.0, %v1489_v36 }
 0x113   :  { %1510 = vrcp.f32 %v479_v30  ;;  %1335 = vmatprep.mubr.bf16.mxu1 %v590_v9  ;;  %v482_v37 = vadd.f32 1.0, %v1491_v11 }
 0x114   :  { %v1493_v27 = vpop.eup %1492 }
 0x115   :  { %v1495_v14 = vpop.eup %1494  ;;  %1336 = vmatmul.mubr.bf16.gmra.mxu1 %v591_v13  ;;  %1512 = vrcp.f32 %v482_v37  ;;  %v570_v24 = vmul.f32 %v1493_v27, %v1734_v8 }
 0x116   :  { %v1497_v46 = vpop.eup %1496  ;;  %v485_v54 = vadd.f32 1.0, %v1495_v14 }
 0x117   :  { %v1499_v61 = vpop.eup %1498  ;;  %v573_v21 = vmul.f32 %v1497_v46, %v1739_v15 }
 0x118   :  { %v1501_v19 = vpop.eup %1500  ;;  %v483_v29 = vadd.f32 1.0, %v1499_v61  ;;  %1514 = vrcp.f32 %v485_v54 }
 0x119   :  { %v1503_v20 = vpop.eup %1502  ;;  %v572_v26 = vmul.f32 %v1501_v19, %v1731_v5 }
 0x11a   :  { %v571_v56 = vmul.f32 %v1503_v20, %v1743_v23  ;;  %1516 = vrcp.f32 %v483_v29 }
 0x11b   :  { %1518 = vrcp.f32 %v484_v16  ;;  %v1505_v51 = vpop.eup %1504  ;;  %v593_v31 = vpack.c.bf16 %v573_v21, %v572_v26 }
 0x11c   :  { %v592_v28 = vpack.c.bf16 %v571_v56, %v570_v24  ;;  %v576_v23 = vmul.f32 %v1505_v51, %v1747_v34 }
 0x11d   :  { %v1507_v32 = vpop.eup %1506 }
 0x11e   :  { %1339 = vmatprep.mubr.bf16.mxu1 %v592_v28  ;;  %v574_v41 = vmul.f32 %v1507_v32, %v1754_v45 }
 0x11f   :  { %v1509_v35 = vpop.eup %1508  ;;  %1340 = vmatmul.mubr.bf16.gmra.mxu1 %v593_v31 }
 0x120   :  { %v1511_v40 = vpop.eup %1510  ;;  %v577_v15 = vmul.f32 %v1509_v35, %v1758_v59 }
 0x121   :  { %v575_v8 = vmul.f32 %v1511_v40, %v1762_v1 }
 0x122   :  { %v1513_v44 = vpop.eup %1512  ;;  %v595_v5 = vpack.c.bf16 %v577_v15, %v576_v23 }
 0x123   :  { %v594_v43 = vpack.c.bf16 %v575_v8, %v574_v41  ;;  %v578_v52 = vmul.f32 %v1513_v44, %v1775_v18 }
 0x125   :  { %1343 = vmatprep.mubr.bf16.mxu1 %v594_v43  ;;  %v1515_v47 = vpop.eup %1514 }
 0x126   :  { %v581_v45 = vmul.f32 %v1515_v47, %v1779_v2 }
 0x127   :  { %v1517_v49 = vpop.eup %1516  ;;  %1344 = vmatmul.mubr.bf16.gmra.mxu1 %v595_v5 }
 0x128   :  { %v1519_v50 = vpop.eup %1518  ;;  %v579_v48 = vmul.f32 %v1517_v49, %v1783_v38 }
 0x129   :  { %v580_v59 = vmul.f32 %v1519_v50, %v1768_v10 }
 0x12a   :  { %v596_v53 = vpack.c.bf16 %v579_v48, %v578_v52 }
 0x12b   :  { %v597_v1 = vpack.c.bf16 %v581_v45, %v580_v59 }
 0x12c   :  { %1347 = vmatprep.mubr.bf16.mxu1 %v596_v53 }
 0x12f   :  { %1348 = vmatmul.mubr.bf16.gmra.mxu1 %v597_v1 }
 0x1b4   :  { %v1321_v34 = vpop.f32.mrf.mxu0 }
 0x1b5   :  { %v712_v18 = vadd.f32 %v1321_v34, %v1809_v25 }
 0x1b6   :  { %v703_v55 = vpop.f32.mrf.mxu0 }
 0x1b7   :  { %v704_v2 = vadd.f32 %v1809_v25, %v703_v55 }
 0x1b8   :  { %v1322_v57 = vpop.f32.mrf.mxu0 }
 0x1b9   :  { %v715_v38 = vadd.f32 %v1322_v57, %v1809_v25 }
 0x1ba   :  { %v706_v58 = vpop.f32.mrf.mxu0 }
 0x1bb   :  { %v1141_v42 = vpack.c.bf16 %v715_v38, %v712_v18  ;;  %v707_v10 = vadd.f32 %v1809_v25, %v706_v58 }
 0x1bd   :  { %1213 = vst [vmem:[%s1896_s5 + $0x8] sm:$0xff] %v1141_v42   ;;  %v1136_v17 = vpack.c.bf16 %v707_v10, %v704_v2  ;;  %v1325_v60 = vpop.f32.mrf.mxu1 }
 0x1be   :  { %v728_v12 = vadd.f32 %v1325_v60, %v1809_v25 }
 0x1bf   :  { %1137 = vst [vmem:[%s1896_s5] sm:$0xff] %v1136_v17   ;;  %v719_v39 = vpop.f32.mrf.mxu1 }
 0x1c0   :  { %v720_v0 = vadd.f32 %v1809_v25, %v719_v39 }
 0x1c1   :  { %v1326_v62 = vpop.f32.mrf.mxu1 }
 0x1c2   :  { %v731_v22 = vadd.f32 %v1326_v62, %v1809_v25 }
 0x1c3   :  { %v722_v63 = vpop.f32.mrf.mxu1 }
 0x1c4   :  { %v1151_v7 = vpack.c.bf16 %v731_v22, %v728_v12  ;;  %v723_v3 = vadd.f32 %v1809_v25, %v722_v63 }
 0x1c5   :  { %v1329_v4 = vpop.f32.mrf.mxu1 }
 0x1c6   :  { %1215 = vst [vmem:[%s1896_s5 + $0x18] sm:$0xff] %v1151_v7   ;;  %v1146_v33 = vpack.c.bf16 %v723_v3, %v720_v0  ;;  %v744_v9 = vadd.f32 %v1329_v4, %v1809_v25 }
 0x1c7   :  { %v735_v6 = vpop.f32.mrf.mxu1 }
 0x1c8   :  { %1214 = vst [vmem:[%s1896_s5 + $0x10] sm:$0xff] %v1146_v33   ;;  %v736_v13 = vadd.f32 %v1809_v25, %v735_v6 }
 0x1c9   :  { %v1330_v30 = vpop.f32.mrf.mxu1 }
 0x1ca   :  { %v747_v36 = vadd.f32 %v1330_v30, %v1809_v25 }
 0x1cb   :  { %v738_v11 = vpop.f32.mrf.mxu1 }
 0x1cc   :  { %v1161_v27 = vpack.c.bf16 %v747_v36, %v744_v9  ;;  %v739_v37 = vadd.f32 %v1809_v25, %v738_v11 }
 0x1cd   :  { %v1333_v14 = vpop.f32.mrf.mxu1 }
 0x1ce   :  { %1217 = vst [vmem:[%s1896_s5 + $0x28] sm:$0xff] %v1161_v27   ;;  %v1156_v46 = vpack.c.bf16 %v739_v37, %v736_v13  ;;  %v760_v16 = vadd.f32 %v1333_v14, %v1809_v25 }
 0x1cf   :  { %v751_v54 = vpop.f32.mrf.mxu1 }
 0x1d0   :  { %1216 = vst [vmem:[%s1896_s5 + $0x20] sm:$0xff] %v1156_v46   ;;  %v752_v20 = vadd.f32 %v1809_v25, %v751_v54 }
 0x1d1   :  { %v1334_v61 = vpop.f32.mrf.mxu1 }
 0x1d2   :  { %v763_v19 = vadd.f32 %v1334_v61, %v1809_v25 }
 0x1d3   :  { %v754_v29 = vpop.f32.mrf.mxu1 }
 0x1d4   :  { %v1171_v21 = vpack.c.bf16 %v763_v19, %v760_v16  ;;  %v755_v24 = vadd.f32 %v1809_v25, %v754_v29 }
 0x1d5   :  { %v1337_v56 = vpop.f32.mrf.mxu1 }
 0x1d6   :  { %1219 = vst [vmem:[%s1896_s5 + $0x38] sm:$0xff] %v1171_v21   ;;  %v1166_v26 = vpack.c.bf16 %v755_v24, %v752_v20  ;;  %v776_v31 = vadd.f32 %v1337_v56, %v1809_v25 }
 0x1d7   :  { %v767_v28 = vpop.f32.mrf.mxu1 }
 0x1d8   :  { %1218 = vst [vmem:[%s1896_s5 + $0x30] sm:$0xff] %v1166_v26   ;;  %v768_v40 = vadd.f32 %v1809_v25, %v767_v28 }
 0x1d9   :  { %v1338_v51 = vpop.f32.mrf.mxu1 }
 0x1da   :  { %v779_v32 = vadd.f32 %v1338_v51, %v1809_v25 }
 0x1db   :  { %v770_v35 = vpop.f32.mrf.mxu1 }
 0x1dc   :  { %v1181_v41 = vpack.c.bf16 %v779_v32, %v776_v31  ;;  %v771_v15 = vadd.f32 %v1809_v25, %v770_v35 }
 0x1de   :  { %1221 = vst [vmem:[%s1896_s5 + $0x48] sm:$0xff] %v1181_v41   ;;  %v1176_v8 = vpack.c.bf16 %v771_v15, %v768_v40 }
 0x1df   :  { %v1341_v23 = vpop.f32.mrf.mxu1 }
 0x1e0   :  { %1220 = vst [vmem:[%s1896_s5 + $0x40] sm:$0xff] %v1176_v8   ;;  %v792_v5 = vadd.f32 %v1341_v23, %v1809_v25 }
 0x1e1   :  { %v783_v43 = vpop.f32.mrf.mxu1 }
 0x1e2   :  { %v784_v50 = vadd.f32 %v1809_v25, %v783_v43 }
 0x1e3   :  { %v1342_v44 = vpop.f32.mrf.mxu1 }
 0x1e4   :  { %v795_v47 = vadd.f32 %v1342_v44, %v1809_v25 }
 0x1e5   :  { %v786_v49 = vpop.f32.mrf.mxu1 }
 0x1e6   :  { %v1191_v52 = vpack.c.bf16 %v795_v47, %v792_v5  ;;  %v787_v48 = vadd.f32 %v1809_v25, %v786_v49 }
 0x1e7   :  { %v1345_v45 = vpop.f32.mrf.mxu1 }
 0x1e8   :  { %1223 = vst [vmem:[%s1896_s5 + $0x58] sm:$0xff] %v1191_v52   ;;  %v1186_v53 = vpack.c.bf16 %v787_v48, %v784_v50  ;;  %v808_v34 = vadd.f32 %v1345_v45, %v1809_v25 }
 0x1e9   :  { %v799_v59 = vpop.f32.mrf.mxu1 }
 0x1ea   :  { %1222 = vst [vmem:[%s1896_s5 + $0x50] sm:$0xff] %v1186_v53   ;;  %v800_v18 = vadd.f32 %v1809_v25, %v799_v59 }
 0x1eb   :  { %v1346_v1 = vpop.f32.mrf.mxu1 }
 0x1ec   :  { %v811_v55 = vadd.f32 %v1346_v1, %v1809_v25 }
 0x1ed   :  { %v802_v57 = vpop.f32.mrf.mxu1 }
 0x1ee   :  { %v1201_v38 = vpack.c.bf16 %v811_v55, %v808_v34  ;;  %v803_v58 = vadd.f32 %v1809_v25, %v802_v57 }
 0x1ef   :  { %v1349_v2 = vpop.f32.mrf.mxu1 }
 0x1f0   :  { %1225 = vst [vmem:[%s1896_s5 + $0x68] sm:$0xff] %v1201_v38   ;;  %v1196_v42 = vpack.c.bf16 %v803_v58, %v800_v18  ;;  %v824_v60 = vadd.f32 %v1349_v2, %v1809_v25 }
 0x1f1   :  { %v815_v10 = vpop.f32.mrf.mxu1 }
 0x1f2   :  { %1224 = vst [vmem:[%s1896_s5 + $0x60] sm:$0xff] %v1196_v42   ;;  %v816_v12 = vadd.f32 %v1809_v25, %v815_v10 }
 0x1f3   :  { %v1350_v17 = vpop.f32.mrf.mxu1 }
 0x1f4   :  { %v827_v39 = vadd.f32 %v1350_v17, %v1809_v25 }
 0x1f5   :  { %v818_v62 = vpop.f32.mrf.mxu1 }
 0x1f6   :  { %v1211_v22 = vpack.c.bf16 %v827_v39, %v824_v60  ;;  %v819_v63 = vadd.f32 %v1809_v25, %v818_v62 }
 0x1f8   :  { %1227 = vst [vmem:[%s1896_s5 + $0x78] sm:$0xff] %v1211_v22   ;;  %v1206_v0 = vpack.c.bf16 %v819_v63, %v816_v12 }
 0x1fa   :  { %1226 = vst [vmem:[%s1896_s5 + $0x70] sm:$0xff] %v1206_v0  }

// kernel: gnn_forward.7
= control target key start
LH: loop header
LB: loop body
LE: loop exit
PB: predicated region body
PF: predicated region fallthrough
CT: control target
= control target key end

     0   :  { %s1750_s2 = inlined_call_operand.vmem [shape: bf16[128,128], index: 2, kind: input, shape index: {}]   ;;  %s1751_s1 = inlined_call_operand.vmem [shape: bf16[256,128], index: 1, kind: input, shape index: {}]   ;;  %s1752_s4 = inlined_call_operand.vmem [shape: bf16[128,128], index: 4, kind: input, shape index: {}]   ;;  %s1753_s3 = inlined_call_operand.vmem [shape: f32[1,128], index: 3, kind: input, shape index: {}]   ;;  %s1754_s0 = inlined_call_operand.vmem [shape: s32[1,256], index: 0, kind: input, shape index: {}]   ;;  %s1755_s5 = inlined_call_operand.vmem [shape: f32[1,128], index: 5, kind: input, shape index: {}]   ;;  %s1756_s6 = inlined_call_operand.vmem [shape: f32[8,128], index: 6, kind: output, shape index: {}]  }
   0x1   :  { %v1206_v0 = vld [vmem:[%s1750_s2 + $0x38] sm:$0xff]   ;;  %v1207_v1 = vld [vmem:[%s1750_s2 + $0x30] sm:$0xff]   ;;  %v1208_v2 = vld [vmem:[%s1750_s2 + $0x28] sm:$0xff]  }
   0x2   :  { %1108 = vmatprep.subr.bf16.mxu0 %v1206_v0  ;;  %v1209_v3 = vld [vmem:[%s1750_s2 + $0x20] sm:$0xff]   ;;  %v1210_v5 = vld [vmem:[%s1750_s2 + $0x18] sm:$0xff]   ;;  %v1211_v6 = vld [vmem:[%s1750_s2 + $0x10] sm:$0xff]  }
   0x3   :  { %1109 = vmatpush3.bf16.msra.mxu0 %v1206_v0  ;;  %v1214_v4 = vld [vmem:[%s1751_s1] sm:$0xff]   ;;  %v1212_v7 = vld [vmem:[%s1750_s2 + $0x8] sm:$0xff]   ;;  %v1216_v10 = vld [vmem:[%s1751_s1 + $0x10] sm:$0xff]  }
   0x4   :  { %1110 = vmatprep.subr.bf16.mxu0 %v1207_v1  ;;  %1124 = vmatprep.mubr.bf16.mxu0 %v1214_v4  ;;  %v1213_v8 = vld [vmem:[%s1750_s2] sm:$0xff]   ;;  %v1215_v9 = vld [vmem:[%s1751_s1 + $0x8] sm:$0xff]   ;;  %v1217_v11 = vld [vmem:[%s1751_s1 + $0x18] sm:$0xff]  }
   0x5   :  { %v1218_v12 = vld [vmem:[%s1751_s1 + $0x20] sm:$0xff]   ;;  %v1219_v13 = vld [vmem:[%s1751_s1 + $0x28] sm:$0xff]   ;;  %v1220_v14 = vld [vmem:[%s1751_s1 + $0x30] sm:$0xff]  }
   0x6   :  { %v1221_v15 = vld [vmem:[%s1751_s1 + $0x38] sm:$0xff]   ;;  %v1222_v16 = vld [vmem:[%s1751_s1 + $0x40] sm:$0xff]   ;;  %v1223_v17 = vld [vmem:[%s1751_s1 + $0x48] sm:$0xff]  }
   0x7   :  { %1111 = vmatpush3.bf16.msra.mxu0 %v1207_v1  ;;  %v1224_v18 = vld [vmem:[%s1751_s1 + $0x50] sm:$0xff]   ;;  %v1225_v19 = vld [vmem:[%s1751_s1 + $0x58] sm:$0xff]   ;;  %v1226_v20 = vld [vmem:[%s1751_s1 + $0x60] sm:$0xff]  }
   0x8   :  { %1112 = vmatprep.subr.bf16.mxu0 %v1208_v2  ;;  %v1227_v21 = vld [vmem:[%s1751_s1 + $0x68] sm:$0xff]   ;;  %v1228_v22 = vld [vmem:[%s1751_s1 + $0x70] sm:$0xff]   ;;  %v1229_v23 = vld [vmem:[%s1751_s1 + $0x78] sm:$0xff]  }
   0x9   :  { %v1230_v24 = vld [vmem:[%s1752_s4 + $0x38] sm:$0xff]   ;;  %v1231_v25 = vld [vmem:[%s1752_s4 + $0x30] sm:$0xff]   ;;  %v1232_v26 = vld [vmem:[%s1752_s4 + $0x28] sm:$0xff]  }
   0xa   :  { %1156 = vmatprep.subr.bf16.mxu1 %v1230_v24  ;;  %v1233_v27 = vld [vmem:[%s1752_s4 + $0x20] sm:$0xff]   ;;  %v1234_v28 = vld [vmem:[%s1752_s4 + $0x18] sm:$0xff]   ;;  %v1235_v29 = vld [vmem:[%s1752_s4 + $0x10] sm:$0xff]  }
   0xb   :  { %1113 = vmatpush3.bf16.msra.mxu0 %v1208_v2  ;;  %1157 = vmatpush3.bf16.msra.mxu1 %v1230_v24  ;;  %v1236_v30 = vld [vmem:[%s1752_s4 + $0x8] sm:$0xff]   ;;  %v1237_v31 = vld [vmem:[%s1752_s4] sm:$0xff]  }
   0xc   :  { %1114 = vmatprep.subr.bf16.mxu0 %v1209_v3  ;;  %1158 = vmatprep.subr.bf16.mxu1 %v1231_v25  ;;  %v1501_v32 = vld [vmem:[%s1753_s3] ss:$0 sm:$0xff] }
   0xf   :  { %1115 = vmatpush3.bf16.msra.mxu0 %v1209_v3  ;;  %1159 = vmatpush3.bf16.msra.mxu1 %v1231_v25 }
  0x10   :  { %1116 = vmatprep.subr.bf16.mxu0 %v1210_v5  ;;  %1160 = vmatprep.subr.bf16.mxu1 %v1232_v26 }
  0x13   :  { %1117 = vmatpush3.bf16.msra.mxu0 %v1210_v5  ;;  %1161 = vmatpush3.bf16.msra.mxu1 %v1232_v26 }
  0x14   :  { %1118 = vmatprep.subr.bf16.mxu0 %v1211_v6  ;;  %1162 = vmatprep.subr.bf16.mxu1 %v1233_v27 }
  0x17   :  { %1119 = vmatpush3.bf16.msra.mxu0 %v1211_v6  ;;  %1163 = vmatpush3.bf16.msra.mxu1 %v1233_v27 }
  0x18   :  { %1120 = vmatprep.subr.bf16.mxu0 %v1212_v7  ;;  %1164 = vmatprep.subr.bf16.mxu1 %v1234_v28 }
  0x1b   :  { %1121 = vmatpush3.bf16.msra.mxu0 %v1212_v7  ;;  %1165 = vmatpush3.bf16.msra.mxu1 %v1234_v28 }
  0x1c   :  { %1122 = vmatprep.subr.bf16.mxu0 %v1213_v8  ;;  %1166 = vmatprep.subr.bf16.mxu1 %v1235_v29 }
  0x1f   :  { %1123 = vmatpush3.bf16.msra.mxu0 %v1213_v8  ;;  %1167 = vmatpush3.bf16.msra.mxu1 %v1235_v29 }
  0x20   :  { %1168 = vmatprep.subr.bf16.mxu1 %v1236_v30 }
  0x22   :  { %1125 = vmatmul.mubr.bf16.vlgmr.msra.gmra.mxu0 %v1215_v9 }
  0x23   :  { %1128 = vmatprep.mubr.bf16.mxu0 %v1216_v10  ;;  %1169 = vmatpush3.bf16.msra.mxu1 %v1236_v30 }
  0x24   :  { %1170 = vmatprep.subr.bf16.mxu1 %v1237_v31 }
  0x27   :  { %1171 = vmatpush3.bf16.msra.mxu1 %v1237_v31 }
  0x2a   :  { %1129 = vmatmul.mubr.bf16.gmra.mxu0 %v1217_v11 }
  0x2b   :  { %1132 = vmatprep.mubr.bf16.mxu0 %v1218_v12 }
  0x32   :  { %1133 = vmatmul.mubr.bf16.gmra.mxu0 %v1219_v13 }
  0x33   :  { %1136 = vmatprep.mubr.bf16.mxu0 %v1220_v14 }
  0x3a   :  { %1137 = vmatmul.mubr.bf16.gmra.mxu0 %v1221_v15 }
  0x3b   :  { %1140 = vmatprep.mubr.bf16.mxu0 %v1222_v16 }
  0x42   :  { %1141 = vmatmul.mubr.bf16.gmra.mxu0 %v1223_v17 }
  0x43   :  { %1144 = vmatprep.mubr.bf16.mxu0 %v1224_v18 }
  0x4a   :  { %1145 = vmatmul.mubr.bf16.gmra.mxu0 %v1225_v19 }
  0x4b   :  { %1148 = vmatprep.mubr.bf16.mxu0 %v1226_v20 }
  0x52   :  { %1149 = vmatmul.mubr.bf16.gmra.mxu0 %v1227_v21 }
  0x53   :  { %1152 = vmatprep.mubr.bf16.mxu0 %v1228_v22 }
  0x5a   :  { %1153 = vmatmul.mubr.bf16.gmra.mxu0 %v1229_v23 }
  0xe2   :  { %v1126_v33 = vpop.f32.mrf.mxu0 }
  0xe3   :  { %v1504_v34 = vadd.f32 %v1126_v33, %v1501_v32 }
  0xe4   :  { %v262_v35 = vpop.f32.mrf.mxu0 }
  0xe5   :  { %v982_v36 = vmul.f32 -1.442695, %v1504_v34  ;;  %v1508_v37 = vadd.f32 %v1501_v32, %v262_v35 }
  0xe6   :  { %v1127_v38 = vpop.f32.mrf.mxu0 }
  0xe7   :  { %1238 = vpow2.f32 %v982_v36  ;;  %v980_v39 = vmul.f32 -1.442695, %v1508_v37  ;;  %v1512_v40 = vadd.f32 %v1127_v38, %v1501_v32 }
  0xe8   :  { %v265_v41 = vpop.f32.mrf.mxu0 }
  0xe9   :  { %1240 = vpow2.f32 %v980_v39  ;;  %v983_v42 = vmul.f32 -1.442695, %v1512_v40  ;;  %v1516_v43 = vadd.f32 %v1501_v32, %v265_v41 }
  0xea   :  { %v1130_v44 = vpop.f32.mrf.mxu0 }
  0xeb   :  { %1242 = vpow2.f32 %v983_v42  ;;  %v981_v45 = vmul.f32 -1.442695, %v1516_v43  ;;  %v1520_v46 = vadd.f32 %v1130_v44, %v1501_v32 }
  0xec   :  { %v278_v47 = vpop.f32.mrf.mxu0 }
  0xed   :  { %1244 = vpow2.f32 %v981_v45  ;;  %v986_v48 = vmul.f32 -1.442695, %v1520_v46  ;;  %v1524_v49 = vadd.f32 %v1501_v32, %v278_v47 }
  0xee   :  { %v1131_v50 = vpop.f32.mrf.mxu0 }
  0xef   :  { %1246 = vpow2.f32 %v986_v48  ;;  %v984_v51 = vmul.f32 -1.442695, %v1524_v49  ;;  %v1528_v52 = vadd.f32 %v1131_v50, %v1501_v32 }
  0xf0   :  { %v281_v53 = vpop.f32.mrf.mxu0 }
  0xf1   :  { %1248 = vpow2.f32 %v984_v51  ;;  %v987_v54 = vmul.f32 -1.442695, %v1528_v52  ;;  %v1532_v55 = vadd.f32 %v1501_v32, %v281_v53 }
  0xf2   :  { %v1134_v56 = vpop.f32.mrf.mxu0 }
  0xf3   :  { %1250 = vpow2.f32 %v987_v54  ;;  %v985_v57 = vmul.f32 -1.442695, %v1532_v55  ;;  %v1536_v58 = vadd.f32 %v1134_v56, %v1501_v32 }
  0xf4   :  { %v1239_v59 = vpop.eup %1238  ;;  %v294_v60 = vpop.f32.mrf.mxu0 }
  0xf5   :  { %v487_v61 = vadd.f32 1.0, %v1239_v59  ;;  %1252 = vpow2.f32 %v985_v57  ;;  %v990_v62 = vmul.f32 -1.442695, %v1536_v58  ;;  %v1540_v63 = vadd.f32 %v1501_v32, %v294_v60 }
  0xf6   :  { %v1241_v0 = vpop.eup %1240  ;;  %v1135_v1 = vpop.f32.mrf.mxu0 }
  0xf7   :  { %1254 = vrcp.f32 %v487_v61  ;;  %v485_v2 = vadd.f32 1.0, %v1241_v0  ;;  %v988_v3 = vmul.f32 -1.442695, %v1540_v63  ;;  %v1544_v4 = vadd.f32 %v1135_v1, %v1501_v32 }
  0xf8   :  { %v1243_v5 = vpop.eup %1242  ;;  %1256 = vpow2.f32 %v990_v62  ;;  %v297_v6 = vpop.f32.mrf.mxu0 }
  0xf9   :  { %1258 = vrcp.f32 %v485_v2  ;;  %v488_v7 = vadd.f32 1.0, %v1243_v5  ;;  %v991_v8 = vmul.f32 -1.442695, %v1544_v4  ;;  %v1548_v9 = vadd.f32 %v1501_v32, %v297_v6 }
  0xfa   :  { %v1245_v10 = vpop.eup %1244  ;;  %1260 = vpow2.f32 %v988_v3  ;;  %v1138_v11 = vpop.f32.mrf.mxu0 }
  0xfb   :  { %1262 = vrcp.f32 %v488_v7  ;;  %v486_v12 = vadd.f32 1.0, %v1245_v10  ;;  %v989_v13 = vmul.f32 -1.442695, %v1548_v9  ;;  %v1552_v14 = vadd.f32 %v1138_v11, %v1501_v32 }
  0xfc   :  { %v1247_v15 = vpop.eup %1246  ;;  %1264 = vpow2.f32 %v991_v8  ;;  %v310_v16 = vpop.f32.mrf.mxu0 }
  0xfd   :  { %1266 = vrcp.f32 %v486_v12  ;;  %v491_v17 = vadd.f32 1.0, %v1247_v15  ;;  %v994_v18 = vmul.f32 -1.442695, %v1552_v14  ;;  %v1556_v19 = vadd.f32 %v1501_v32, %v310_v16 }
  0xfe   :  { %v1249_v20 = vpop.eup %1248  ;;  %1268 = vpow2.f32 %v989_v13  ;;  %v1139_v21 = vpop.f32.mrf.mxu0 }
  0xff   :  { %1270 = vrcp.f32 %v491_v17  ;;  %v489_v22 = vadd.f32 1.0, %v1249_v20  ;;  %v992_v23 = vmul.f32 -1.442695, %v1556_v19  ;;  %v1560_v24 = vadd.f32 %v1139_v21, %v1501_v32 }
 0x100   :  { %v1251_v25 = vpop.eup %1250  ;;  %1272 = vpow2.f32 %v994_v18  ;;  %v313_v26 = vpop.f32.mrf.mxu0 }
 0x101   :  { %1274 = vrcp.f32 %v489_v22  ;;  %v492_v27 = vadd.f32 1.0, %v1251_v25  ;;  %v995_v28 = vmul.f32 -1.442695, %v1560_v24  ;;  %v1564_v29 = vadd.f32 %v1501_v32, %v313_v26 }
 0x102   :  { %v1253_v30 = vpop.eup %1252  ;;  %1276 = vpow2.f32 %v992_v23  ;;  %v1142_v31 = vpop.f32.mrf.mxu0 }
 0x103   :  { %1278 = vrcp.f32 %v492_v27  ;;  %v490_v33 = vadd.f32 1.0, %v1253_v30  ;;  %v993_v35 = vmul.f32 -1.442695, %v1564_v29  ;;  %v1568_v36 = vadd.f32 %v1142_v31, %v1501_v32 }
 0x104   :  { %v1255_v38 = vpop.eup %1254  ;;  %1280 = vpow2.f32 %v995_v28  ;;  %v326_v39 = vpop.f32.mrf.mxu0 }
 0x105   :  { %v1257_v41 = vpop.eup %1256  ;;  %1282 = vrcp.f32 %v490_v33  ;;  %v998_v42 = vmul.f32 -1.442695, %v1568_v36  ;;  %v1572_v44 = vadd.f32 %v1501_v32, %v326_v39 }
 0x106   :  { %v1259_v45 = vpop.eup %1258  ;;  %v495_v47 = vadd.f32 1.0, %v1257_v41  ;;  %1284 = vpow2.f32 %v993_v35  ;;  %v1143_v48 = vpop.f32.mrf.mxu0 }
 0x107   :  { %v1261_v50 = vpop.eup %1260  ;;  %1286 = vpow2.f32 %v998_v42  ;;  %v996_v51 = vmul.f32 -1.442695, %v1572_v44  ;;  %v1576_v53 = vadd.f32 %v1143_v48, %v1501_v32  ;;  %v581_v12 = vmul.f32 %v1259_v45, %v1508_v37 }
 0x108   :  { %v1263_v54 = vpop.eup %1262  ;;  %1288 = vrcp.f32 %v495_v47  ;;  %v493_v56 = vadd.f32 1.0, %v1261_v50  ;;  %v329_v57 = vpop.f32.mrf.mxu0 }
 0x109   :  { %v1265_v59 = vpop.eup %1264  ;;  %1290 = vpow2.f32 %v996_v51  ;;  %v999_v60 = vmul.f32 -1.442695, %v1576_v53  ;;  %v1580_v61 = vadd.f32 %v1501_v32, %v329_v57  ;;  %v584_v0 = vmul.f32 %v1263_v54, %v1512_v40 }
 0x10a   :  { %v1267_v62 = vpop.eup %1266  ;;  %1292 = vrcp.f32 %v493_v56  ;;  %v496_v1 = vadd.f32 1.0, %v1265_v59  ;;  %v1146_v2 = vpop.f32.mrf.mxu0  ;;  %v583_v40 = vmul.f32 %v1255_v38, %v1504_v34 }
 0x10b   :  { %v1269_v3 = vpop.eup %1268  ;;  %1294 = vpow2.f32 %v999_v60  ;;  %v997_v5 = vmul.f32 -1.442695, %v1580_v61  ;;  %v1585_v6 = vadd.f32 %v1146_v2, %v1501_v32  ;;  %v582_v7 = vmul.f32 %v1267_v62, %v1516_v43 }
 0x10c   :  { %v1271_v8 = vpop.eup %1270  ;;  %1296 = vrcp.f32 %v496_v1  ;;  %v494_v10 = vadd.f32 1.0, %v1269_v3  ;;  %v342_v11 = vpop.f32.mrf.mxu0  ;;  %v614_v23 = vpack.c.bf16 %v584_v0, %v583_v40 }
 0x10d   :  { %v1273_v13 = vpop.eup %1272  ;;  %1298 = vpow2.f32 %v997_v5  ;;  %v1002_v15 = vmul.f32 -1.442695, %v1585_v6  ;;  %v1592_v16 = vadd.f32 %v1501_v32, %v342_v11  ;;  %v613_v43 = vpack.c.bf16 %v582_v7, %v581_v12 }
 0x10e   :  { %v1275_v17 = vpop.eup %1274  ;;  %1300 = vrcp.f32 %v494_v10  ;;  %v499_v18 = vadd.f32 1.0, %v1273_v13  ;;  %v1147_v20 = vpop.f32.mrf.mxu0  ;;  %v587_v48 = vmul.f32 %v1271_v8, %v1520_v46 }
 0x10f   :  { %v1277_v21 = vpop.eup %1276  ;;  %1302 = vpow2.f32 %v1002_v15  ;;  %v1000_v22 = vmul.f32 -1.442695, %v1592_v16  ;;  %v1596_v37 = vadd.f32 %v1147_v20, %v1501_v32  ;;  %1172 = vmatprep.mubr.bf16.mxu1 %v613_v43  ;;  %v585_v50 = vmul.f32 %v1275_v17, %v1524_v49 }
 0x110   :  { %v1279_v34 = vpop.eup %1278  ;;  %1304 = vrcp.f32 %v499_v18  ;;  %v497_v25 = vadd.f32 1.0, %v1277_v21  ;;  %v345_v26 = vpop.f32.mrf.mxu0  ;;  %1173 = vmatmul.mubr.bf16.vlgmr.msra.gmra.mxu1 %v614_v23 }
 0x111   :  { %v1281_v27 = vpop.eup %1280  ;;  %1306 = vpow2.f32 %v1000_v22  ;;  %v1003_v28 = vmul.f32 -1.442695, %v1596_v37  ;;  %v1600_v30 = vadd.f32 %v1501_v32, %v345_v26  ;;  %v588_v33 = vmul.f32 %v1279_v34, %v1528_v52 }
 0x112   :  { %v1283_v31 = vpop.eup %1282  ;;  %1308 = vrcp.f32 %v497_v25  ;;  %v500_v35 = vadd.f32 1.0, %v1281_v27  ;;  %v1150_v38 = vpop.f32.mrf.mxu0 }
 0x113   :  { %v1285_v39 = vpop.eup %1284  ;;  %v586_v41 = vmul.f32 %v1283_v31, %v1532_v55  ;;  %1310 = vpow2.f32 %v1003_v28  ;;  %v1001_v42 = vmul.f32 -1.442695, %v1600_v30  ;;  %v1606_v45 = vadd.f32 %v1150_v38, %v1501_v32 }
 0x114   :  { %v1287_v47 = vpop.eup %1286  ;;  %1312 = vrcp.f32 %v500_v35  ;;  %v498_v51 = vadd.f32 1.0, %v1285_v39  ;;  %v358_v52 = vpop.f32.mrf.mxu0  ;;  %v616_v0 = vpack.c.bf16 %v588_v33, %v587_v48 }
 0x115   :  { %v1289_v54 = vpop.eup %1288  ;;  %v503_v56 = vadd.f32 1.0, %v1287_v47  ;;  %1314 = vpow2.f32 %v1001_v42  ;;  %v1006_v57 = vmul.f32 -1.442695, %v1606_v45  ;;  %v1612_v55 = vadd.f32 %v1501_v32, %v358_v52 }
 0x116   :  { %v1291_v59 = vpop.eup %1290  ;;  %1316 = vrcp.f32 %v498_v51  ;;  %v1151_v60 = vpop.f32.mrf.mxu0  ;;  %v615_v62 = vpack.c.bf16 %v586_v41, %v585_v50  ;;  %v591_v21 = vmul.f32 %v1289_v54, %v1536_v58 }
 0x117   :  { %v1293_v1 = vpop.eup %1292  ;;  %1318 = vrcp.f32 %v503_v56  ;;  %v501_v46 = vadd.f32 1.0, %v1291_v59  ;;  %v1004_v49 = vmul.f32 -1.442695, %v1612_v55  ;;  %v1616_v2 = vadd.f32 %v1151_v60, %v1501_v32 }
 0x118   :  { %v1295_v3 = vpop.eup %1294  ;;  %1320 = vpow2.f32 %v1006_v57  ;;  %1176 = vmatprep.mubr.bf16.mxu1 %v615_v62  ;;  %v361_v5 = vpop.f32.mrf.mxu0  ;;  %v589_v22 = vmul.f32 %v1293_v1, %v1540_v63 }
 0x119   :  { %v1297_v7 = vpop.eup %1296  ;;  %1322 = vrcp.f32 %v501_v46  ;;  %v504_v8 = vadd.f32 1.0, %v1295_v3  ;;  %v1007_v10 = vmul.f32 -1.442695, %v1616_v2  ;;  %v1620_v11 = vadd.f32 %v1501_v32, %v361_v5  ;;  %1177 = vmatmul.mubr.bf16.gmra.mxu1 %v616_v0 }
 0x11a   :  { %v1299_v12 = vpop.eup %1298  ;;  %v592_v13 = vmul.f32 %v1297_v7, %v1544_v4  ;;  %1324 = vpow2.f32 %v1004_v49  ;;  %v1154_v40 = vpop.f32.mrf.mxu0 }
 0x11b   :  { %v1301_v15 = vpop.eup %1300  ;;  %1326 = vrcp.f32 %v504_v8  ;;  %v502_v17 = vadd.f32 1.0, %v1299_v12  ;;  %v1005_v18 = vmul.f32 -1.442695, %v1620_v11  ;;  %v1625_v20 = vadd.f32 %v1154_v40, %v1501_v32 }
 0x11c   :  { %v1303_v43 = vpop.eup %1302  ;;  %v590_v23 = vmul.f32 %v1301_v15, %v1548_v9  ;;  %1328 = vpow2.f32 %v1007_v10  ;;  %v374_v34 = vpop.f32.mrf.mxu0  ;;  %v618_v35 = vpack.c.bf16 %v592_v13, %v591_v21 }
 0x11d   :  { %v1305_v4 = vpop.eup %1304  ;;  %1330 = vrcp.f32 %v502_v17  ;;  %v507_v25 = vadd.f32 1.0, %v1303_v43  ;;  %v1010_v26 = vmul.f32 -1.442695, %v1625_v20  ;;  %v1632_v27 = vadd.f32 %v1501_v32, %v374_v34 }
 0x11e   :  { %v1307_v28 = vpop.eup %1306  ;;  %1332 = vpow2.f32 %v1005_v18  ;;  %v1155_v31 = vpop.f32.mrf.mxu0  ;;  %v617_v33 = vpack.c.bf16 %v590_v23, %v589_v22 }
 0x11f   :  { %v1309_v58 = vpop.eup %1308  ;;  %1334 = vrcp.f32 %v507_v25  ;;  %v505_v63 = vadd.f32 1.0, %v1307_v28  ;;  %v1008_v9 = vmul.f32 -1.442695, %v1632_v27  ;;  %v1636_v38 = vadd.f32 %v1155_v31, %v1501_v32 }
 0x120   :  { %v1311_v39 = vpop.eup %1310  ;;  %1336 = vpow2.f32 %v1010_v26  ;;  %1180 = vmatprep.mubr.bf16.mxu1 %v617_v33  ;;  %v377_v41 = vpop.f32.mrf.mxu0  ;;  %v593_v60 = vmul.f32 %v1309_v58, %v1556_v19 }
 0x121   :  { %v1313_v42 = vpop.eup %1312  ;;  %1338 = vrcp.f32 %v505_v63  ;;  %v508_v47 = vadd.f32 1.0, %v1311_v39  ;;  %v1011_v48 = vmul.f32 -1.442695, %v1636_v38  ;;  %v1640_v50 = vadd.f32 %v1501_v32, %v377_v41  ;;  %1181 = vmatmul.mubr.bf16.gmra.mxu1 %v618_v35 }
 0x122   :  { %v1315_v51 = vpop.eup %1314  ;;  %1340 = vpow2.f32 %v1008_v9  ;;  %v596_v54 = vmul.f32 %v1313_v42, %v1560_v24  ;;  %v595_v32 = vmul.f32 %v1305_v4, %v1552_v14 }
 0x123   :  { %v1317_v52 = vpop.eup %1316  ;;  %1342 = vrcp.f32 %v508_v47  ;;  %v506_v56 = vadd.f32 1.0, %v1315_v51  ;;  %v1009_v57 = vmul.f32 -1.442695, %v1640_v50 }
 0x124   :  { %v1319_v59 = vpop.eup %1318  ;;  %v594_v62 = vmul.f32 %v1317_v52, %v1564_v29  ;;  %1344 = vpow2.f32 %v1011_v48  ;;  %v620_v3 = vpack.c.bf16 %v596_v54, %v595_v32  ;;  %v863_v32 = vld [vmem:[%s1754_s0] sm:$0x3] }
 0x125   :  { %v1321_v0 = vpop.eup %1320  ;;  %1346 = vrcp.f32 %v506_v56  ;;  %v599_v18 = vmul.f32 %v1319_v59, %v1568_v36 }
 0x126   :  { %v1323_v1 = vpop.eup %1322  ;;  %1348 = vpow2.f32 %v1009_v57  ;;  %v619_v46 = vpack.c.bf16 %v594_v62, %v593_v60  ;;  %v511_v8 = vadd.f32 1.0, %v1321_v0 }
 0x127   :  { %v1325_v49 = vpop.eup %1324  ;;  %v597_v29 = vmul.f32 %v1323_v1, %v1572_v44 }
 0x128   :  { %v1327_v24 = vpop.eup %1326  ;;  %v509_v5 = vadd.f32 1.0, %v1325_v49  ;;  %1184 = vmatprep.mubr.bf16.mxu1 %v619_v46 }
 0x129   :  { %v1329_v7 = vpop.eup %1328  ;;  %1185 = vmatmul.mubr.bf16.gmra.mxu1 %v620_v3  ;;  %v600_v13 = vmul.f32 %v1327_v24, %v1576_v53 }
 0x12a   :  { %v1331_v10 = vpop.eup %1330  ;;  %v512_v19 = vadd.f32 1.0, %v1329_v7  ;;  %1350 = vrcp.f32 %v509_v5 }
 0x12b   :  { %v1333_v12 = vpop.eup %1332  ;;  %v598_v14 = vmul.f32 %v1331_v10, %v1580_v61  ;;  %v622_v23 = vpack.c.bf16 %v600_v13, %v599_v18 }
 0x12c   :  { %v1335_v40 = vpop.eup %1334  ;;  %1352 = vrcp.f32 %v512_v19  ;;  %v510_v15 = vadd.f32 1.0, %v1333_v12 }
 0x12d   :  { %v1337_v17 = vpop.eup %1336  ;;  %1354 = vrcp.f32 %v511_v8  ;;  %v621_v43 = vpack.c.bf16 %v598_v14, %v597_v29  ;;  %v603_v35 = vmul.f32 %v1335_v40, %v1585_v6 }
 0x12e   :  { %v1339_v21 = vpop.eup %1338  ;;  %1356 = vrcp.f32 %v510_v15  ;;  %v515_v53 = vadd.f32 1.0, %v1337_v17 }
 0x12f   :  { %v1341_v22 = vpop.eup %1340  ;;  %1188 = vmatprep.mubr.bf16.mxu1 %v621_v43  ;;  %v601_v28 = vmul.f32 %v1339_v21, %v1592_v16 }
 0x130   :  { %v1343_v34 = vpop.eup %1342  ;;  %v513_v44 = vadd.f32 1.0, %v1341_v22 }
 0x131   :  { %v1345_v4 = vpop.eup %1344  ;;  %1189 = vmatmul.mubr.bf16.gmra.mxu1 %v622_v23  ;;  %v604_v31 = vmul.f32 %v1343_v34, %v1596_v37 }
 0x132   :  { %v1347_v61 = vpop.eup %1346  ;;  %v516_v25 = vadd.f32 1.0, %v1345_v4  ;;  %1358 = vrcp.f32 %v513_v44 }
 0x133   :  { %v1349_v26 = vpop.eup %1348  ;;  %v602_v36 = vmul.f32 %v1347_v61, %v1600_v30  ;;  %v624_v63 = vpack.c.bf16 %v604_v31, %v603_v35  ;;  %v1699_v31 = vld [vmem:[%s1755_s5] ss:$0 sm:$0xff] }
 0x134   :  { %1360 = vrcp.f32 %v516_v25  ;;  %v514_v33 = vadd.f32 1.0, %v1349_v26 }
 0x135   :  { %1362 = vrcp.f32 %v515_v53  ;;  %v623_v58 = vpack.c.bf16 %v602_v36, %v601_v28 }
 0x136   :  { %1364 = vrcp.f32 %v514_v33 }
 0x137   :  { %1192 = vmatprep.mubr.bf16.mxu1 %v623_v58  ;;  %v1351_v9 = vpop.eup %1350 }
 0x138   :  { %v605_v37 = vmul.f32 %v1351_v9, %v1612_v55 }
 0x139   :  { %v1353_v39 = vpop.eup %1352  ;;  %1193 = vmatmul.mubr.bf16.gmra.mxu1 %v624_v63 }
 0x13a   :  { %v1355_v41 = vpop.eup %1354  ;;  %v608_v16 = vmul.f32 %v1353_v39, %v1616_v2 }
 0x13b   :  { %v1357_v42 = vpop.eup %1356  ;;  %v607_v47 = vmul.f32 %v1355_v41, %v1606_v45  ;;  %v861_v45 = vlaneseq }
 0x13c   :  { %v606_v30 = vmul.f32 %v1357_v42, %v1620_v11 }
 0x13d   :  { %v626_v6 = vpack.c.bf16 %v608_v16, %v607_v47  ;;  %v1663_v62 = vshrl.u32 %v861_v45, 7 }
 0x13e   :  { %v625_v48 = vpack.c.bf16 %v606_v30, %v605_v37 }
 0x13f   :  { %v1359_v51 = vpop.eup %1358  ;;  %v870_v0 = vsub.s32 1, %v1663_v62 }
 0x140   :  { %1196 = vmatprep.mubr.bf16.mxu1 %v625_v48  ;;  %v609_v59 = vmul.f32 %v1359_v51, %v1632_v27 }
 0x141   :  { %v1361_v52 = vpop.eup %1360  ;;  %1197 = vmatmul.mubr.bf16.gmra.mxu1 %v626_v6  ;;  %v871_v27 = vrot.slane %v863_v32, %v870_v0 }
 0x142   :  { %v1363_v54 = vpop.eup %1362  ;;  %v612_v57 = vmul.f32 %v1361_v52, %v1636_v38  ;;  %v866_v38 = vsub.s32 0, %v1663_v62 }
 0x143   :  { %v1365_v56 = vpop.eup %1364  ;;  %v611_v55 = vmul.f32 %v1363_v54, %v1625_v20  ;;  %vm873_vm0 = vcmp.eq.s32.totalorder %v871_v27, %v1663_v62  ;;  %v1366_v20 = vmov 1.0  }
 0x144   :  { %v610_v2 = vmul.f32 %v1365_v56, %v1640_v50  ;;  %v1670_v1 = vrot.slane %v863_v32, %v866_v38  ;;  %1023 = vmatprep.mubr.msk.f32.mxu0 %vm873_vm0, %v1366_v20 }
 0x145   :  { %v628_v11 = vpack.c.bf16 %v612_v57, %v611_v55 }
 0x146   :  { %v627_v60 = vpack.c.bf16 %v610_v2, %v609_v59  ;;  %vm872_vm1 = vcmp.eq.s32.totalorder %v1670_v1, %v1663_v62 }
 0x148   :  { %1200 = vmatprep.mubr.bf16.mxu1 %v627_v60 }
 0x149   :  { %1201 = vmatmul.mubr.bf16.gmra.mxu1 %v628_v11 }
 0x1d0   :  { %v1676_v50 = vpop.f32.mrf.mxu1 }
 0x1d1   :  { %v743_v27 = vadd.f32 %v1676_v50, %v1699_v31 }
 0x1d2   :  { %v1678_v46 = vpop.f32.mrf.mxu1 }
 0x1d4   :  { %v1680_v49 = vpop.f32.mrf.mxu1 }
 0x1d5   :  { %v746_v32 = vadd.f32 %v1680_v49, %v1699_v31 }
 0x1d6   :  { %v1682_v3 = vpop.f32.mrf.mxu1 }
 0x1d9   :  { %v1684_v24 = vpop.f32.mrf.mxu1 }
 0x1da   :  { %v759_v2 = vadd.f32 %v1684_v24, %v1699_v31 }
 0x1db   :  { %v1686_v5 = vpop.f32.mrf.mxu1 }
 0x1dc   :  { %v751_v45 = vadd.f32 %v1699_v31, %v1686_v5  ;;  %v738_v5 = vadd.f32 %v1699_v31, %v1682_v3 }
 0x1dd   :  { %v1179_v7 = vpop.f32.mrf.mxu1 }
 0x1de   :  { %v762_v57 = vadd.f32 %v1179_v7, %v1699_v31  ;;  %v735_v7 = vadd.f32 %v1699_v31, %v1678_v46 }
 0x1df   :  { %v1688_v8 = vpop.f32.mrf.mxu1 }
 0x1e0   :  { %v754_v60 = vadd.f32 %v1699_v31, %v1688_v8 }
 0x1e1   :  { %v1182_v10 = vpop.f32.mrf.mxu1 }
 0x1e2   :  { %v775_v48 = vadd.f32 %v1182_v10, %v1699_v31 }
 0x1e3   :  { %v766_v19 = vpop.f32.mrf.mxu1 }
 0x1e4   :  { %v767_v54 = vadd.f32 %v1699_v31, %v766_v19 }
 0x1e5   :  { %v1183_v12 = vpop.f32.mrf.mxu1 }
 0x1e6   :  { %v778_v30 = vadd.f32 %v1183_v12, %v1699_v31 }
 0x1e7   :  { %v769_v29 = vpop.f32.mrf.mxu1 }
 0x1e8   :  { %v770_v51 = vadd.f32 %v1699_v31, %v769_v29 }
 0x1e9   :  { %v1186_v13 = vpop.f32.mrf.mxu1 }
 0x1ea   :  { %v791_v9 = vadd.f32 %v1186_v13, %v1699_v31 }
 0x1eb   :  { %v782_v14 = vpop.f32.mrf.mxu1 }
 0x1ec   :  { %v783_v16 = vadd.f32 %v1699_v31, %v782_v14 }
 0x1ed   :  { %v1187_v40 = vpop.f32.mrf.mxu1 }
 0x1ee   :  { %v794_v35 = vadd.f32 %v1187_v40, %v1699_v31 }
 0x1ef   :  { %v785_v15 = vpop.f32.mrf.mxu1 }
 0x1f0   :  { %v786_v41 = vadd.f32 %v1699_v31, %v785_v15 }
 0x1f1   :  { %v1690_v17 = vpop.f32.mrf.mxu1 }
 0x1f2   :  { %v807_v38 = vadd.f32 %v1690_v17, %v1699_v31 }
 0x1f3   :  { %v1692_v18 = vpop.f32.mrf.mxu1 }
 0x1f4   :  { %v799_v49 = vadd.f32 %v1699_v31, %v1692_v18 }
 0x1f5   :  { %v1191_v43 = vpop.f32.mrf.mxu1 }
 0x1f6   :  { %v810_v0 = vadd.f32 %v1191_v43, %v1699_v31 }
 0x1f7   :  { %v1694_v21 = vpop.f32.mrf.mxu1 }
 0x1f8   :  { %v802_v24 = vadd.f32 %v1699_v31, %v1694_v21 }
 0x1f9   :  { %v1194_v22 = vpop.f32.mrf.mxu1 }
 0x1fa   :  { %v823_v59 = vadd.f32 %v1194_v22, %v1699_v31 }
 0x1fb   :  { %v814_v23 = vpop.f32.mrf.mxu1 }
 0x1fc   :  { %v815_v11 = vadd.f32 %v1699_v31, %v814_v23 }
 0x1fd   :  { %v1195_v34 = vpop.f32.mrf.mxu1 }
 0x1fe   :  { %v826_v56 = vadd.f32 %v1195_v34, %v1699_v31 }
 0x1ff   :  { %v817_v44 = vpop.f32.mrf.mxu1 }
 0x200   :  { %v818_v55 = vadd.f32 %v1699_v31, %v817_v44 }
 0x201   :  { %v1198_v4 = vpop.f32.mrf.mxu1 }
 0x202   :  { %v839_v47 = vadd.f32 %v1198_v4, %v1699_v31 }
 0x203   :  { %v830_v53 = vpop.f32.mrf.mxu1 }
 0x204   :  { %v831_v52 = vadd.f32 %v1699_v31, %v830_v53 }
 0x205   :  { %v1199_v61 = vpop.f32.mrf.mxu1 }
 0x206   :  { %v842_v37 = vadd.f32 %v1199_v61, %v1699_v31 }
 0x207   :  { %v833_v25 = vpop.f32.mrf.mxu1 }
 0x208   :  { %v834_v6 = vadd.f32 %v1699_v31, %v833_v25 }
 0x209   :  { %v1202_v26 = vpop.f32.mrf.mxu1 }
 0x20a   :  { %v855_v63 = vadd.f32 %v1202_v26, %v1699_v31 }
 0x20b   :  { %v846_v28 = vpop.f32.mrf.mxu1 }
 0x20c   :  { %v847_v42 = vadd.f32 %v1699_v31, %v846_v28 }
 0x20d   :  { %v1203_v36 = vpop.f32.mrf.mxu1 }
 0x20e   :  { %v858_v33 = vadd.f32 %v1203_v36, %v1699_v31 }
 0x20f   :  { %v849_v58 = vpop.f32.mrf.mxu1 }
 0x210   :  { %1073 = vmatprep.subr.mxu0 %v858_v33  ;;  %v850_v39 = vadd.f32 %v1699_v31, %v849_v58 }
 0x211   :  { %1074 = vmatpush3.msra.mxu0 %v794_v35 }
 0x212   :  { %1075 = vmatprep.subr.mxu0 %v855_v63 }
 0x213   :  { %1076 = vmatpush3.msra.mxu0 %v791_v9 }
 0x214   :  { %1077 = vmatprep.subr.mxu0 %v850_v39 }
 0x215   :  { %1078 = vmatpush3.msra.mxu0 %v786_v41 }
 0x216   :  { %1079 = vmatprep.subr.mxu0 %v847_v42 }
 0x217   :  { %1080 = vmatpush3.msra.mxu0 %v783_v16 }
 0x218   :  { %1081 = vmatprep.subr.mxu0 %v842_v37 }
 0x219   :  { %1082 = vmatpush3.msra.mxu0 %v778_v30 }
 0x21a   :  { %1083 = vmatprep.subr.mxu0 %v839_v47 }
 0x21b   :  { %1084 = vmatpush3.msra.mxu0 %v775_v48 }
 0x21c   :  { %1085 = vmatprep.subr.mxu0 %v834_v6 }
 0x21d   :  { %1086 = vmatpush3.msra.mxu0 %v770_v51 }
 0x21e   :  { %1087 = vmatprep.subr.mxu0 %v831_v52 }
 0x21f   :  { %1088 = vmatpush3.msra.mxu0 %v767_v54 }
 0x220   :  { %1089 = vmatprep.subr.mxu0 %v826_v56 }
 0x221   :  { %1090 = vmatpush3.msra.mxu0 %v762_v57 }
 0x222   :  { %1091 = vmatprep.subr.mxu0 %v823_v59 }
 0x223   :  { %1092 = vmatpush3.msra.mxu0 %v759_v2 }
 0x224   :  { %1093 = vmatprep.subr.mxu0 %v818_v55 }
 0x225   :  { %1094 = vmatpush3.msra.mxu0 %v754_v60 }
 0x226   :  { %1095 = vmatprep.subr.mxu0 %v815_v11 }
 0x227   :  { %1096 = vmatpush3.msra.mxu0 %v751_v45 }
 0x228   :  { %1097 = vmatprep.subr.mxu0 %v810_v0 }
 0x229   :  { %1098 = vmatpush3.msra.mxu0 %v746_v32 }
 0x22a   :  { %1099 = vmatprep.subr.mxu0 %v807_v38 }
 0x22b   :  { %1100 = vmatpush3.msra.mxu0 %v743_v27 }
 0x22c   :  { %1101 = vmatprep.subr.mxu0 %v802_v24 }
 0x22d   :  { %1102 = vmatpush3.msra.mxu0 %v738_v5 }
 0x22e   :  { %1103 = vmatprep.subr.mxu0 %v799_v49 }
 0x22f   :  { %1104 = vmatpush3.msra.mxu0 %v735_v7 }
 0x230   :  { %1024 = vmatmul.mubr.msk.f32.vlgmr.msra.gmra.mxu0 %vm872_vm1, %v1366_v20 }
 0x2f0   :  { %v1105_v50 = vpop.f32.mrf.mxu0 }
 0x2f2   :  { %v1106_v8 = vpop.f32.mrf.mxu0 }
 0x2f3   :  { %v1107_v10 = vadd.f32 %v1106_v8, %v1105_v50 }
 0x2f5   :  { %950 = vst [vmem:[%s1756_s6] sm:$0xff] %v1107_v10 }

// kernel: gnn_forward.5
= control target key start
LH: loop header
LB: loop body
LE: loop exit
PB: predicated region body
PF: predicated region fallthrough
CT: control target
= control target key end

     0   :  { %s7298_s21 = smov 0   ;;  %s9155_s0 = inlined_call_operand.vmem [shape: s32[512,1], index: 0, kind: input, shape index: {}]   ;;  %s9156_s1 = inlined_call_operand.vmem [shape: s32[512,1], index: 1, kind: input, shape index: {}]   ;;  %s9157_s2 = inlined_call_operand.vmem [shape: s32[1,512], index: 2, kind: input, shape index: {}]   ;;  %s9158_s3 = inlined_call_operand.vmem [shape: bf16[256,128], index: 3, kind: input, shape index: {}]   ;;  %s9159_s4 = inlined_call_operand.vmem [shape: bf16[512,16], index: 4, kind: input, shape index: {}]   ;;  %s9160_s5 = inlined_call_operand.vmem [shape: bf16[128,128], index: 5, kind: input, shape index: {}]   ;;  %s9161_s6 = inlined_call_operand.vmem [shape: bf16[128,128], index: 6, kind: input, shape index: {}]   ;;  %s9162_s7 = inlined_call_operand.vmem [shape: bf16[16,128], index: 7, kind: input, shape index: {}]   ;;  %s9163_s8 = inlined_call_operand.vmem [shape: f32[1,128], index: 8, kind: input, shape index: {}]   ;;  %s9164_s9 = inlined_call_operand.vmem [shape: bf16[128,128], index: 9, kind: input, shape index: {}]   ;;  %s9165_s10 = inlined_call_operand.vmem [shape: f32[1,128], index: 10, kind: input, shape index: {}]   ;;  %s9166_s11 = inlined_call_operand.vmem [shape: bf16[128,128], index: 11, kind: input, shape index: {}]   ;;  %s9167_s12 = inlined_call_operand.vmem [shape: bf16[128,128], index: 12, kind: input, shape index: {}]   ;;  %s9168_s13 = inlined_call_operand.vmem [shape: f32[1,128], index: 13, kind: input, shape index: {}]   ;;  %s9169_s14 = inlined_call_operand.vmem [shape: bf16[128,128], index: 14, kind: input, shape index: {}]   ;;  %s9170_s15 = inlined_call_operand.vmem [shape: f32[1,128], index: 15, kind: input, shape index: {}]   ;;  %s9171_s16 = inlined_call_operand.vmem [shape: bf16[256,128], index: 16, kind: output, shape index: {}]  }
   0x1   :  { %9192 = sst [smem:[#allocation19_spill]] %s9155_s0 }
   0x2   :  { %9193 = sst [smem:[#allocation20_spill]] %s9168_s13 }
   0x3   :  { %9194 = sst [smem:[#allocation21_spill]] %s9170_s15 }
   0x4   :  { %9195 = sst [smem:[#allocation22_spill]] %s9171_s16 }
   0x5 LB: > { %9196 = sst [smem:[#allocation3_spill]] %s7208_s21  ;;  %s7304_s22 = sadd.s32 4294967295, %s7208_s21   ;;  %s7208_s21 = sphi %s7298_s21, %s26_s21  }
   0x6   : > { %p5121_p0 = scmp.ge.s32.totalorder %s7208_s21, 1  ;;  %p490_p1 = scmp.lt.s32.totalorder %s7208_s21, 3 }
   0x8   : > { %p491_p2 = pnand %p5121_p0, %p490_p1 }
   0xa   : > { %494 = sbr.rel (%p491_p2) target bundleno = 2029 (0x7ed), region = 84 }
   0xf   : > { %s5122_s23 = sshll.u32 %s7304_s22, 5  ;;  %s5126_s24 = sshll.u32 %s7304_s22, 1 }
  0x10   : > { %p550_p3 = scmp.lt.s32.totalorder %s5122_s23, 63  ;;  %p562_p4 = scmp.lt.s32.totalorder %s5126_s24, 3 }
  0x11   : > { %s9197_s29 = sld [smem:[#allocation19_spill]]  ;;  %p5129_p5 = scmp.ne.s32.totalorder %s7304_s22, 0 }
  0x12   : > { %s9292_s23 = smov (!%p550_p3, %s5122_s23), 63  ;;  %s9294_s24 = smov (!%p562_p4, %s5126_s24), 3 }
  0x13   : > { %s5123_s25 = sshll.u32 %s9292_s23, 3  ;;  %s5128_s26 = sshll.u32 %s9292_s23, 2 }
  0x14   : > { %s7320_s18 = scalar_lea.vmem %s9156_s1, %s5123_s25  ;;  %s564_s21 = scalar_lea.vmem %s9157_s2, %s9294_s24 }
  0x15   : > { %s7329_s13 = scalar_lea.vmem %s9159_s4, %s5128_s26  ;;  %576 = sbr.rel (%p5129_p5) target bundleno = 43 (0x2b), region = 88 }
  0x17   : > { %s7315_s30 = scalar_lea.vmem %s9197_s29, %s5123_s25 }
  0x1a   : > { %v7210_v0 = vmov 0.0  }
  0x1b   : > { %577 = vst [vmem:[#allocation2 + $0xb0] sm:$0xff] %v7210_v0  ;;  %578 = vst [vmem:[#allocation2] sm:$0xff] %v7210_v0 }
  0x1c   : > { %579 = vst [vmem:[#allocation2 + $0xd8] sm:$0xff] %v7210_v0  ;;  %580 = vst [vmem:[#allocation2 + $0x18] sm:$0xff] %v7210_v0 }
  0x1d   : > { %581 = vst [vmem:[#allocation2 + $0x50] sm:$0xff] %v7210_v0  ;;  %582 = vst [vmem:[#allocation2 + $0x68] sm:$0xff] %v7210_v0 }
  0x1e   : > { %583 = vst [vmem:[#allocation2 + $0x30] sm:$0xff] %v7210_v0  ;;  %584 = vst [vmem:[#allocation2 + $0x48] sm:$0xff] %v7210_v0 }
  0x1f   : > { %585 = vst [vmem:[#allocation2 + $0x80] sm:$0xff] %v7210_v0  ;;  %586 = vst [vmem:[#allocation2 + $0x88] sm:$0xff] %v7210_v0 }
  0x20   : > { %587 = vst [vmem:[#allocation2 + $0xe8] sm:$0xff] %v7210_v0  ;;  %588 = vst [vmem:[#allocation2 + $0xb8] sm:$0xff] %v7210_v0 }
  0x21   : > { %589 = vst [vmem:[#allocation2 + $0x60] sm:$0xff] %v7210_v0  ;;  %590 = vst [vmem:[#allocation2 + $0xf0] sm:$0xff] %v7210_v0 }
  0x22   : > { %591 = vst [vmem:[#allocation2 + $0x8] sm:$0xff] %v7210_v0  ;;  %592 = vst [vmem:[#allocation2 + $0x78] sm:$0xff] %v7210_v0 }
  0x23   : > { %593 = vst [vmem:[#allocation2 + $0x38] sm:$0xff] %v7210_v0  ;;  %594 = vst [vmem:[#allocation2 + $0x58] sm:$0xff] %v7210_v0 }
  0x24   : > { %595 = vst [vmem:[#allocation2 + $0x40] sm:$0xff] %v7210_v0  ;;  %596 = vst [vmem:[#allocation2 + $0xc8] sm:$0xff] %v7210_v0 }
  0x25   : > { %597 = vst [vmem:[#allocation2 + $0xe0] sm:$0xff] %v7210_v0  ;;  %598 = vst [vmem:[#allocation2 + $0x90] sm:$0xff] %v7210_v0 }
  0x26   : > { %599 = vst [vmem:[#allocation2 + $0x70] sm:$0xff] %v7210_v0  ;;  %600 = vst [vmem:[#allocation2 + $0xc0] sm:$0xff] %v7210_v0 }
  0x27   : > { %601 = vst [vmem:[#allocation2 + $0xa8] sm:$0xff] %v7210_v0  ;;  %602 = vst [vmem:[#allocation2 + $0xd0] sm:$0xff] %v7210_v0 }
  0x28   : > { %603 = vst [vmem:[#allocation2 + $0x10] sm:$0xff] %v7210_v0  ;;  %604 = vst [vmem:[#allocation2 + $0x28] sm:$0xff] %v7210_v0 }
  0x29   : > { %605 = vst [vmem:[#allocation2 + $0xa0] sm:$0xff] %v7210_v0  ;;  %606 = vst [vmem:[#allocation2 + $0xf8] sm:$0xff] %v7210_v0 }
  0x2a   : > { %607 = vst [vmem:[#allocation2 + $0x20] sm:$0xff] %v7210_v0  ;;  %608 = vst [vmem:[#allocation2 + $0x98] sm:$0xff] %v7210_v0 }
  0x2b PF: > { %v662_v1 = vld [vmem:[%s7315_s30 + $0x90] sm:$0xff]  ;;  %v660_v2 = vld [vmem:[%s7315_s30 + $0x80] sm:$0xff]  ;;  %v7211_v3 = vmov 0   ;;  %v663_v4 = vld [vmem:[%s7315_s30 + $0x98] sm:$0xff]  ;;  %p5653_p6 = scmp.ne.s32.totalorder %s7304_s22, 1 }
  0x2c   : > { %6736 = vset.pattern.permute.xlu1 %v7211_v3  ;;  %6735 = vset.pattern.permute.xlu0 %v7211_v3  ;;  %v661_v5 = vld [vmem:[%s7315_s30 + $0x88] sm:$0xff]  ;;  %v664_v7 = vld [vmem:[%s7315_s30 + $0xa0] sm:$0xff]  ;;  %v667_v8 = vld [vmem:[%s7315_s30 + $0xb8] sm:$0xff]  ;;  %s9287_s25 = sld [smem:[#allocation20_spill]] (!%p5653_p6) }
  0x2d   : > { %731 = vperm.xlu1 %6736, %v662_v1   ;;  %725 = vperm.xlu0 %6735, %v660_v2   ;;  %v665_v6 = vld [vmem:[%s7315_s30 + $0xa8] sm:$0xff]  ;;  %v666_v9 = vld [vmem:[%s7315_s30 + $0xb0] sm:$0xff]  ;;  %v668_v11 = vld [vmem:[%s7315_s30 + $0xc0] sm:$0xff]  ;;  %s9289_s28 = sld [smem:[#allocation22_spill]] (!%p5653_p6) }
  0x2e   : > { %v669_v10 = vld [vmem:[%s7315_s30 + $0xc8] sm:$0xff]  ;;  %v671_v12 = vld [vmem:[%s7315_s30 + $0xd8] sm:$0xff]  ;;  %v670_v14 = vld [vmem:[%s7315_s30 + $0xd0] sm:$0xff] }
  0x2f   : > { %v7346_v13 = vld [vmem:[%s9158_s3 + $0x78] sm:$0xff]   ;;  %v7359_v16 = vld [vmem:[%s9158_s3 + $0x70] sm:$0xff]   ;;  %v673_v18 = vld [vmem:[%s7315_s30 + $0xe8] sm:$0xff] }
  0x30   : > { %9198 = vst [vmem:[#allocation4_spill] sm:$0xff] %v7346_v13  ;;  %6692 = vmatprep.subr.bf16.mxu1 %v7346_v13  ;;  %v7353_v15 = vld [vmem:[%s9158_s3 + $0x38] sm:$0xff]   ;;  %5873 = vmatprep.subr.bf16.mxu0 %v7346_v13  ;;  %9200 = vst [vmem:[#allocation6_spill] sm:$0xff] %v7359_v16  ;;  %v7365_v17 = vld [vmem:[%s9158_s3 + $0x30] sm:$0xff]  }
  0x31   : > { %734 = vperm.xlu1 %6736, %v663_v4   ;;  %728 = vperm.xlu0 %6735, %v661_v5   ;;  %9199 = vst [vmem:[#allocation5_spill] sm:$0xff] %v7353_v15  ;;  %9201 = vst [vmem:[#allocation7_spill] sm:$0xff] %v7365_v17  ;;  %v672_v19 = vld [vmem:[%s7315_s30 + $0xe0] sm:$0xff]  ;;  %v7374_v20 = vld [vmem:[%s9158_s3 + $0x68] sm:$0xff]  }
  0x32   : > { %6700 = vmatpush3.bf16.msra.mxu1 %v7353_v15  ;;  %5874 = vmatpush3.bf16.msra.mxu0 %v7353_v15  ;;  %9202 = vst [vmem:[#allocation8_spill] sm:$0xff] %v7374_v20  ;;  %v675_v21 = vld [vmem:[%s7315_s30 + $0xf8] sm:$0xff]  ;;  %v7382_v22 = vld [vmem:[%s9158_s3 + $0x28] sm:$0xff]   ;;  %v674_v23 = vld [vmem:[%s7315_s30 + $0xf0] sm:$0xff] }
  0x33   : > { %6693 = vmatprep.subr.bf16.mxu1 %v7359_v16  ;;  %5875 = vmatprep.subr.bf16.mxu0 %v7359_v16  ;;  %9203 = vst [vmem:[#allocation9_spill] sm:$0xff] %v7382_v22  ;;  %v7390_v24 = vld [vmem:[%s9158_s3 + $0x60] sm:$0xff]   ;;  %v997_v26 = vld [vmem:[%s7320_s18 + $0x8] sm:$0xff]  ;;  %v7406_v28 = vld [vmem:[%s9158_s3 + $0x58] sm:$0xff]  }
  0x34   : > { %9204 = vst [vmem:[#allocation10_spill] sm:$0xff] %v7390_v24  ;;  %v7397_v25 = vld [vmem:[%s9158_s3 + $0x20] sm:$0xff]   ;;  %9206 = vst [vmem:[#allocation12_spill] sm:$0xff] %v7406_v28  ;;  %v999_v29 = vld [vmem:[%s7320_s18 + $0x18] sm:$0xff] }
  0x35   : > { %740 = vperm.xlu1 %6736, %v665_v6   ;;  %737 = vperm.xlu0 %6735, %v664_v7   ;;  %9205 = vst [vmem:[#allocation11_spill] sm:$0xff] %v7397_v25  ;;  %v996_v27 = vld [vmem:[%s7320_s18] sm:$0xff]  ;;  %v7414_v30 = vld [vmem:[%s9158_s3 + $0x18] sm:$0xff]   ;;  %v998_v31 = vld [vmem:[%s7320_s18 + $0x10] sm:$0xff] }
  0x36   : > { %6701 = vmatpush3.bf16.msra.mxu1 %v7365_v17  ;;  %5876 = vmatpush3.bf16.msra.mxu0 %v7365_v17  ;;  %9207 = vst [vmem:[#allocation13_spill] sm:$0xff] %v7414_v30  ;;  %v7422_v32 = vld [vmem:[%s9158_s3 + $0x50] sm:$0xff]   ;;  %v1001_v34 = vld [vmem:[%s7320_s18 + $0x28] sm:$0xff]  ;;  %v1000_v35 = vld [vmem:[%s7320_s18 + $0x20] sm:$0xff] }
  0x37   : > { %6694 = vmatprep.subr.bf16.mxu1 %v7374_v20  ;;  %5877 = vmatprep.subr.bf16.mxu0 %v7374_v20  ;;  %9208 = vst [vmem:[#allocation14_spill] sm:$0xff] %v7422_v32  ;;  %v7428_v33 = vld [vmem:[%s9158_s3 + $0x10] sm:$0xff]   ;;  %v7436_v36 = vld [vmem:[%s9158_s3 + $0x48] sm:$0xff]   ;;  %v1003_v38 = vld [vmem:[%s7320_s18 + $0x38] sm:$0xff] }
  0x38   : > { %9209 = vst [vmem:[#allocation15_spill] sm:$0xff] %v7428_v33  ;;  %9210 = vst [vmem:[#allocation16_spill] sm:$0xff] %v7436_v36  ;;  %v7443_v37 = vld [vmem:[%s9158_s3 + $0x8] sm:$0xff]   ;;  %v1002_v39 = vld [vmem:[%s7320_s18 + $0x30] sm:$0xff] }
  0x39   : > { %746 = vperm.xlu1 %6736, %v667_v8   ;;  %743 = vperm.xlu0 %6735, %v666_v9   ;;  %9211 = vst [vmem:[#allocation17_spill] sm:$0xff] %v7443_v37  ;;  %v7452_v40 = vld [vmem:[%s9158_s3 + $0x40] sm:$0xff]   ;;  %v1005_v42 = vld [vmem:[%s7320_s18 + $0x48] sm:$0xff]  ;;  %v1007_v44 = vld [vmem:[%s7320_s18 + $0x58] sm:$0xff] }
  0x3a   : > { %6702 = vmatpush3.bf16.msra.mxu1 %v7382_v22  ;;  %5878 = vmatpush3.bf16.msra.mxu0 %v7382_v22  ;;  %9212 = vst [vmem:[#allocation18_spill] sm:$0xff] %v7452_v40  ;;  %v7459_v41 = vld [vmem:[%s9158_s3] sm:$0xff]   ;;  %v1006_v45 = vld [vmem:[%s7320_s18 + $0x50] sm:$0xff]  ;;  %v1009_v46 = vld [vmem:[%s7320_s18 + $0x68] sm:$0xff] }
  0x3b   : > { %6695 = vmatprep.subr.bf16.mxu1 %v7390_v24  ;;  %5879 = vmatprep.subr.bf16.mxu0 %v7390_v24  ;;  %v1004_v43 = vld [vmem:[%s7320_s18 + $0x40] sm:$0xff]  ;;  %v1011_v48 = vld [vmem:[%s7320_s18 + $0x78] sm:$0xff]  ;;  %v1010_v49 = vld [vmem:[%s7320_s18 + $0x70] sm:$0xff] }
  0x3c   : > { %v1008_v47 = vld [vmem:[%s7320_s18 + $0x60] sm:$0xff]  ;;  %v1013_v50 = vld [vmem:[%s7320_s18 + $0x88] sm:$0xff]  ;;  %v1015_v52 = vld [vmem:[%s7320_s18 + $0x98] sm:$0xff] }
  0x3d   : > { %752 = vperm.xlu1 %6736, %v669_v10   ;;  %749 = vperm.xlu0 %6735, %v668_v11   ;;  %v1012_v51 = vld [vmem:[%s7320_s18 + $0x80] sm:$0xff]  ;;  %v1014_v53 = vld [vmem:[%s7320_s18 + $0x90] sm:$0xff]  ;;  %v1017_v54 = vld [vmem:[%s7320_s18 + $0xa8] sm:$0xff] }
  0x3e   : > { %6703 = vmatpush3.bf16.msra.mxu1 %v7397_v25  ;;  %5880 = vmatpush3.bf16.msra.mxu0 %v7397_v25  ;;  %v1016_v55 = vld [vmem:[%s7320_s18 + $0xa0] sm:$0xff]  ;;  %v1019_v56 = vld [vmem:[%s7320_s18 + $0xb8] sm:$0xff]  ;;  %v1018_v57 = vld [vmem:[%s7320_s18 + $0xb0] sm:$0xff] }
  0x3f   : > { %6696 = vmatprep.subr.bf16.mxu1 %v7406_v28  ;;  %5881 = vmatprep.subr.bf16.mxu0 %v7406_v28  ;;  %v645_v58 = vld [vmem:[%s7315_s30 + $0x8] sm:$0xff]  ;;  %v644_v59 = vld [vmem:[%s7315_s30] sm:$0xff]  ;;  %v647_v62 = vld [vmem:[%s7315_s30 + $0x18] sm:$0xff] }
  0x40   : > { %v1021_v60 = vld [vmem:[%s7320_s18 + $0xc8] sm:$0xff]  ;;  %v1020_v61 = vld [vmem:[%s7320_s18 + $0xc0] sm:$0xff]  ;;  %v646_v63 = vld [vmem:[%s7315_s30 + $0x10] sm:$0xff] }
  0x41   : > { %758 = vperm.xlu1 %6736, %v671_v12   ;;  %755 = vperm.xlu0 %6735, %v670_v14   ;;  %v1023_v0 = vld [vmem:[%s7320_s18 + $0xd8] sm:$0xff]  ;;  %v1022_v1 = vld [vmem:[%s7320_s18 + $0xd0] sm:$0xff]  ;;  %v649_v2 = vld [vmem:[%s7315_s30 + $0x28] sm:$0xff] }
  0x42   : > { %6704 = vmatpush3.bf16.msra.mxu1 %v7414_v30  ;;  %5882 = vmatpush3.bf16.msra.mxu0 %v7414_v30  ;;  %v648_v3 = vld [vmem:[%s7315_s30 + $0x20] sm:$0xff]  ;;  %v1025_v4 = vld [vmem:[%s7320_s18 + $0xe8] sm:$0xff]  ;;  %v651_v6 = vld [vmem:[%s7315_s30 + $0x38] sm:$0xff] }
  0x43   : > { %6697 = vmatprep.subr.bf16.mxu1 %v7422_v32  ;;  %5883 = vmatprep.subr.bf16.mxu0 %v7422_v32  ;;  %v1024_v5 = vld [vmem:[%s7320_s18 + $0xe0] sm:$0xff]  ;;  %v650_v7 = vld [vmem:[%s7315_s30 + $0x30] sm:$0xff]  ;;  %v1027_v8 = vld [vmem:[%s7320_s18 + $0xf8] sm:$0xff] }
  0x44   : > { %v1026_v9 = vld [vmem:[%s7320_s18 + $0xf0] sm:$0xff]  ;;  %v653_v10 = vld [vmem:[%s7315_s30 + $0x48] sm:$0xff]  ;;  %v652_v11 = vld [vmem:[%s7315_s30 + $0x40] sm:$0xff] }
  0x45   : > { %764 = vperm.xlu1 %6736, %v673_v18   ;;  %761 = vperm.xlu0 %6735, %v672_v19   ;;  %v655_v12 = vld [vmem:[%s7315_s30 + $0x58] sm:$0xff]  ;;  %v654_v14 = vld [vmem:[%s7315_s30 + $0x50] sm:$0xff]  ;;  %v657_v18 = vld [vmem:[%s7315_s30 + $0x68] sm:$0xff] }
  0x46   : > { %6705 = vmatpush3.bf16.msra.mxu1 %v7428_v33  ;;  %5884 = vmatpush3.bf16.msra.mxu0 %v7428_v33  ;;  %v656_v19 = vld [vmem:[%s7315_s30 + $0x60] sm:$0xff] }
  0x47   : > { %6698 = vmatprep.subr.bf16.mxu1 %v7436_v36  ;;  %5885 = vmatprep.subr.bf16.mxu0 %v7436_v36 }
  0x49   : > { %770 = vperm.xlu1 %6736, %v675_v21   ;;  %767 = vperm.xlu0 %6735, %v674_v23   ;;  %v9176_v21 = vlaneseq }
  0x4a   : > { %6706 = vmatpush3.bf16.msra.mxu1 %v7443_v37  ;;  %5886 = vmatpush3.bf16.msra.mxu0 %v7443_v37 }
  0x4b   : > { %6699 = vmatprep.subr.bf16.mxu1 %v7452_v40  ;;  %5887 = vmatprep.subr.bf16.mxu0 %v7452_v40  ;;  %v7508_v23 = vand.u32 127, %v9176_v21 }
  0x4d   : > { %1032 = vperm.xlu1 %6736, %v997_v26   ;;  %1029 = vperm.xlu0 %6735, %v996_v27   ;;  %v659_v26 = vld [vmem:[%s7315_s30 + $0x78] sm:$0xff]  ;;  %v658_v27 = vld [vmem:[%s7315_s30 + $0x70] sm:$0xff] }
  0x4e   : > { %6707 = vmatpush3.bf16.msra.mxu1 %v7459_v41  ;;  %5888 = vmatpush3.bf16.msra.mxu0 %v7459_v41 }
  0x4f   : > { %5985 = vmatprep.subr.bf16.mxu1 %v7346_v13 }
  0x51   : > { %1038 = vperm.xlu1 %6736, %v999_v29   ;;  %1035 = vperm.xlu0 %6735, %v998_v31  }
  0x55   : > { %1044 = vperm.xlu1 %6736, %v1001_v34   ;;  %1041 = vperm.xlu0 %6735, %v1000_v35   ;;  %v7513_v34 = vadd.s32 128, %v7508_v23 }
  0x59   : > { %1050 = vperm.xlu1 %6736, %v1003_v38   ;;  %1047 = vperm.xlu0 %6735, %v1002_v39  }
  0x5d   : > { %1056 = vperm.xlu1 %6736, %v1005_v42   ;;  %1053 = vperm.xlu0 %6735, %v1004_v43   ;;  %v9174_v43 = vmov 1.0|1.0  }
  0x61   : > { %1062 = vperm.xlu1 %6736, %v1007_v44   ;;  %1059 = vperm.xlu0 %6735, %v1006_v45  }
  0x65   : > { %1068 = vperm.xlu1 %6736, %v1009_v46   ;;  %1065 = vperm.xlu0 %6735, %v1008_v47  }
  0x69   : > { %1074 = vperm.xlu1 %6736, %v1011_v48   ;;  %1071 = vperm.xlu0 %6735, %v1010_v49  }
  0x6d   : > { %1080 = vperm.xlu1 %6736, %v1013_v50   ;;  %1077 = vperm.xlu0 %6735, %v1012_v51  }
  0x71   : > { %1086 = vperm.xlu1 %6736, %v1015_v52   ;;  %1083 = vperm.xlu0 %6735, %v1014_v53  }
  0x75   : > { %1092 = vperm.xlu1 %6736, %v1017_v54   ;;  %1089 = vperm.xlu0 %6735, %v1016_v55  }
  0x79   : > { %1098 = vperm.xlu1 %6736, %v1019_v56   ;;  %1095 = vperm.xlu0 %6735, %v1018_v57  }
  0x7d   : > { %680 = vperm.xlu1 %6736, %v645_v58   ;;  %677 = vperm.xlu0 %6735, %v644_v59  }
  0x81   : > { %1104 = vperm.xlu1 %6736, %v1021_v60   ;;  %1101 = vperm.xlu0 %6735, %v1020_v61  }
  0x85   : > { %686 = vperm.xlu1 %6736, %v647_v62   ;;  %683 = vperm.xlu0 %6735, %v646_v63  }
  0x89   : > { %1110 = vperm.xlu1 %6736, %v1023_v0   ;;  %1107 = vperm.xlu0 %6735, %v1022_v1  }
  0x8d   : > { %692 = vperm.xlu1 %6736, %v649_v2   ;;  %689 = vperm.xlu0 %6735, %v648_v3  }
  0x91   : > { %1116 = vperm.xlu1 %6736, %v1025_v4   ;;  %1113 = vperm.xlu0 %6735, %v1024_v5   ;;  %v9213_v4 = vmov 0 }
  0x95   : > { %698 = vperm.xlu1 %6736, %v651_v6   ;;  %695 = vperm.xlu0 %6735, %v650_v7   ;;  %v9215_v7 = vmov 0 }
  0x99   : > { %1122 = vperm.xlu1 %6736, %v1027_v8   ;;  %1119 = vperm.xlu0 %6735, %v1026_v9  }
  0x9d   : > { %704 = vperm.xlu1 %6736, %v653_v10   ;;  %701 = vperm.xlu0 %6735, %v652_v11   ;;  %v9217_v10 = vmov 0  ;;  %v9219_v11 = vmov 0 }
  0xa1   : > { %710 = vperm.xlu1 %6736, %v655_v12   ;;  %707 = vperm.xlu0 %6735, %v654_v14  }
  0xa5   : > { %716 = vperm.xlu1 %6736, %v657_v18   ;;  %713 = vperm.xlu0 %6735, %v656_v19   ;;  %v9221_v18 = vmov 0  ;;  %v9223_v19 = vmov 0 }
  0xa8   : > { %v732_v29 = vpop.permute.xlu1 %731  ;;  %v726_v31 = vpop.permute.xlu0 %725 }
  0xa9   : > { %722 = vperm.xlu1 %6736, %v659_v26   ;;  %719 = vperm.xlu0 %6735, %v658_v27   ;;  %vm809_vm0 = vcmp.eq.s32.totalorder %v732_v29, %v7513_v34  ;;  %vm804_vm4 = vcmp.eq.s32.totalorder %v726_v31, %v7508_v23  ;;  %vm805_vm7 = vcmp.eq.s32.totalorder %v726_v31, %v7513_v34  ;;  %v9227_v31 = vmov 0 }
  0xaa   : > { %vm808_vm9 = vcmp.eq.s32.totalorder %v732_v29, %v7508_v23  ;;  %v9225_v29 = vmov 0 }
  0xac   : > { %v735_v35 = vpop.permute.xlu1 %734  ;;  %v729_v38 = vpop.permute.xlu0 %728 }
  0xad   : > { %vm811_vm1 = vcmp.eq.s32.totalorder %v735_v35, %v7513_v34  ;;  %vm806_vm2 = vcmp.eq.s32.totalorder %v729_v38, %v7508_v23  ;;  %vm807_vm3 = vcmp.eq.s32.totalorder %v729_v38, %v7513_v34  ;;  %vm810_vm10 = vcmp.eq.s32.totalorder %v735_v35, %v7508_v23 }
  0xae   : > { %vm5310_vm5 = vmpackc.low %vm811_vm1, %vm809_vm0 }
  0xaf   : > { %vm5308_vm6 = vmpackc.low %vm806_vm2, %vm804_vm4 }
  0xb0   : > { %v741_v39 = vpop.permute.xlu1 %740  ;;  %v738_v42 = vpop.permute.xlu0 %737  ;;  %vm5306_vm8 = vmpackc.low %vm807_vm3, %vm805_vm7 }
  0xb1   : > { %5307 = vmatprep.mubr.msk.bf16.mxu1 %vm5306_vm8, %v9174_v43  ;;  %vm815_vm11 = vcmp.eq.s32.totalorder %v741_v39, %v7513_v34  ;;  %vm813_vm12 = vcmp.eq.s32.totalorder %v738_v42, %v7513_v34  ;;  %vm5312_vm13 = vmpackc.low %vm810_vm10, %vm808_vm9  ;;  %vm814_vm15 = vcmp.eq.s32.totalorder %v741_v39, %v7508_v23  ;;  %vm812_vm0 = vcmp.eq.s32.totalorder %v738_v42, %v7508_v23 }
  0xb2   : > { %5309 = vmatmul.mubr.msk.bf16.vlgmr.msra.gmra.mxu1 %vm5308_vm6, %v9174_v43  ;;  %vm5314_vm14 = vmpackc.low %vm815_vm11, %vm813_vm12  ;;  %v9229_v39 = vmov 0  ;;  %v9231_v42 = vmov 0 }
  0xb3   : > { %5311 = vmatprep.mubr.msk.bf16.mxu1 %vm5310_vm5, %v9174_v43  ;;  %5986 = vmatpush3.bf16.msra.mxu1 %v7353_v15  ;;  %vm5316_vm3 = vmpackc.low %vm814_vm15, %vm812_vm0 }
  0xb4   : > { %v747_v44 = vpop.permute.xlu1 %746  ;;  %v744_v45 = vpop.permute.xlu0 %743  ;;  %5987 = vmatprep.subr.bf16.mxu1 %v7359_v16 }
  0xb5   : > { %vm819_vm1 = vcmp.eq.s32.totalorder %v747_v44, %v7513_v34  ;;  %vm817_vm2 = vcmp.eq.s32.totalorder %v744_v45, %v7513_v34  ;;  %vm818_vm5 = vcmp.eq.s32.totalorder %v747_v44, %v7508_v23  ;;  %vm816_vm6 = vcmp.eq.s32.totalorder %v744_v45, %v7508_v23 }
  0xb6   : > { %vm5318_vm4 = vmpackc.low %vm819_vm1, %vm817_vm2 }
  0xb7   : > { %5988 = vmatpush3.bf16.msra.mxu1 %v7365_v17  ;;  %vm5320_vm9 = vmpackc.low %vm818_vm5, %vm816_vm6 }
  0xb8   : > { %v753_v46 = vpop.permute.xlu1 %752  ;;  %v750_v47 = vpop.permute.xlu0 %749  ;;  %5989 = vmatprep.subr.bf16.mxu1 %v7374_v20 }
  0xb9   : > { %vm823_vm7 = vcmp.eq.s32.totalorder %v753_v46, %v7513_v34  ;;  %vm821_vm8 = vcmp.eq.s32.totalorder %v750_v47, %v7513_v34  ;;  %vm822_vm11 = vcmp.eq.s32.totalorder %v753_v46, %v7508_v23  ;;  %vm820_vm12 = vcmp.eq.s32.totalorder %v750_v47, %v7508_v23 }
  0xba   : > { %5313 = vmatmul.mubr.msk.bf16.gmra.mxu1 %vm5312_vm13, %v9174_v43  ;;  %vm5322_vm10 = vmpackc.low %vm823_vm7, %vm821_vm8 }
  0xbb   : > { %5315 = vmatprep.mubr.msk.bf16.mxu1 %vm5314_vm14, %v9174_v43  ;;  %5990 = vmatpush3.bf16.msra.mxu1 %v7382_v22  ;;  %vm5324_vm15 = vmpackc.low %vm822_vm11, %vm820_vm12 }
  0xbc   : > { %v759_v48 = vpop.permute.xlu1 %758  ;;  %v756_v49 = vpop.permute.xlu0 %755  ;;  %5991 = vmatprep.subr.bf16.mxu1 %v7390_v24  ;;  %v8168_v24 = vld [vmem:[%s9163_s8] ss:$0 sm:$0xff] }
  0xbd   : > { %vm827_vm13 = vcmp.eq.s32.totalorder %v759_v48, %v7513_v34  ;;  %vm825_vm14 = vcmp.eq.s32.totalorder %v756_v49, %v7513_v34  ;;  %vm826_vm1 = vcmp.eq.s32.totalorder %v759_v48, %v7508_v23  ;;  %vm824_vm2 = vcmp.eq.s32.totalorder %v756_v49, %v7508_v23 }
  0xbe   : > { %vm5326_vm0 = vmpackc.low %vm827_vm13, %vm825_vm14  ;;  %v9233_v48 = vmov 0  ;;  %v9235_v49 = vmov 0 }
  0xbf   : > { %5992 = vmatpush3.bf16.msra.mxu1 %v7397_v25  ;;  %vm5328_vm5 = vmpackc.low %vm826_vm1, %vm824_vm2 }
  0xc0   : > { %v765_v50 = vpop.permute.xlu1 %764  ;;  %v762_v51 = vpop.permute.xlu0 %761  ;;  %5993 = vmatprep.subr.bf16.mxu1 %v7406_v28 }
  0xc1   : > { %vm830_vm7 = vcmp.eq.s32.totalorder %v765_v50, %v7508_v23  ;;  %vm828_vm8 = vcmp.eq.s32.totalorder %v762_v51, %v7508_v23 }
  0xc2   : > { %5317 = vmatmul.mubr.msk.bf16.gmra.mxu1 %vm5316_vm3, %v9174_v43  ;;  %vm831_vm3 = vcmp.eq.s32.totalorder %v765_v50, %v7513_v34  ;;  %vm5332_vm11 = vmpackc.low %vm830_vm7, %vm828_vm8 }
  0xc3   : > { %5319 = vmatprep.mubr.msk.bf16.mxu1 %vm5318_vm4, %v9174_v43  ;;  %5994 = vmatpush3.bf16.msra.mxu1 %v7414_v30  ;;  %vm829_vm4 = vcmp.eq.s32.totalorder %v762_v51, %v7513_v34 }
  0xc4   : > { %v7544_v52 = vpop.permute.xlu1 %770  ;;  %v7546_v53 = vpop.permute.xlu0 %767  ;;  %5995 = vmatprep.subr.bf16.mxu1 %v7422_v32  ;;  %vm5330_vm6 = vmpackc.low %vm831_vm3, %vm829_vm4 }
  0xc5   : > { %vm832_vm1 = vcmp.eq.s32.totalorder %v7546_v53, %v7508_v23 }
  0xc7   : > { %5996 = vmatpush3.bf16.msra.mxu1 %v7428_v33 }
  0xc8   : > { %v7554_v54 = vpop.permute.xlu1 %1032  ;;  %v7556_v55 = vpop.permute.xlu0 %1029  ;;  %5997 = vmatprep.subr.bf16.mxu1 %v7436_v36 }
  0xc9   : > { %vm1127_vm4 = vcmp.eq.s32.totalorder %v7554_v54, %v7513_v34 }
  0xca   : > { %5321 = vmatmul.mubr.msk.bf16.gmra.mxu1 %vm5320_vm9, %v9174_v43  ;;  %vm835_vm9 = vcmp.eq.s32.totalorder %v7544_v52, %v7513_v34 }
  0xcb   : > { %5323 = vmatprep.mubr.msk.bf16.mxu1 %vm5322_vm10, %v9174_v43  ;;  %5998 = vmatpush3.bf16.msra.mxu1 %v7443_v37  ;;  %vm833_vm10 = vcmp.eq.s32.totalorder %v7546_v53, %v7513_v34 }
  0xcc   : > { %v7562_v56 = vpop.permute.xlu1 %1038  ;;  %v7564_v57 = vpop.permute.xlu0 %1035  ;;  %5999 = vmatprep.subr.bf16.mxu1 %v7452_v40  ;;  %vm5334_vm14 = vmpackc.low %vm835_vm9, %vm833_vm10 }
  0xcf   : > { %6000 = vmatpush3.bf16.msra.mxu1 %v7459_v41 }
  0xd0   : > { %v7572_v58 = vpop.permute.xlu1 %1044  ;;  %v7574_v59 = vpop.permute.xlu0 %1041 }
  0xd2   : > { %5325 = vmatmul.mubr.msk.bf16.gmra.mxu1 %vm5324_vm15, %v9174_v43 }
  0xd3   : > { %5327 = vmatprep.mubr.msk.bf16.mxu1 %vm5326_vm0, %v9174_v43  ;;  %vm834_vm0 = vcmp.eq.s32.totalorder %v7544_v52, %v7508_v23 }
  0xd4   : > { %v7579_v60 = vpop.permute.xlu1 %1050  ;;  %v7581_v61 = vpop.permute.xlu0 %1047  ;;  %vm5336_vm7 = vmpackc.low %vm834_vm0, %vm832_vm1  ;;  %vm1126_vm0 = vcmp.eq.s32.totalorder %v7554_v54, %v7508_v23  ;;  %vm1124_vm1 = vcmp.eq.s32.totalorder %v7556_v55, %v7508_v23  ;;  %v9237_v54 = vmov 0 }
  0xd8   : > { %v7587_v62 = vpop.permute.xlu1 %1056  ;;  %v7589_v63 = vpop.permute.xlu0 %1053 }
  0xda   : > { %5329 = vmatmul.mubr.msk.bf16.gmra.mxu1 %vm5328_vm5, %v9174_v43  ;;  %vm1125_vm5 = vcmp.eq.s32.totalorder %v7556_v55, %v7513_v34  ;;  %v9239_v55 = vmov 0 }
  0xdb   : > { %5331 = vmatprep.mubr.msk.bf16.mxu1 %vm5330_vm6, %v9174_v43  ;;  %vm5338_vm8 = vmpackc.low %vm1127_vm4, %vm1125_vm5 }
  0xdc   : > { %v7593_v0 = vpop.permute.xlu1 %1062  ;;  %v7595_v1 = vpop.permute.xlu0 %1059 }
  0xe0   : > { %v7603_v2 = vpop.permute.xlu1 %1068  ;;  %v7605_v3 = vpop.permute.xlu0 %1065 }
  0xe1   : > { %vm1150_vm12 = vcmp.eq.s32.totalorder %v7603_v2, %v7508_v23  ;;  %vm1148_vm13 = vcmp.eq.s32.totalorder %v7605_v3, %v7508_v23 }
  0xe2   : > { %vm7611_vm15 = vmpackc.low %vm1150_vm12, %vm1148_vm13  ;;  %5333 = vmatmul.mubr.msk.bf16.gmra.mxu1 %vm5332_vm11, %v9174_v43 }
  0xe3   : > { %v9214_v4 = vsel %vm7611_vm15, 4294967295, %v9213_v4  ;;  %5335 = vmatprep.mubr.msk.bf16.mxu1 %vm5334_vm14, %v9174_v43 }
  0xe4   : > { %v7617_v5 = vpop.permute.xlu1 %1074  ;;  %v7619_v6 = vpop.permute.xlu0 %1071 }
  0xe5   : > { %vm1154_vm2 = vcmp.eq.s32.totalorder %v7617_v5, %v7508_v23  ;;  %vm1152_vm3 = vcmp.eq.s32.totalorder %v7619_v6, %v7508_v23 }
  0xe6   : > { %vm7633_vm6 = vmpackc.low %vm1154_vm2, %vm1152_vm3 }
  0xe7   : > { %v9216_v7 = vsel %vm7633_vm6, 4294967295, %v9215_v7 }
  0xe8   : > { %v1081_v8 = vpop.permute.xlu1 %1080  ;;  %v1078_v9 = vpop.permute.xlu0 %1077 }
  0xe9   : > { %vm1158_vm9 = vcmp.eq.s32.totalorder %v1081_v8, %v7508_v23  ;;  %vm1159_vm10 = vcmp.eq.s32.totalorder %v1081_v8, %v7513_v34  ;;  %vm1156_vm11 = vcmp.eq.s32.totalorder %v1078_v9, %v7508_v23  ;;  %vm1157_vm12 = vcmp.eq.s32.totalorder %v1078_v9, %v7513_v34 }
  0xea   : > { %vm7641_vm13 = vmpackc.low %vm1159_vm10, %vm1157_vm12  ;;  %5337 = vmatmul.mubr.msk.bf16.gmra.mxu1 %vm5336_vm7, %v9174_v43  ;;  %vm1131_vm7 = vcmp.eq.s32.totalorder %v7562_v56, %v7513_v34 }
  0xeb   : > { %v9218_v10 = vsel %vm7641_vm13, 4294967295, %v9217_v10  ;;  %vm7645_vm14 = vmpackc.low %vm1158_vm9, %vm1156_vm11  ;;  %5339 = vmatprep.mubr.msk.bf16.mxu1 %vm5338_vm8, %v9174_v43  ;;  %vm1129_vm9 = vcmp.eq.s32.totalorder %v7564_v57, %v7513_v34 }
  0xec   : > { %v9220_v11 = vsel %vm7645_vm14, 4294967295, %v9219_v11  ;;  %v1087_v12 = vpop.permute.xlu1 %1086  ;;  %v1084_v14 = vpop.permute.xlu0 %1083  ;;  %vm5340_vm11 = vmpackc.low %vm1126_vm0, %vm1124_vm1  ;;  %vm1130_vm0 = vcmp.eq.s32.totalorder %v7562_v56, %v7508_v23  ;;  %vm1128_vm1 = vcmp.eq.s32.totalorder %v7564_v57, %v7508_v23 }
  0xed   : > { %vm1162_vm2 = vcmp.eq.s32.totalorder %v1087_v12, %v7508_v23  ;;  %vm1163_vm3 = vcmp.eq.s32.totalorder %v1087_v12, %v7513_v34  ;;  %vm1160_vm4 = vcmp.eq.s32.totalorder %v1084_v14, %v7508_v23  ;;  %vm1161_vm5 = vcmp.eq.s32.totalorder %v1084_v14, %v7513_v34  ;;  %vm5342_vm12 = vmpackc.low %vm1131_vm7, %vm1129_vm9 }
  0xee   : > { %vm7663_vm10 = vmpackc.low %vm1163_vm3, %vm1161_vm5  ;;  %vm1133_vm5 = vcmp.eq.s32.totalorder %v7574_v59, %v7513_v34 }
  0xef   : > { %v9222_v18 = vsel %vm7663_vm10, 4294967295, %v9221_v18  ;;  %vm7667_vm8 = vmpackc.low %vm1162_vm2, %vm1160_vm4  ;;  %vm1135_vm4 = vcmp.eq.s32.totalorder %v7572_v58, %v7513_v34 }
  0xf0   : > { %v9224_v19 = vsel %vm7667_vm8, 4294967295, %v9223_v19  ;;  %v1093_v26 = vpop.permute.xlu1 %1092  ;;  %v1090_v27 = vpop.permute.xlu0 %1089 }
  0xf1   : > { %vm1166_vm14 = vcmp.eq.s32.totalorder %v1093_v26, %v7508_v23  ;;  %vm1167_vm13 = vcmp.eq.s32.totalorder %v1093_v26, %v7513_v34  ;;  %vm1164_vm6 = vcmp.eq.s32.totalorder %v1090_v27, %v7508_v23  ;;  %vm1165_vm15 = vcmp.eq.s32.totalorder %v1090_v27, %v7513_v34 }
  0xf2   : > { %vm7675_vm3 = vmpackc.low %vm1167_vm13, %vm1165_vm15  ;;  %5341 = vmatmul.mubr.msk.bf16.vlgmr.msra.gmra.mxu1 %vm5340_vm11, %v9174_v43 }
  0xf3   : > { %v9226_v29 = vsel %vm7675_vm3, 4294967295, %v9225_v29  ;;  %vm7679_vm2 = vmpackc.low %vm1166_vm14, %vm1164_vm6  ;;  %5343 = vmatprep.mubr.msk.bf16.mxu1 %vm5342_vm12, %v9174_v43 }
  0xf4   : > { %v9228_v31 = vsel %vm7679_vm2, 4294967295, %v9227_v31  ;;  %v1099_v35 = vpop.permute.xlu1 %1098  ;;  %v1096_v38 = vpop.permute.xlu0 %1095  ;;  %vm5344_vm11 = vmpackc.low %vm1130_vm0, %vm1128_vm1  ;;  %vm1132_vm0 = vcmp.eq.s32.totalorder %v7574_v59, %v7508_v23 }
  0xf5   : > { %vm1170_vm15 = vcmp.eq.s32.totalorder %v1099_v35, %v7508_v23  ;;  %vm1171_vm13 = vcmp.eq.s32.totalorder %v1099_v35, %v7513_v34  ;;  %vm1168_vm6 = vcmp.eq.s32.totalorder %v1096_v38, %v7508_v23  ;;  %vm1169_vm14 = vcmp.eq.s32.totalorder %v1096_v38, %v7513_v34  ;;  %vm5346_vm12 = vmpackc.low %vm1135_vm4, %vm1133_vm5  ;;  %v6755_v38 = vld [vmem:[%s9161_s6 + $0x28] sm:$0xff]  }
  0xf6   : > { %vm7697_vm7 = vmpackc.low %vm1171_vm13, %vm1169_vm14 }
  0xf7   : > { %v9230_v39 = vsel %vm7697_vm7, 4294967295, %v9229_v39  ;;  %vm7701_vm9 = vmpackc.low %vm1170_vm15, %vm1168_vm6  ;;  %vm1134_vm15 = vcmp.eq.s32.totalorder %v7572_v58, %v7508_v23 }
  0xf8   : > { %v9232_v42 = vsel %vm7701_vm9, 4294967295, %v9231_v42  ;;  %v681_v44 = vpop.permute.xlu1 %680  ;;  %v678_v45 = vpop.permute.xlu0 %677 }
  0xf9   : > { %vm774_vm2 = vcmp.eq.s32.totalorder %v681_v44, %v7508_v23  ;;  %vm772_vm3 = vcmp.eq.s32.totalorder %v678_v45, %v7508_v23  ;;  %vm773_vm8 = vcmp.eq.s32.totalorder %v678_v45, %v7513_v34  ;;  %vm775_vm10 = vcmp.eq.s32.totalorder %v681_v44, %v7513_v34  ;;  %v6762_v44 = vld [vmem:[%s9161_s6 + $0x8] sm:$0xff]   ;;  %v6763_v45 = vld [vmem:[%s9160_s5 + $0x20] sm:$0xff]  }
  0xfa   : > { %vm5276_vm13 = vmpackc.low %vm774_vm2, %vm772_vm3  ;;  %5345 = vmatmul.mubr.msk.bf16.gmra.mxu1 %vm5344_vm11, %v9174_v43  ;;  %vm1137_vm2 = vcmp.eq.s32.totalorder %v7581_v61, %v7513_v34 }
  0xfb   : > { %vm5274_vm14 = vmpackc.low %vm775_vm10, %vm773_vm8  ;;  %5347 = vmatprep.mubr.msk.bf16.mxu1 %vm5346_vm12, %v9174_v43  ;;  %vm1139_vm8 = vcmp.eq.s32.totalorder %v7579_v60, %v7513_v34 }
  0xfc   : > { %5275 = vmatprep.mubr.msk.bf16.mxu0 %vm5274_vm14, %v9174_v43  ;;  %v1105_v46 = vpop.permute.xlu1 %1104  ;;  %v1102_v47 = vpop.permute.xlu0 %1101  ;;  %vm5348_vm11 = vmpackc.low %vm1134_vm15, %vm1132_vm0  ;;  %vm1138_vm15 = vcmp.eq.s32.totalorder %v7579_v60, %v7508_v23  ;;  %vm1136_vm0 = vcmp.eq.s32.totalorder %v7581_v61, %v7508_v23  ;;  %v9241_v60 = vmov 0  ;;  %v9243_v61 = vmov 0 }
  0xfd   : > { %vm1174_vm1 = vcmp.eq.s32.totalorder %v1105_v46, %v7508_v23  ;;  %vm1175_vm6 = vcmp.eq.s32.totalorder %v1105_v46, %v7513_v34  ;;  %vm1172_vm3 = vcmp.eq.s32.totalorder %v1102_v47, %v7508_v23  ;;  %vm1173_vm10 = vcmp.eq.s32.totalorder %v1102_v47, %v7513_v34  ;;  %5277 = vmatmul.mubr.msk.bf16.vlgmr.msra.gmra.mxu0 %vm5276_vm13, %v9174_v43  ;;  %vm5350_vm12 = vmpackc.low %vm1139_vm8, %vm1137_vm2  ;;  %v6766_v46 = vld [vmem:[%s9160_s5 + $0x10] sm:$0xff]   ;;  %v6767_v47 = vld [vmem:[%s9160_s5 + $0x8] sm:$0xff]  }
  0xfe   : > { %vm7725_vm4 = vmpackc.low %vm1175_vm6, %vm1173_vm10 }
  0xff   : > { %v9234_v48 = vsel %vm7725_vm4, 4294967295, %v9233_v48  ;;  %vm7729_vm5 = vmpackc.low %vm1174_vm1, %vm1172_vm3 }
 0x100   : > { %v9236_v49 = vsel %vm7729_vm5, 4294967295, %v9235_v49  ;;  %v687_v50 = vpop.permute.xlu1 %686  ;;  %v684_v51 = vpop.permute.xlu0 %683 }
 0x101   : > { %vm778_vm13 = vcmp.eq.s32.totalorder %v687_v50, %v7508_v23  ;;  %vm779_vm14 = vcmp.eq.s32.totalorder %v687_v50, %v7513_v34  ;;  %vm776_vm6 = vcmp.eq.s32.totalorder %v684_v51, %v7508_v23  ;;  %vm777_vm10 = vcmp.eq.s32.totalorder %v684_v51, %v7513_v34 }
 0x102   : > { %vm5278_vm4 = vmpackc.low %vm779_vm14, %vm777_vm10  ;;  %5349 = vmatmul.mubr.msk.bf16.gmra.mxu1 %vm5348_vm11, %v9174_v43 }
 0x103   : > { %vm5280_vm1 = vmpackc.low %vm778_vm13, %vm776_vm6  ;;  %5279 = vmatprep.mubr.msk.bf16.mxu0 %vm5278_vm4, %v9174_v43  ;;  %5351 = vmatprep.mubr.msk.bf16.mxu1 %vm5350_vm12, %v9174_v43  ;;  %vm1143_vm4 = vcmp.eq.s32.totalorder %v7587_v62, %v7513_v34  ;;  %vm1141_vm13 = vcmp.eq.s32.totalorder %v7589_v63, %v7513_v34 }
 0x104   : > { %v1111_v52 = vpop.permute.xlu1 %1110  ;;  %v1108_v53 = vpop.permute.xlu0 %1107  ;;  %vm5352_vm6 = vmpackc.low %vm1138_vm15, %vm1136_vm0  ;;  %vm1142_vm15 = vcmp.eq.s32.totalorder %v7587_v62, %v7508_v23  ;;  %vm1140_vm0 = vcmp.eq.s32.totalorder %v7589_v63, %v7508_v23 }
 0x105   : > { %vm1178_vm3 = vcmp.eq.s32.totalorder %v1111_v52, %v7508_v23  ;;  %vm1179_vm8 = vcmp.eq.s32.totalorder %v1111_v52, %v7513_v34  ;;  %vm1176_vm2 = vcmp.eq.s32.totalorder %v1108_v53, %v7508_v23  ;;  %vm1177_vm11 = vcmp.eq.s32.totalorder %v1108_v53, %v7513_v34  ;;  %5281 = vmatmul.mubr.msk.bf16.gmra.mxu0 %vm5280_vm1, %v9174_v43  ;;  %vm5354_vm10 = vmpackc.low %vm1143_vm4, %vm1141_vm13 }
 0x106   : > { %vm7756_vm14 = vmpackc.low %vm1179_vm8, %vm1177_vm11  ;;  %vm1145_vm4 = vcmp.eq.s32.totalorder %v7595_v1, %v7513_v34 }
 0x107   : > { %v9238_v54 = vsel %vm7756_vm14, 4294967295, %v9237_v54  ;;  %vm7760_vm12 = vmpackc.low %vm1178_vm3, %vm1176_vm2 }
 0x108   : > { %v9240_v55 = vsel %vm7760_vm12, 4294967295, %v9239_v55  ;;  %v693_v56 = vpop.permute.xlu1 %692  ;;  %v690_v57 = vpop.permute.xlu0 %689 }
 0x109   : > { %vm782_vm1 = vcmp.eq.s32.totalorder %v693_v56, %v7508_v23  ;;  %vm783_vm5 = vcmp.eq.s32.totalorder %v693_v56, %v7513_v34  ;;  %vm780_vm9 = vcmp.eq.s32.totalorder %v690_v57, %v7508_v23  ;;  %vm781_vm7 = vcmp.eq.s32.totalorder %v690_v57, %v7513_v34 }
 0x10a   : > { %vm5282_vm8 = vmpackc.low %vm783_vm5, %vm781_vm7  ;;  %5353 = vmatmul.mubr.msk.bf16.gmra.mxu1 %vm5352_vm6, %v9174_v43  ;;  %vm1147_vm5 = vcmp.eq.s32.totalorder %v7593_v0, %v7513_v34 }
 0x10b   : > { %vm5284_vm11 = vmpackc.low %vm782_vm1, %vm780_vm9  ;;  %5283 = vmatprep.mubr.msk.bf16.mxu0 %vm5282_vm8, %v9174_v43  ;;  %5355 = vmatprep.mubr.msk.bf16.mxu1 %vm5354_vm10, %v9174_v43 }
 0x10c   : > { %v1117_v58 = vpop.permute.xlu1 %1116  ;;  %v1114_v59 = vpop.permute.xlu0 %1113  ;;  %vm5356_vm10 = vmpackc.low %vm1142_vm15, %vm1140_vm0  ;;  %vm1146_vm15 = vcmp.eq.s32.totalorder %v7593_v0, %v7508_v23  ;;  %vm1144_vm0 = vcmp.eq.s32.totalorder %v7595_v1, %v7508_v23 }
 0x10d   : > { %vm1182_vm3 = vcmp.eq.s32.totalorder %v1117_v58, %v7508_v23  ;;  %vm1183_vm2 = vcmp.eq.s32.totalorder %v1117_v58, %v7513_v34  ;;  %vm1180_vm7 = vcmp.eq.s32.totalorder %v1114_v59, %v7508_v23  ;;  %vm1181_vm9 = vcmp.eq.s32.totalorder %v1114_v59, %v7513_v34  ;;  %5285 = vmatmul.mubr.msk.bf16.gmra.mxu0 %vm5284_vm11, %v9174_v43  ;;  %vm5358_vm1 = vmpackc.low %vm1147_vm5, %vm1145_vm4 }
 0x10e   : > { %vm7784_vm13 = vmpackc.low %vm1183_vm2, %vm1181_vm9  ;;  %vm1151_vm5 = vcmp.eq.s32.totalorder %v7603_v2, %v7513_v34  ;;  %vm1149_vm4 = vcmp.eq.s32.totalorder %v7605_v3, %v7513_v34 }
 0x10f   : > { %v9242_v60 = vsel %vm7784_vm13, 4294967295, %v9241_v60  ;;  %vm7788_vm6 = vmpackc.low %vm1182_vm3, %vm1180_vm7 }
 0x110   : > { %v9244_v61 = vsel %vm7788_vm6, 4294967295, %v9243_v61  ;;  %v699_v62 = vpop.permute.xlu1 %698  ;;  %v696_v63 = vpop.permute.xlu0 %695 }
 0x111   : > { %vm786_vm8 = vcmp.eq.s32.totalorder %v699_v62, %v7508_v23  ;;  %vm787_vm11 = vcmp.eq.s32.totalorder %v699_v62, %v7513_v34  ;;  %vm784_vm12 = vcmp.eq.s32.totalorder %v696_v63, %v7508_v23  ;;  %vm785_vm14 = vcmp.eq.s32.totalorder %v696_v63, %v7513_v34 }
 0x112   : > { %vm5286_vm2 = vmpackc.low %vm787_vm11, %vm785_vm14  ;;  %5357 = vmatmul.mubr.msk.bf16.gmra.mxu1 %vm5356_vm10, %v9174_v43 }
 0x113   : > { %vm5288_vm9 = vmpackc.low %vm786_vm8, %vm784_vm12  ;;  %5287 = vmatprep.mubr.msk.bf16.mxu0 %vm5286_vm2, %v9174_v43  ;;  %5359 = vmatprep.mubr.msk.bf16.mxu1 %vm5358_vm1, %v9174_v43 }
 0x114   : > { %v1123_v8 = vpop.permute.xlu1 %1122  ;;  %v1120_v9 = vpop.permute.xlu0 %1119  ;;  %vm5360_vm8 = vmpackc.low %vm1146_vm15, %vm1144_vm0 }
 0x115   : > { %vm1186_vm3 = vcmp.eq.s32.totalorder %v1123_v8, %v7508_v23  ;;  %vm1187_vm7 = vcmp.eq.s32.totalorder %v1123_v8, %v7513_v34  ;;  %vm1184_vm14 = vcmp.eq.s32.totalorder %v1120_v9, %v7508_v23  ;;  %vm1185_vm12 = vcmp.eq.s32.totalorder %v1120_v9, %v7513_v34  ;;  %5289 = vmatmul.mubr.msk.bf16.gmra.mxu0 %vm5288_vm9, %v9174_v43  ;;  %vm5362_vm11 = vmpackc.low %vm1151_vm5, %vm1149_vm4 }
 0x116   : > { %vm7812_vm10 = vmpackc.low %vm1187_vm7, %vm1185_vm12 }
 0x117   : > { %vm7816_vm1 = vmpackc.low %vm1186_vm3, %vm1184_vm14 }
 0x118   : > { %v705_v12 = vpop.permute.xlu1 %704  ;;  %v702_v14 = vpop.permute.xlu0 %701 }
 0x119   : > { %vm790_vm2 = vcmp.eq.s32.totalorder %v705_v12, %v7508_v23  ;;  %vm791_vm9 = vcmp.eq.s32.totalorder %v705_v12, %v7513_v34  ;;  %vm788_vm6 = vcmp.eq.s32.totalorder %v702_v14, %v7508_v23  ;;  %vm789_vm13 = vcmp.eq.s32.totalorder %v702_v14, %v7513_v34 }
 0x11a   : > { %vm5290_vm7 = vmpackc.low %vm791_vm9, %vm789_vm13  ;;  %5361 = vmatmul.mubr.msk.bf16.gmra.mxu1 %vm5360_vm8, %v9174_v43  ;;  %vm1155_vm13 = vcmp.eq.s32.totalorder %v7617_v5, %v7513_v34  ;;  %v6753_v5 = vld [vmem:[%s9161_s6 + $0x38] sm:$0xff]  }
 0x11b   : > { %vm5292_vm12 = vmpackc.low %vm790_vm2, %vm788_vm6  ;;  %5291 = vmatprep.mubr.msk.bf16.mxu0 %vm5290_vm7, %v9174_v43  ;;  %5363 = vmatprep.mubr.msk.bf16.mxu1 %vm5362_vm11, %v9174_v43  ;;  %vm1153_vm6 = vcmp.eq.s32.totalorder %v7619_v6, %v7513_v34  ;;  %vm9249_vm2 = vnez %v9214_v4  ;;  %v6754_v4 = vld [vmem:[%s9161_s6 + $0x30] sm:$0xff]  }
 0x11c   : > { %v711_v2 = vpop.permute.xlu1 %710  ;;  %v708_v3 = vpop.permute.xlu0 %707  ;;  %vm5366_vm11 = vmpackc.low %vm1155_vm13, %vm1153_vm6  ;;  %6370 = vmatprep.subr.bf16.mxu0 %v6753_v5  ;;  %vm9250_vm13 = vnez %v9216_v7  ;;  %v6757_v7 = vld [vmem:[%s9160_s5 + $0x38] sm:$0xff]  }
 0x11d   : > { %vm795_vm15 = vcmp.eq.s32.totalorder %v711_v2, %v7513_v34  ;;  %vm793_vm0 = vcmp.eq.s32.totalorder %v708_v3, %v7513_v34  ;;  %5293 = vmatmul.mubr.msk.bf16.gmra.mxu0 %vm5292_vm12, %v9174_v43  ;;  %vm794_vm14 = vcmp.eq.s32.totalorder %v711_v2, %v7508_v23  ;;  %vm792_vm5 = vcmp.eq.s32.totalorder %v708_v3, %v7508_v23 }
 0x11e   : > { %vm5294_vm3 = vmpackc.low %vm795_vm15, %vm793_vm0  ;;  %6371 = vmatpush3.bf16.msra.mxu0 %v6753_v5  ;;  %6418 = vmatprep.subr.bf16.mxu1 %v6757_v7 }
 0x11f   : > { %5295 = vmatprep.mubr.msk.bf16.mxu0 %vm5294_vm3, %v9174_v43  ;;  %vm5296_vm9 = vmpackc.low %vm794_vm14, %vm792_vm5  ;;  %6372 = vmatprep.subr.bf16.mxu0 %v6754_v4  ;;  %vm9251_vm14 = vnez %v9218_v10  ;;  %v6758_v10 = vld [vmem:[%s9161_s6 + $0x18] sm:$0xff]  }
 0x120   : > { %v717_v26 = vpop.permute.xlu1 %716  ;;  %v714_v27 = vpop.permute.xlu0 %713  ;;  %6419 = vmatpush3.bf16.msra.mxu1 %v6757_v7 }
 0x121   : > { %vm799_vm4 = vcmp.eq.s32.totalorder %v717_v26, %v7513_v34  ;;  %vm797_vm8 = vcmp.eq.s32.totalorder %v714_v27, %v7513_v34  ;;  %vm798_vm12 = vcmp.eq.s32.totalorder %v717_v26, %v7508_v23  ;;  %vm796_vm15 = vcmp.eq.s32.totalorder %v714_v27, %v7508_v23 }
 0x122   : > { %5365 = vmatmul.mubr.msk.bf16.gmra.mxu1 %vm9249_vm2, %v9174_v43  ;;  %vm5298_vm7 = vmpackc.low %vm799_vm4, %vm797_vm8  ;;  %6373 = vmatpush3.bf16.msra.mxu0 %v6754_v4 }
 0x123   : > { %5367 = vmatprep.mubr.msk.bf16.mxu1 %vm5366_vm11, %v9174_v43  ;;  %vm5300_vm6 = vmpackc.low %vm798_vm12, %vm796_vm15  ;;  %6374 = vmatprep.subr.bf16.mxu0 %v6755_v38  ;;  %vm9252_vm11 = vnez %v9220_v11  ;;  %v6760_v11 = vld [vmem:[%s9161_s6 + $0x10] sm:$0xff]   ;;  %vm9255_vm12 = vnez %v9226_v29  ;;  %v6765_v29 = vld [vmem:[%s9160_s5 + $0x18] sm:$0xff]   ;;  %vm9256_vm15 = vnez %v9228_v31 }
 0x124   : > { %v723_v6 = vpop.permute.xlu1 %722  ;;  %v720_v35 = vpop.permute.xlu0 %719  ;;  %v6768_v31 = vld [vmem:[%s9160_s5] sm:$0xff]  }
 0x125   : > { %5297 = vmatmul.mubr.msk.bf16.gmra.mxu0 %vm5296_vm9, %v9174_v43  ;;  %vm803_vm0 = vcmp.eq.s32.totalorder %v723_v6, %v7513_v34  ;;  %vm801_vm3 = vcmp.eq.s32.totalorder %v720_v35, %v7513_v34  ;;  %v6756_v34 = vld [vmem:[%s9161_s6 + $0x20] sm:$0xff]   ;;  %vm802_vm4 = vcmp.eq.s32.totalorder %v723_v6, %v7508_v23  ;;  %vm800_vm8 = vcmp.eq.s32.totalorder %v720_v35, %v7508_v23  ;;  %v6759_v23 = vld [vmem:[%s9160_s5 + $0x30] sm:$0xff]  }
 0x126   : > { %5299 = vmatprep.mubr.msk.bf16.mxu0 %vm5298_vm7, %v9174_v43  ;;  %vm5302_vm5 = vmpackc.low %vm803_vm0, %vm801_vm3  ;;  %6375 = vmatpush3.bf16.msra.mxu0 %v6755_v38  ;;  %vm9253_vm9 = vnez %v9222_v18  ;;  %v6761_v18 = vld [vmem:[%s9160_s5 + $0x28] sm:$0xff]   ;;  %vm9254_vm7 = vnez %v9224_v19  ;;  %v6764_v19 = vld [vmem:[%s9161_s6] sm:$0xff]   ;;  %vm9257_vm0 = vnez %v9230_v39  ;;  %vm9258_vm3 = vnez %v9232_v42 }
 0x127   : > { %6376 = vmatprep.subr.bf16.mxu0 %v6756_v34  ;;  %vm5304_vm2 = vmpackc.low %vm802_vm4, %vm800_vm8  ;;  %6420 = vmatprep.subr.bf16.mxu1 %v6759_v23  ;;  %vm9263_vm4 = vnez %v9242_v60  ;;  %vm9264_vm8 = vnez %v9244_v61 }
 0x128   : > { %6421 = vmatpush3.bf16.msra.mxu1 %v6759_v23 }
 0x129   : > { %6422 = vmatprep.subr.bf16.mxu1 %v6761_v18 }
 0x12a   : > { %5369 = vmatmul.mubr.msk.bf16.gmra.mxu1 %vm9250_vm13, %v9174_v43  ;;  %6377 = vmatpush3.bf16.msra.mxu0 %v6756_v34  ;;  %vm9259_vm13 = vnez %v9234_v48 }
 0x12b   : > { %5371 = vmatprep.mubr.msk.bf16.mxu1 %vm9251_vm14, %v9174_v43  ;;  %6378 = vmatprep.subr.bf16.mxu0 %v6758_v10  ;;  %vm9261_vm14 = vnez %v9238_v54 }
 0x12c   : > { %6423 = vmatpush3.bf16.msra.mxu1 %v6761_v18  ;;  %v6769_v18 = vld [vmem:[%s9162_s7] sm:$0xff]  }
 0x12d   : > { %5301 = vmatmul.mubr.msk.bf16.gmra.mxu0 %vm5300_vm6, %v9174_v43  ;;  %6424 = vmatprep.subr.bf16.mxu1 %v6763_v45  ;;  %vm9260_vm6 = vnez %v9236_v49 }
 0x12e   : > { %5303 = vmatprep.mubr.msk.bf16.mxu0 %vm5302_vm5, %v9174_v43  ;;  %6379 = vmatpush3.bf16.msra.mxu0 %v6758_v10  ;;  %vm9262_vm5 = vnez %v9240_v55 }
 0x12f   : > { %6380 = vmatprep.subr.bf16.mxu0 %v6760_v11 }
 0x130   : > { %6425 = vmatpush3.bf16.msra.mxu1 %v6763_v45 }
 0x131   : > { %6426 = vmatprep.subr.bf16.mxu1 %v6765_v29 }
 0x132   : > { %5373 = vmatmul.mubr.msk.bf16.gmra.mxu1 %vm9252_vm11, %v9174_v43  ;;  %6381 = vmatpush3.bf16.msra.mxu0 %v6760_v11 }
 0x133   : > { %5375 = vmatprep.mubr.msk.bf16.mxu1 %vm9253_vm9, %v9174_v43  ;;  %6382 = vmatprep.subr.bf16.mxu0 %v6762_v44 }
 0x134   : > { %6427 = vmatpush3.bf16.msra.mxu1 %v6765_v29 }
 0x135   : > { %5305 = vmatmul.mubr.msk.bf16.gmra.mxu0 %vm5304_vm2, %v9174_v43  ;;  %6428 = vmatprep.subr.bf16.mxu1 %v6766_v46 }
 0x136   : > { %6383 = vmatpush3.bf16.msra.mxu0 %v6762_v44 }
 0x137   : > { %6384 = vmatprep.subr.bf16.mxu0 %v6764_v19 }
 0x138   : > { %6429 = vmatpush3.bf16.msra.mxu1 %v6766_v46 }
 0x139   : > { %6430 = vmatprep.subr.bf16.mxu1 %v6767_v47 }
 0x13a   : > { %5377 = vmatmul.mubr.msk.bf16.gmra.mxu1 %vm9254_vm7, %v9174_v43  ;;  %6385 = vmatpush3.bf16.msra.mxu0 %v6764_v19 }
 0x13b   : > { %5379 = vmatprep.mubr.msk.bf16.mxu1 %vm9255_vm12, %v9174_v43  ;;  %6466 = vmatprep.subr.bf16.mxu0 %v6769_v18 }
 0x13c   : > { %6431 = vmatpush3.bf16.msra.mxu1 %v6767_v47 }
 0x13d   : > { %6432 = vmatprep.subr.bf16.mxu1 %v6768_v31 }
 0x140   : > { %6433 = vmatpush3.bf16.msra.mxu1 %v6768_v31 }
 0x142   : > { %5381 = vmatmul.mubr.msk.bf16.gmra.mxu1 %vm9256_vm15, %v9174_v43 }
 0x143   : > { %5383 = vmatprep.mubr.msk.bf16.mxu1 %vm9257_vm0, %v9174_v43 }
 0x14a   : > { %5385 = vmatmul.mubr.msk.bf16.gmra.mxu1 %vm9258_vm3, %v9174_v43 }
 0x14b   : > { %5387 = vmatprep.mubr.msk.bf16.mxu1 %vm9259_vm13, %v9174_v43 }
 0x152   : > { %5389 = vmatmul.mubr.msk.bf16.gmra.mxu1 %vm9260_vm6, %v9174_v43 }
 0x153   : > { %5391 = vmatprep.mubr.msk.bf16.mxu1 %vm9261_vm14, %v9174_v43 }
 0x15a   : > { %5393 = vmatmul.mubr.msk.bf16.gmra.mxu1 %vm9262_vm5, %v9174_v43 }
 0x15b   : > { %5395 = vmatprep.mubr.msk.bf16.mxu1 %vm9263_vm4, %v9174_v43 }
 0x162   : > { %5397 = vmatmul.mubr.msk.bf16.gmra.mxu1 %vm9264_vm8, %v9174_v43 }
 0x163   : > { %5399 = vmatprep.mubr.msk.bf16.mxu1 %vm7812_vm10, %v9174_v43  ;;  %vm2368_vm10 = vcmask 130048  }
 0x16a   : > { %5401 = vmatmul.mubr.msk.bf16.gmra.mxu1 %vm7816_vm1, %v9174_v43 }
 0x172   : > { %v5937_v39 = vpop.f32.mrf.mxu1 }
 0x174   : > { %v5938_v42 = vpop.f32.mrf.mxu1 }
 0x175   : > { %v7953_v48 = vadd.f32 %v5938_v42, %v5937_v39 }
 0x176   : > { %v5940_v49 = vpop.f32.mrf.mxu1 }
 0x178   : > { %v5941_v50 = vpop.f32.mrf.mxu1 }
 0x179   : > { %v7955_v51 = vadd.f32 %v5941_v50, %v5940_v49 }
 0x17a   : > { %v5943_v52 = vpop.f32.mrf.mxu1 }
 0x17b   : > { %v1774_v53 = vpack.c.bf16 %v7955_v51, %v7953_v48 }
 0x17c   : > { %v5944_v54 = vpop.f32.mrf.mxu1 }
 0x17d   : > { %v7959_v55 = vadd.f32 %v5944_v54, %v5943_v52 }
 0x17e   : > { %v5946_v56 = vpop.f32.mrf.mxu1 }
 0x180   : > { %v5947_v57 = vpop.f32.mrf.mxu1 }
 0x181   : > { %v7961_v58 = vadd.f32 %v5947_v57, %v5946_v56 }
 0x182   : > { %v5949_v59 = vpop.f32.mrf.mxu1 }
 0x183   : > { %v1775_v60 = vpack.c.bf16 %v7961_v58, %v7959_v55 }
 0x184   : > { %v5950_v61 = vpop.f32.mrf.mxu1 }
 0x185   : > { %v7965_v62 = vadd.f32 %v5950_v61, %v5949_v59 }
 0x186   : > { %v5952_v63 = vpop.f32.mrf.mxu1 }
 0x188   : > { %v5953_v8 = vpop.f32.mrf.mxu1 }
 0x189   : > { %v7967_v9 = vadd.f32 %v5953_v8, %v5952_v63 }
 0x18a   : > { %v5955_v0 = vpop.f32.mrf.mxu1 }
 0x18b   : > { %v1776_v1 = vpack.c.bf16 %v7967_v9, %v7965_v62 }
 0x18c   : > { %v5956_v12 = vpop.f32.mrf.mxu1 }
 0x18d   : > { %v7971_v14 = vadd.f32 %v5956_v12, %v5955_v0 }
 0x18e   : > { %v5958_v2 = vpop.f32.mrf.mxu1 }
 0x190   : > { %v5959_v3 = vpop.f32.mrf.mxu1 }
 0x191   : > { %v7973_v26 = vadd.f32 %v5959_v3, %v5958_v2 }
 0x192   : > { %v5961_v27 = vpop.f32.mrf.mxu1 }
 0x193   : > { %v1777_v5 = vpack.c.bf16 %v7973_v26, %v7971_v14 }
 0x194   : > { %v5962_v6 = vpop.f32.mrf.mxu1 }
 0x195   : > { %v7977_v35 = vadd.f32 %v5962_v6, %v5961_v27 }
 0x196   : > { %v5964_v4 = vpop.f32.mrf.mxu1 }
 0x198   : > { %v5965_v38 = vpop.f32.mrf.mxu1 }
 0x199   : > { %v7979_v34 = vadd.f32 %v5965_v38, %v5964_v4 }
 0x19a   : > { %v5967_v7 = vpop.f32.mrf.mxu1 }
 0x19b   : > { %v1778_v10 = vpack.c.bf16 %v7979_v34, %v7977_v35 }
 0x19c   : > { %v5968_v23 = vpop.f32.mrf.mxu1 }
 0x19d   : > { %v7983_v11 = vadd.f32 %v5968_v23, %v5967_v7 }
 0x19e   : > { %v5970_v44 = vpop.f32.mrf.mxu1 }
 0x1a0   : > { %v5971_v45 = vpop.f32.mrf.mxu1 }
 0x1a1   : > { %v7988_v19 = vadd.f32 %v5971_v45, %v5970_v44 }
 0x1a2   : > { %v5973_v29 = vpop.f32.mrf.mxu1 }
 0x1a3   : > { %v1779_v46 = vpack.c.bf16 %v7988_v19, %v7983_v11 }
 0x1a4   : > { %v5974_v47 = vpop.f32.mrf.mxu1 }
 0x1a5   : > { %v7992_v31 = vadd.f32 %v5974_v47, %v5973_v29 }
 0x1a6   : > { %v5976_v39 = vpop.f32.mrf.mxu1 }
 0x1a8   : > { %v5977_v42 = vpop.f32.mrf.mxu1 }
 0x1a9   : > { %v7994_v49 = vadd.f32 %v5977_v42, %v5976_v39 }
 0x1aa   : > { %v5979_v50 = vpop.f32.mrf.mxu1 }
 0x1ab   : > { %v1780_v52 = vpack.c.bf16 %v7994_v49, %v7992_v31 }
 0x1ac   : > { %v5980_v54 = vpop.f32.mrf.mxu1 }
 0x1ad   : > { %v7998_v56 = vadd.f32 %v5980_v54, %v5979_v50 }
 0x1ae   : > { %v5982_v57 = vpop.f32.mrf.mxu1 }
 0x1b0   : > { %v5983_v59 = vpop.f32.mrf.mxu1 }
 0x1b1   : > { %v8000_v61 = vadd.f32 %v5983_v59, %v5982_v57 }
 0x1b2   : > { %v6001_v63 = vpop.f32.mrf.mxu1 }
 0x1b4   : > { %v6002_v0 = vpop.f32.mrf.mxu1 }
 0x1b5   : > { %v6003_v3 = vadd.f32 %v6002_v0, %v6001_v63 }
 0x1b6   : > { %v6004_v12 = vpop.f32.mrf.mxu1 }
 0x1b8   : > { %v6005_v2 = vpop.f32.mrf.mxu1 }
 0x1b9   : > { %v6006_v27 = vadd.f32 %v6005_v2, %v6004_v12 }
 0x1ba   : > { %v6007_v6 = vpop.f32.mrf.mxu1 }
 0x1bb   : > { %v1798_v4 = vpack.c.bf16 %v6006_v27, %v6003_v3 }
 0x1bc   : > { %v6008_v38 = vpop.f32.mrf.mxu1 }
 0x1bd   : > { %v5889_v7 = vpop.f32.mrf.mxu0  ;;  %6386 = vmatprep.mubr.bf16.mxu0 %v1798_v4  ;;  %v6009_v47 = vadd.f32 %v6008_v38, %v6007_v6 }
 0x1be   : > { %v6010_v23 = vpop.f32.mrf.mxu1 }
 0x1bf   : > { %v5890_v44 = vpop.f32.mrf.mxu0 }
 0x1c0   : > { %v6011_v45 = vpop.f32.mrf.mxu1  ;;  %v5891_v54 = vadd.f32 %v5890_v44, %v5889_v7 }
 0x1c1   : > { %v5892_v29 = vpop.f32.mrf.mxu0  ;;  %v6012_v39 = vadd.f32 %v6011_v45, %v6010_v23 }
 0x1c2   : > { %v6013_v42 = vpop.f32.mrf.mxu1 }
 0x1c3   : > { %v5893_v50 = vpop.f32.mrf.mxu0  ;;  %v1799_v57 = vpack.c.bf16 %v6012_v39, %v6009_v47 }
 0x1c4   : > { %v5894_v59 = vadd.f32 %v5893_v50, %v5892_v29  ;;  %v6014_v43 = vpop.f32.mrf.mxu1 }
 0x1c5   : > { %v5895_v21 = vpop.f32.mrf.mxu0  ;;  %6387 = vmatmul.mubr.bf16.vlgmr.msra.gmra.mxu0 %v1799_v57  ;;  %v6015_v27 = vadd.f32 %v6014_v43, %v6013_v42 }
 0x1c6   : > { %v1766_v63 = vpack.c.bf16 %v5894_v59, %v5891_v54  ;;  %v6016_v0 = vpop.f32.mrf.mxu1  ;;  %6467 = vmatpush3.bf16.msra.mxu0 %v6769_v18 }
 0x1c7   : > { %v5896_v12 = vpop.f32.mrf.mxu0 }
 0x1c8   : > { %6434 = vmatprep.mubr.bf16.mxu1 %v1766_v63  ;;  %v6017_v2 = vpop.f32.mrf.mxu1  ;;  %v5897_v38 = vadd.f32 %v5896_v12, %v5895_v21 }
 0x1c9   : > { %v5898_v3 = vpop.f32.mrf.mxu0  ;;  %v6018_v4 = vadd.f32 %v6017_v2, %v6016_v0 }
 0x1ca   : > { %v6019_v8 = vpop.f32.mrf.mxu1 }
 0x1cb   : > { %v5899_v6 = vpop.f32.mrf.mxu0  ;;  %v1800_v23 = vpack.c.bf16 %v6018_v4, %v6015_v27 }
 0x1cc   : > { %v5900_v45 = vadd.f32 %v5899_v6, %v5898_v3  ;;  %v6020_v7 = vpop.f32.mrf.mxu1 }
 0x1cd   : > { %v5901_v44 = vpop.f32.mrf.mxu0  ;;  %6390 = vmatprep.mubr.bf16.mxu0 %v1800_v23  ;;  %v6021_v18 = vadd.f32 %v6020_v7, %v6019_v8 }
 0x1ce   : > { %v1767_v29 = vpack.c.bf16 %v5900_v45, %v5897_v38  ;;  %v6022_v47 = vpop.f32.mrf.mxu1 }
 0x1cf   : > { %v5902_v39 = vpop.f32.mrf.mxu0 }
 0x1d0   : > { %6435 = vmatmul.mubr.bf16.vlgmr.msra.gmra.mxu1 %v1767_v29  ;;  %v6023_v50 = vpop.f32.mrf.mxu1  ;;  %v5903_v43 = vadd.f32 %v5902_v39, %v5901_v44 }
 0x1d1   : > { %v5904_v54 = vpop.f32.mrf.mxu0  ;;  %v6024_v57 = vadd.f32 %v6023_v50, %v6022_v47 }
 0x1d2   : > { %v6025_v59 = vpop.f32.mrf.mxu1 }
 0x1d3   : > { %v5905_v63 = vpop.f32.mrf.mxu0  ;;  %v1801_v42 = vpack.c.bf16 %v6024_v57, %v6021_v18 }
 0x1d4   : > { %v5906_v0 = vadd.f32 %v5905_v63, %v5904_v54  ;;  %v6026_v2 = vpop.f32.mrf.mxu1 }
 0x1d5   : > { %v5907_v21 = vpop.f32.mrf.mxu0  ;;  %6391 = vmatmul.mubr.bf16.gmra.mxu0 %v1801_v42  ;;  %v6027_v38 = vadd.f32 %v6026_v2, %v6025_v59 }
 0x1d6   : > { %v1768_v12 = vpack.c.bf16 %v5906_v0, %v5903_v43  ;;  %v6028_v3 = vpop.f32.mrf.mxu1 }
 0x1d7   : > { %v5908_v27 = vpop.f32.mrf.mxu0 }
 0x1d8   : > { %6438 = vmatprep.mubr.bf16.mxu1 %v1768_v12  ;;  %v6029_v4 = vpop.f32.mrf.mxu1  ;;  %v5909_v8 = vadd.f32 %v5908_v27, %v5907_v21 }
 0x1d9   : > { %v5910_v6 = vpop.f32.mrf.mxu0  ;;  %v6030_v23 = vadd.f32 %v6029_v4, %v6028_v3 }
 0x1da   : > { %v6031_v45 = vpop.f32.mrf.mxu1 }
 0x1db   : > { %v5911_v29 = vpop.f32.mrf.mxu0  ;;  %v1802_v7 = vpack.c.bf16 %v6030_v23, %v6027_v38 }
 0x1dc   : > { %v5912_v47 = vadd.f32 %v5911_v29, %v5910_v6  ;;  %v6032_v50 = vpop.f32.mrf.mxu1 }
 0x1dd   : > { %v5913_v44 = vpop.f32.mrf.mxu0  ;;  %6394 = vmatprep.mubr.bf16.mxu0 %v1802_v7  ;;  %v6033_v43 = vadd.f32 %v6032_v50, %v6031_v45 }
 0x1de   : > { %v1769_v39 = vpack.c.bf16 %v5912_v47, %v5909_v8  ;;  %v6034_v54 = vpop.f32.mrf.mxu1 }
 0x1df   : > { %v5914_v18 = vpop.f32.mrf.mxu0 }
 0x1e0   : > { %6439 = vmatmul.mubr.bf16.gmra.mxu1 %v1769_v39  ;;  %v6035_v57 = vpop.f32.mrf.mxu1  ;;  %v5915_v59 = vadd.f32 %v5914_v18, %v5913_v44 }
 0x1e1   : > { %v5916_v63 = vpop.f32.mrf.mxu0  ;;  %v6036_v42 = vadd.f32 %v6035_v57, %v6034_v54 }
 0x1e2   : > { %v6037_v0 = vpop.f32.mrf.mxu1 }
 0x1e3   : > { %v5917_v12 = vpop.f32.mrf.mxu0  ;;  %v1803_v2 = vpack.c.bf16 %v6036_v42, %v6033_v43 }
 0x1e4   : > { %v5918_v3 = vadd.f32 %v5917_v12, %v5916_v63  ;;  %v6038_v4 = vpop.f32.mrf.mxu1 }
 0x1e5   : > { %v5919_v21 = vpop.f32.mrf.mxu0  ;;  %6395 = vmatmul.mubr.bf16.gmra.mxu0 %v1803_v2  ;;  %v6039_v8 = vadd.f32 %v6038_v4, %v6037_v0 }
 0x1e6   : > { %v1770_v27 = vpack.c.bf16 %v5918_v3, %v5915_v59  ;;  %v6040_v6 = vpop.f32.mrf.mxu1 }
 0x1e7   : > { %v5920_v38 = vpop.f32.mrf.mxu0 }
 0x1e8   : > { %6442 = vmatprep.mubr.bf16.mxu1 %v1770_v27  ;;  %v6041_v23 = vpop.f32.mrf.mxu1  ;;  %v5921_v45 = vadd.f32 %v5920_v38, %v5919_v21 }
 0x1e9   : > { %v5922_v29 = vpop.f32.mrf.mxu0  ;;  %v6042_v7 = vadd.f32 %v6041_v23, %v6040_v6 }
 0x1ea   : > { %v6043_v47 = vpop.f32.mrf.mxu1 }
 0x1eb   : > { %v5923_v39 = vpop.f32.mrf.mxu0  ;;  %v1804_v50 = vpack.c.bf16 %v6042_v7, %v6039_v8 }
 0x1ec   : > { %v5924_v54 = vadd.f32 %v5923_v39, %v5922_v29  ;;  %v6044_v57 = vpop.f32.mrf.mxu1 }
 0x1ed   : > { %v5925_v44 = vpop.f32.mrf.mxu0  ;;  %6398 = vmatprep.mubr.bf16.mxu0 %v1804_v50  ;;  %v6045_v59 = vadd.f32 %v6044_v57, %v6043_v47 }
 0x1ee   : > { %v1771_v18 = vpack.c.bf16 %v5924_v54, %v5921_v45  ;;  %v6046_v63 = vpop.f32.mrf.mxu1 }
 0x1ef   : > { %v5926_v43 = vpop.f32.mrf.mxu0 }
 0x1f0   : > { %6443 = vmatmul.mubr.bf16.gmra.mxu1 %v1771_v18  ;;  %v6047_v42 = vpop.f32.mrf.mxu1  ;;  %v5927_v0 = vadd.f32 %v5926_v43, %v5925_v44 }
 0x1f1   : > { %v5928_v12 = vpop.f32.mrf.mxu0  ;;  %v6048_v2 = vadd.f32 %v6047_v42, %v6046_v63 }
 0x1f2   : > { %v6049_v3 = vpop.f32.mrf.mxu1 }
 0x1f3   : > { %v5929_v27 = vpop.f32.mrf.mxu0  ;;  %v1805_v4 = vpack.c.bf16 %v6048_v2, %v6045_v59 }
 0x1f4   : > { %v5930_v6 = vadd.f32 %v5929_v27, %v5928_v12  ;;  %v6050_v23 = vpop.f32.mrf.mxu1 }
 0x1f5   : > { %v5931_v21 = vpop.f32.mrf.mxu0  ;;  %6399 = vmatmul.mubr.bf16.gmra.mxu0 %v1805_v4  ;;  %v6051_v45 = vadd.f32 %v6050_v23, %v6049_v3 }
 0x1f6   : > { %v1772_v38 = vpack.c.bf16 %v5930_v6, %v5927_v0  ;;  %v6052_v29 = vpop.f32.mrf.mxu1 }
 0x1f7   : > { %v5932_v8 = vpop.f32.mrf.mxu0 }
 0x1f8   : > { %6446 = vmatprep.mubr.bf16.mxu1 %v1772_v38  ;;  %v6053_v7 = vpop.f32.mrf.mxu1  ;;  %v5933_v47 = vadd.f32 %v5932_v8, %v5931_v21 }
 0x1f9   : > { %v5934_v39 = vpop.f32.mrf.mxu0  ;;  %v6054_v50 = vadd.f32 %v6053_v7, %v6052_v29  ;;  %v9265_v7 = vpack.c.bf16 %v8000_v61, %v7998_v56 }
 0x1fa   : > { %v6055_v54 = vpop.f32.mrf.mxu1 }
 0x1fb   : > { %v5935_v18 = vpop.f32.mrf.mxu0  ;;  %v1806_v57 = vpack.c.bf16 %v6054_v50, %v6051_v45 }
 0x1fc   : > { %v5936_v63 = vadd.f32 %v5935_v18, %v5934_v39  ;;  %v6056_v42 = vpop.f32.mrf.mxu1 }
 0x1fd   : > { %6402 = vmatprep.mubr.bf16.mxu0 %v1806_v57  ;;  %v6057_v59 = vadd.f32 %v6056_v42, %v6055_v54 }
 0x1fe   : > { %v1773_v44 = vpack.c.bf16 %v5936_v63, %v5933_v47  ;;  %v6058_v43 = vpop.f32.mrf.mxu1 }
 0x200   : > { %6447 = vmatmul.mubr.bf16.gmra.mxu1 %v1773_v44  ;;  %v6059_v12 = vpop.f32.mrf.mxu1  ;;  %v6770_v44 = vld [vmem:[%s7329_s13] sm:$0xff]  }
 0x201   : > { %6450 = vmatprep.mubr.bf16.mxu1 %v1774_v53  ;;  %v6060_v2 = vadd.f32 %v6059_v12, %v6058_v43  ;;  %v6771_v12 = vld [vmem:[%s7329_s13 + $0x8] sm:$0xff]  }
 0x202   : > { %v6061_v27 = vpop.f32.mrf.mxu1 }
 0x203   : > { %v1807_v3 = vpack.c.bf16 %v6060_v2, %v6057_v59  ;;  %v6772_v59 = vld [vmem:[%s7329_s13 + $0x10] sm:$0xff]   ;;  %v6773_v2 = vld [vmem:[%s7329_s13 + $0x18] sm:$0xff]  }
 0x204   : > { %v6062_v0 = vpop.f32.mrf.mxu1 }
 0x205   : > { %6403 = vmatmul.mubr.bf16.gmra.mxu0 %v1807_v3  ;;  %v6063_v23 = vadd.f32 %v6062_v0, %v6061_v27  ;;  %v6774_v27 = vld [vmem:[%s7329_s13 + $0x20] sm:$0xff]   ;;  %v6775_v3 = vld [vmem:[%s7329_s13 + $0x28] sm:$0xff]   ;;  %v6776_v0 = vld [vmem:[%s7329_s13 + $0x30] sm:$0xff]  }
 0x206   : > { %v6064_v4 = vpop.f32.mrf.mxu1 }
 0x208   : > { %6451 = vmatmul.mubr.bf16.gmra.mxu1 %v1775_v60  ;;  %v6065_v6 = vpop.f32.mrf.mxu1 }
 0x209   : > { %6454 = vmatprep.mubr.bf16.mxu1 %v1776_v1  ;;  %v6066_v21 = vadd.f32 %v6065_v6, %v6064_v4  ;;  %v6777_v4 = vld [vmem:[%s7329_s13 + $0x38] sm:$0xff]   ;;  %v6778_v6 = vld [vmem:[%s7329_s13 + $0x40] sm:$0xff]  }
 0x20a   : > { %v6067_v48 = vpop.f32.mrf.mxu1 }
 0x20b   : > { %v1808_v51 = vpack.c.bf16 %v6066_v21, %v6063_v23  ;;  %v6779_v23 = vld [vmem:[%s7329_s13 + $0x48] sm:$0xff]   ;;  %v6780_v21 = vld [vmem:[%s7329_s13 + $0x50] sm:$0xff]  }
 0x20c   : > { %v6068_v53 = vpop.f32.mrf.mxu1 }
 0x20d   : > { %6406 = vmatprep.mubr.bf16.mxu0 %v1808_v51  ;;  %v6069_v55 = vadd.f32 %v6068_v53, %v6067_v48  ;;  %v6781_v48 = vld [vmem:[%s7329_s13 + $0x58] sm:$0xff]   ;;  %v6782_v51 = vld [vmem:[%s7329_s13 + $0x60] sm:$0xff]   ;;  %v6783_v53 = vld [vmem:[%s7329_s13 + $0x68] sm:$0xff]  }
 0x20e   : > { %v6070_v38 = vpop.f32.mrf.mxu1 }
 0x210   : > { %6455 = vmatmul.mubr.bf16.gmra.mxu1 %v1777_v5  ;;  %v6071_v29 = vpop.f32.mrf.mxu1 }
 0x211   : > { %6458 = vmatprep.mubr.bf16.mxu1 %v1778_v10  ;;  %v6072_v58 = vadd.f32 %v6071_v29, %v6070_v38  ;;  %v6784_v38 = vld [vmem:[%s7329_s13 + $0x70] sm:$0xff]   ;;  %v6785_v29 = vld [vmem:[%s7329_s13 + $0x78] sm:$0xff]   ;;  %s9288_s13 = sld [smem:[#allocation21_spill]] (!%p5653_p6) }
 0x212   : > { %v6073_v60 = vpop.f32.mrf.mxu1 }
 0x213   : > { %v1809_v62 = vpack.c.bf16 %v6072_v58, %v6069_v55  ;;  %v6786_v55 = vld [vmem:[%s9164_s9 + $0x38] sm:$0xff]   ;;  %v6787_v58 = vld [vmem:[%s9164_s9 + $0x30] sm:$0xff]  }
 0x214   : > { %v6074_v9 = vpop.f32.mrf.mxu1  ;;  %6500 = vmatprep.subr.bf16.mxu1 %v6786_v55 }
 0x215   : > { %6407 = vmatmul.mubr.bf16.gmra.mxu0 %v1809_v62  ;;  %v6075_v14 = vadd.f32 %v6074_v9, %v6073_v60  ;;  %6501 = vmatpush3.bf16.msra.mxu1 %v6786_v55  ;;  %v6788_v62 = vld [vmem:[%s9164_s9 + $0x28] sm:$0xff]  }
 0x216   : > { %v6076_v1 = vpop.f32.mrf.mxu1  ;;  %6502 = vmatprep.subr.bf16.mxu1 %v6787_v58 }
 0x218   : > { %6459 = vmatmul.mubr.bf16.gmra.mxu1 %v1779_v46  ;;  %v6077_v8 = vpop.f32.mrf.mxu1 }
 0x219   : > { %6462 = vmatprep.mubr.bf16.mxu1 %v1780_v52  ;;  %v6078_v26 = vadd.f32 %v6077_v8, %v6076_v1  ;;  %6503 = vmatpush3.bf16.msra.mxu1 %v6787_v58  ;;  %v6789_v1 = vld [vmem:[%s9164_s9 + $0x20] sm:$0xff]  }
 0x21a   : > { %v6079_v5 = vpop.f32.mrf.mxu1  ;;  %6504 = vmatprep.subr.bf16.mxu1 %v6788_v62 }
 0x21b   : > { %v1810_v35 = vpack.c.bf16 %v6078_v26, %v6075_v14  ;;  %v6790_v14 = vld [vmem:[%s9164_s9 + $0x18] sm:$0xff]  }
 0x21c   : > { %v6080_v34 = vpop.f32.mrf.mxu1 }
 0x21d   : > { %6410 = vmatprep.mubr.bf16.mxu0 %v1810_v35  ;;  %v6081_v45 = vadd.f32 %v6080_v34, %v6079_v5  ;;  %6505 = vmatpush3.bf16.msra.mxu1 %v6788_v62  ;;  %v6791_v35 = vld [vmem:[%s9164_s9 + $0x10] sm:$0xff]  }
 0x21e   : > { %v6082_v10 = vpop.f32.mrf.mxu1  ;;  %6506 = vmatprep.subr.bf16.mxu1 %v6789_v1 }
 0x220   : > { %6463 = vmatmul.mubr.bf16.gmra.mxu1 %v9265_v7  ;;  %v6083_v39 = vpop.f32.mrf.mxu1 }
 0x221   : > { %v6084_v11 = vadd.f32 %v6083_v39, %v6082_v10  ;;  %6507 = vmatpush3.bf16.msra.mxu1 %v6789_v1  ;;  %v6792_v10 = vld [vmem:[%s9164_s9 + $0x8] sm:$0xff]   ;;  %v6793_v39 = vld [vmem:[%s9164_s9] sm:$0xff]  }
 0x222   : > { %v6085_v19 = vpop.f32.mrf.mxu1  ;;  %6508 = vmatprep.subr.bf16.mxu1 %v6790_v14 }
 0x223   : > { %v1811_v46 = vpack.c.bf16 %v6084_v11, %v6081_v45 }
 0x224   : > { %v6086_v50 = vpop.f32.mrf.mxu1 }
 0x225   : > { %6411 = vmatmul.mubr.bf16.gmra.mxu0 %v1811_v46  ;;  %v6087_v52 = vadd.f32 %v6086_v50, %v6085_v19  ;;  %6509 = vmatpush3.bf16.msra.mxu1 %v6790_v14 }
 0x226   : > { %v6088_v31 = vpop.f32.mrf.mxu1  ;;  %6510 = vmatprep.subr.bf16.mxu1 %v6791_v35 }
 0x228   : > { %v6089_v49 = vpop.f32.mrf.mxu1 }
 0x229   : > { %v6090_v54 = vadd.f32 %v6089_v49, %v6088_v31  ;;  %6511 = vmatpush3.bf16.msra.mxu1 %v6791_v35 }
 0x22a   : > { %v6091_v18 = vpop.f32.mrf.mxu1  ;;  %6512 = vmatprep.subr.bf16.mxu1 %v6792_v10 }
 0x22b   : > { %v1812_v47 = vpack.c.bf16 %v6090_v54, %v6087_v52 }
 0x22c   : > { %v6092_v57 = vpop.f32.mrf.mxu1 }
 0x22d   : > { %6414 = vmatprep.mubr.bf16.mxu0 %v1812_v47  ;;  %v6093_v63 = vadd.f32 %v6092_v57, %v6091_v18  ;;  %6513 = vmatpush3.bf16.msra.mxu1 %v6792_v10 }
 0x22e   : > { %v6094_v56 = vpop.f32.mrf.mxu1  ;;  %6514 = vmatprep.subr.bf16.mxu1 %v6793_v39 }
 0x230   : > { %v6095_v61 = vpop.f32.mrf.mxu1 }
 0x231   : > { %v6096_v42 = vadd.f32 %v6095_v61, %v6094_v56  ;;  %6515 = vmatpush3.bf16.msra.mxu1 %v6793_v39 }
 0x233   : > { %v1813_v43 = vpack.c.bf16 %v6096_v42, %v6093_v63 }
 0x235   : > { %6415 = vmatmul.mubr.bf16.gmra.mxu0 %v1813_v43 }
 0x236   : > { %6468 = vmatprep.mubr.msk.bf16.mxu0 %vm2368_vm10, %v6770_v44 }
 0x23d   : > { %6469 = vmatmul.mubr.msk.bf16.vlgmr.msra.gmra.mxu0 %vm2368_vm10, %v6771_v12 }
 0x23e   : > { %6472 = vmatprep.mubr.msk.bf16.mxu0 %vm2368_vm10, %v6772_v59 }
 0x245   : > { %6473 = vmatmul.mubr.msk.bf16.gmra.mxu0 %vm2368_vm10, %v6773_v2 }
 0x246   : > { %6476 = vmatprep.mubr.msk.bf16.mxu0 %vm2368_vm10, %v6774_v27 }
 0x24d   : > { %6477 = vmatmul.mubr.msk.bf16.gmra.mxu0 %vm2368_vm10, %v6775_v3 }
 0x24e   : > { %6480 = vmatprep.mubr.msk.bf16.mxu0 %vm2368_vm10, %v6776_v0 }
 0x255   : > { %6481 = vmatmul.mubr.msk.bf16.gmra.mxu0 %vm2368_vm10, %v6777_v4 }
 0x256   : > { %6484 = vmatprep.mubr.msk.bf16.mxu0 %vm2368_vm10, %v6778_v6 }
 0x25d   : > { %6485 = vmatmul.mubr.msk.bf16.gmra.mxu0 %vm2368_vm10, %v6779_v23 }
 0x25e   : > { %6488 = vmatprep.mubr.msk.bf16.mxu0 %vm2368_vm10, %v6780_v21 }
 0x265   : > { %6489 = vmatmul.mubr.msk.bf16.gmra.mxu0 %vm2368_vm10, %v6781_v48 }
 0x266   : > { %6492 = vmatprep.mubr.msk.bf16.mxu0 %vm2368_vm10, %v6782_v51 }
 0x26d   : > { %6493 = vmatmul.mubr.msk.bf16.gmra.mxu0 %vm2368_vm10, %v6783_v53 }
 0x26e   : > { %6496 = vmatprep.mubr.msk.bf16.mxu0 %vm2368_vm10, %v6784_v38 }
 0x275   : > { %6497 = vmatmul.mubr.msk.bf16.gmra.mxu0 %vm2368_vm10, %v6785_v29 }
 0x285   : > { %v8066_v60 = vpop.f32.mrf.mxu0 }
 0x287   : > { %v8071_v9 = vpop.f32.mrf.mxu0 }
 0x289   : > { %v8076_v8 = vpop.f32.mrf.mxu0 }
 0x28b   : > { %v8081_v26 = vpop.f32.mrf.mxu0 }
 0x290   : > { %v6436_v52 = vpop.f32.mrf.mxu1 }
 0x291   : > { %v2130_v13 = vadd.f32 %v6436_v52, %v8066_v60 }
 0x292   : > { %v2121_v18 = vpop.f32.mrf.mxu1 }
 0x293   : > { %v2122_v28 = vadd.f32 %v2121_v18, %v8071_v9 }
 0x294   : > { %v6437_v57 = vpop.f32.mrf.mxu1 }
 0x295   : > { %v8083_v5 = vpop.f32.mrf.mxu0  ;;  %v2133_v40 = vadd.f32 %v6437_v57, %v8076_v8 }
 0x296   : > { %v2124_v61 = vpop.f32.mrf.mxu1 }
 0x297   : > { %v8088_v34 = vpop.f32.mrf.mxu0  ;;  %v2125_v22 = vadd.f32 %v2124_v61, %v8081_v26 }
 0x299   : > { %v8093_v7 = vpop.f32.mrf.mxu0 }
 0x29b   : > { %v8098_v45 = vpop.f32.mrf.mxu0 }
 0x2a0   : > { %v6440_v42 = vpop.f32.mrf.mxu1 }
 0x2a2   : > { %v2137_v43 = vpop.f32.mrf.mxu1 }
 0x2a4   : > { %v6441_v59 = vpop.f32.mrf.mxu1 }
 0x2a5   : > { %v8100_v11 = vpop.f32.mrf.mxu0  ;;  %v2149_v57 = vadd.f32 %v6441_v59, %v8093_v7 }
 0x2a6   : > { %v2140_v27 = vpop.f32.mrf.mxu1 }
 0x2a7   : > { %v8102_v19 = vpop.f32.mrf.mxu0 }
 0x2a9   : > { %v8104_v46 = vpop.f32.mrf.mxu0 }
 0x2ab   : > { %v8106_v50 = vpop.f32.mrf.mxu0 }
 0x2b0   : > { %v6444_v0 = vpop.f32.mrf.mxu1 }
 0x2b1   : > { %v2162_v59 = vadd.f32 %v6444_v0, %v8100_v11 }
 0x2b2   : > { %v8130_v6 = vpop.f32.mrf.mxu1 }
 0x2b4   : > { %v8134_v21 = vpop.f32.mrf.mxu1 }
 0x2b5   : > { %v8108_v31 = vpop.f32.mrf.mxu0 }
 0x2b6   : > { %v8138_v51 = vpop.f32.mrf.mxu1 }
 0x2b7   : > { %v8110_v49 = vpop.f32.mrf.mxu0 }
 0x2b9   : > { %v8112_v54 = vpop.f32.mrf.mxu0 }
 0x2bb   : > { %v8114_v47 = vpop.f32.mrf.mxu0 }
 0x2c0   : > { %v8142_v38 = vpop.f32.mrf.mxu1 }
 0x2c2   : > { %v8146_v55 = vpop.f32.mrf.mxu1 }
 0x2c4   : > { %v8150_v62 = vpop.f32.mrf.mxu1 }
 0x2c5   : > { %v8116_v56 = vpop.f32.mrf.mxu0 }
 0x2c6   : > { %v8156_v35 = vpop.f32.mrf.mxu1 }
 0x2c7   : > { %v8118_v63 = vpop.f32.mrf.mxu0 }
 0x2c8   : > { %v8163_v16 = vpop.f32.mrf.mxu1 }
 0x2c9   : > { %v8120_v44 = vpop.f32.mrf.mxu0 }
 0x2ca   : > { %v8172_v15 = vpop.f32.mrf.mxu1 }
 0x2cb   : > { %v8122_v12 = vpop.f32.mrf.mxu0 }
 0x2cc   : > { %v8183_v9 = vpop.f32.mrf.mxu1 }
 0x2d5   : > { %v8124_v2 = vpop.f32.mrf.mxu0 }
 0x2d7   : > { %v8126_v3 = vpop.f32.mrf.mxu0 }
 0x2d9   : > { %v8128_v4 = vpop.f32.mrf.mxu0 }
 0x2db   : > { %v8132_v23 = vpop.f32.mrf.mxu0 }
 0x2e5   : > { %v8136_v48 = vpop.f32.mrf.mxu0 }
 0x2e7   : > { %v8140_v53 = vpop.f32.mrf.mxu0 }
 0x2e9   : > { %v8144_v29 = vpop.f32.mrf.mxu0 }
 0x2eb   : > { %v8148_v58 = vpop.f32.mrf.mxu0 }
 0x2f5   : > { %v8152_v1 = vpop.f32.mrf.mxu0 }
 0x2f7   : > { %v8154_v14 = vpop.f32.mrf.mxu0 }
 0x2f9   : > { %v8158_v10 = vpop.f32.mrf.mxu0 }
 0x2fb   : > { %v8160_v39 = vpop.f32.mrf.mxu0 }
 0x2fd   : > { %v6470_v20 = vpop.f32.mrf.mxu0 }
 0x2fe   : > { %v2580_v32 = vadd.f32 %v6470_v20, %v2130_v13  ;;  %v2146_v13 = vadd.f32 %v6440_v42, %v8083_v5  ;;  %v2141_v42 = vadd.f32 %v2140_v27, %v8098_v45  ;;  %v2154_v27 = vadd.f32 %v8130_v6, %v8102_v19 }
 0x2ff   : > { %v2451_v36 = vpop.f32.mrf.mxu0  ;;  %v2165_v19 = vadd.f32 %v8134_v21, %v8104_v46  ;;  %v2157_v6 = vadd.f32 %v8138_v51, %v8106_v50 }
 0x300   : > { %v8175_v17 = vadd.f32 %v8168_v24, %v2580_v32  ;;  %v2578_v60 = vadd.f32 %v2451_v36, %v2122_v28  ;;  %v2138_v36 = vadd.f32 %v2137_v43, %v8088_v34 }
 0x301   : > { %v6471_v52 = vpop.f32.mrf.mxu0 }
 0x302   : > { %v5454_v25 = vmul.f32 -1.442695, %v8175_v17  ;;  %v8180_v30 = vadd.f32 %v8168_v24, %v2578_v60  ;;  %v2581_v33 = vadd.f32 %v6471_v52, %v2133_v40 }
 0x303   : > { %v2454_v20 = vpop.f32.mrf.mxu0 }
 0x304   : > { %6794 = vpow2.f32 %v5454_v25  ;;  %v5452_v8 = vmul.f32 -1.442695, %v8180_v30  ;;  %v8187_v32 = vadd.f32 %v8168_v24, %v2581_v33  ;;  %v2579_v28 = vadd.f32 %v2454_v20, %v2125_v22  ;;  %v8195_v25 = vpop.f32.mrf.mxu1 }
 0x305   : > { %v6474_v26 = vpop.f32.mrf.mxu0 }
 0x306   : > { %6796 = vpow2.f32 %v5452_v8  ;;  %v5455_v18 = vmul.f32 -1.442695, %v8187_v32  ;;  %v8192_v40 = vadd.f32 %v8168_v24, %v2579_v28  ;;  %v2584_v5 = vadd.f32 %v6474_v26, %v2146_v13  ;;  %v8207_v20 = vpop.f32.mrf.mxu1 }
 0x307   : > { %v2467_v61 = vpop.f32.mrf.mxu0 }
 0x308   : > { %6798 = vpow2.f32 %v5455_v18  ;;  %v5453_v33 = vmul.f32 -1.442695, %v8192_v40  ;;  %v8199_v22 = vadd.f32 %v8168_v24, %v2584_v5  ;;  %v2582_v34 = vadd.f32 %v2467_v61, %v2138_v36  ;;  %v8219_v5 = vpop.f32.mrf.mxu1 }
 0x309   : > { %v6475_v43 = vpop.f32.mrf.mxu0 }
 0x30a   : > { %6800 = vpow2.f32 %v5453_v33  ;;  %v5458_v60 = vmul.f32 -1.442695, %v8199_v22  ;;  %v8204_v52 = vadd.f32 %v8168_v24, %v2582_v34  ;;  %v2585_v7 = vadd.f32 %v6475_v43, %v2149_v57 }
 0x30b   : > { %v2470_v13 = vpop.f32.mrf.mxu0 }
 0x30c   : > { %6802 = vpow2.f32 %v5458_v60  ;;  %v5456_v8 = vmul.f32 -1.442695, %v8204_v52  ;;  %v8211_v28 = vadd.f32 %v8168_v24, %v2585_v7  ;;  %v2583_v45 = vadd.f32 %v2470_v13, %v2141_v42 }
 0x30d   : > { %v6478_v36 = vpop.f32.mrf.mxu0  ;;  %v2178_v13 = vadd.f32 %v8142_v38, %v8108_v31 }
 0x30e   : > { %6804 = vpow2.f32 %v5456_v8  ;;  %v5459_v26 = vmul.f32 -1.442695, %v8211_v28  ;;  %v8217_v18 = vadd.f32 %v8168_v24, %v2583_v45  ;;  %v2588_v11 = vadd.f32 %v6478_v36, %v2162_v59 }
 0x30f   : > { %v2483_v0 = vpop.f32.mrf.mxu0 }
 0x310   : > { %6806 = vpow2.f32 %v5459_v26  ;;  %v5457_v57 = vmul.f32 -1.442695, %v8217_v18  ;;  %v8223_v61 = vadd.f32 %v8168_v24, %v2588_v11  ;;  %v2586_v33 = vadd.f32 %v2483_v0, %v2154_v27  ;;  %v8235_v27 = vpop.f32.mrf.mxu1 }
 0x311   : > { %v6795_v34 = vpop.eup %6794  ;;  %v6479_v42 = vpop.f32.mrf.mxu0 }
 0x312   : > { %v2747_v43 = vadd.f32 1.0, %v6795_v34  ;;  %6808 = vpow2.f32 %v5457_v57  ;;  %v5462_v60 = vmul.f32 -1.442695, %v8223_v61  ;;  %v8231_v7 = vadd.f32 %v8168_v24, %v2586_v33 }
 0x313   : > { %v6797_v59 = vpop.eup %6796  ;;  %v2589_v8 = vadd.f32 %v6479_v42, %v2165_v19  ;;  %v2486_v45 = vpop.f32.mrf.mxu0  ;;  %v2170_v57 = vadd.f32 %v8146_v55, %v8110_v49  ;;  %v2181_v33 = vadd.f32 %v8150_v62, %v8112_v54 }
 0x314   : > { %6810 = vrcp.f32 %v2747_v43  ;;  %v2745_v46 = vadd.f32 1.0, %v6797_v59  ;;  %v5460_v50 = vmul.f32 -1.442695, %v8231_v7  ;;  %v2587_v21 = vadd.f32 %v2486_v45, %v2157_v6  ;;  %v2204_v6 = vpop.f32.mrf.mxu1 }
 0x315   : > { %v6799_v51 = vpop.eup %6798  ;;  %6812 = vpow2.f32 %v5462_v60  ;;  %v8239_v36 = vadd.f32 %v8168_v24, %v2589_v8  ;;  %v6482_v26 = vpop.f32.mrf.mxu0 }
 0x316   : > { %6814 = vrcp.f32 %v2745_v46  ;;  %v2748_v11 = vadd.f32 1.0, %v6799_v51  ;;  %v8242_v0 = vadd.f32 %v8168_v24, %v2587_v21  ;;  %v2592_v31 = vadd.f32 %v6482_v26, %v2178_v13  ;;  %v6460_v21 = vpop.f32.mrf.mxu1 }
 0x317   : > { %v6801_v38 = vpop.eup %6800  ;;  %6816 = vpow2.f32 %v5460_v50  ;;  %v5463_v34 = vmul.f32 -1.442695, %v8239_v36  ;;  %v2499_v19 = vpop.f32.mrf.mxu0  ;;  %v2173_v13 = vadd.f32 %v8156_v35, %v8114_v47 }
 0x318   : > { %6818 = vrcp.f32 %v2748_v11  ;;  %v2746_v42 = vadd.f32 1.0, %v6801_v38  ;;  %v5461_v43 = vmul.f32 -1.442695, %v8242_v0  ;;  %v8251_v60 = vadd.f32 %v8168_v24, %v2592_v31 }
 0x319   : > { %v6803_v59 = vpop.eup %6802  ;;  %6820 = vpow2.f32 %v5463_v34  ;;  %v2590_v49 = vadd.f32 %v2499_v19, %v2170_v57  ;;  %v6483_v55 = vpop.f32.mrf.mxu0  ;;  %v2194_v11 = vadd.f32 %v8163_v16, %v8116_v56  ;;  %v2186_v31 = vadd.f32 %v8172_v15, %v8118_v63 }
 0x31a   : > { %6822 = vrcp.f32 %v2746_v42  ;;  %v2751_v54 = vadd.f32 1.0, %v6803_v59  ;;  %v5466_v62 = vmul.f32 -1.442695, %v8251_v60  ;;  %v2593_v8 = vadd.f32 %v6483_v55, %v2181_v33  ;;  %v2217_v63 = vpop.f32.mrf.mxu1 }
 0x31b   : > { %v6805_v45 = vpop.eup %6804  ;;  %6824 = vpow2.f32 %v5461_v43  ;;  %v8257_v46 = vadd.f32 %v8168_v24, %v2590_v49  ;;  %v2502_v50 = vpop.f32.mrf.mxu0  ;;  %v2197_v43 = vadd.f32 %v8183_v9, %v8120_v44  ;;  %v2189_v16 = vadd.f32 %v8195_v25, %v8122_v12 }
 0x31c   : > { %6826 = vrcp.f32 %v2751_v54  ;;  %v2749_v51 = vadd.f32 1.0, %v6805_v45  ;;  %v8260_v26 = vadd.f32 %v8168_v24, %v2593_v8  ;;  %v2591_v47 = vadd.f32 %v2502_v50, %v2173_v13 }
 0x31d   : > { %v6807_v35 = vpop.eup %6806  ;;  %6828 = vpow2.f32 %v5466_v62  ;;  %v5464_v38 = vmul.f32 -1.442695, %v8257_v46  ;;  %v6486_v57 = vpop.f32.mrf.mxu0  ;;  %v2210_v54 = vadd.f32 %v8207_v20, %v8124_v2  ;;  %v2202_v62 = vadd.f32 %v8219_v5, %v8126_v3 }
 0x31e   : > { %6830 = vrcp.f32 %v2749_v51  ;;  %v2752_v33 = vadd.f32 1.0, %v6807_v35  ;;  %v5467_v34 = vmul.f32 -1.442695, %v8260_v26  ;;  %v8269_v19 = vadd.f32 %v8168_v24, %v2591_v47  ;;  %v6461_v47 = vpop.f32.mrf.mxu1 }
 0x31f   : > { %v6809_v42 = vpop.eup %6808  ;;  %6832 = vpow2.f32 %v5464_v38  ;;  %v2596_v15 = vadd.f32 %v6486_v57, %v2194_v11  ;;  %v2515_v56 = vpop.f32.mrf.mxu0  ;;  %v2213_v25 = vadd.f32 %v8235_v27, %v8128_v4  ;;  %v2205_v2 = vadd.f32 %v2204_v6, %v8132_v23 }
 0x320   : > { %6834 = vrcp.f32 %v2752_v33  ;;  %v2750_v59 = vadd.f32 1.0, %v6809_v42  ;;  %v5465_v13 = vmul.f32 -1.442695, %v8269_v19  ;;  %v2594_v49 = vadd.f32 %v2515_v56, %v2186_v31  ;;  %v2220_v56 = vpop.f32.mrf.mxu1 }
 0x321   : > { %v6811_v55 = vpop.eup %6810  ;;  %6836 = vpow2.f32 %v5467_v34  ;;  %v8281_v44 = vadd.f32 %v8168_v24, %v2596_v15  ;;  %v6487_v12 = vpop.f32.mrf.mxu0  ;;  %v8291_v35 = vadd.f32 %v6460_v21, %v8136_v48  ;;  %v8298_v38 = vadd.f32 %v2217_v63, %v8140_v53 }
 0x322   : > { %v6813_v9 = vpop.eup %6812  ;;  %6838 = vrcp.f32 %v2750_v59  ;;  %v8286_v8 = vadd.f32 %v8168_v24, %v2594_v49  ;;  %v2597_v45 = vadd.f32 %v6487_v12, %v2197_v43  ;;  %v2843_v23 = vmul.f32 %v6811_v55, %v8175_v17 }
 0x323   : > { %v6815_v50 = vpop.eup %6814  ;;  %v2755_v20 = vadd.f32 1.0, %v6813_v9  ;;  %6840 = vpow2.f32 %v5465_v13  ;;  %v5470_v3 = vmul.f32 -1.442695, %v8281_v44  ;;  %v2518_v5 = vpop.f32.mrf.mxu0 }
 0x324   : > { %v6817_v51 = vpop.eup %6816  ;;  %v5468_v4 = vmul.f32 -1.442695, %v8286_v8  ;;  %v8295_v27 = vadd.f32 %v8168_v24, %v2597_v45  ;;  %v2595_v11 = vadd.f32 %v2518_v5, %v2189_v16  ;;  %v2841_v43 = vmul.f32 %v6815_v50, %v8180_v30 }
 0x325   : > { %v6819_v31 = vpop.eup %6818  ;;  %6842 = vrcp.f32 %v2755_v20  ;;  %v2753_v6 = vadd.f32 1.0, %v6817_v51  ;;  %v6490_v57 = vpop.f32.mrf.mxu0 }
 0x326   : > { %v6821_v33 = vpop.eup %6820  ;;  %v2844_v34 = vmul.f32 %v6819_v31, %v8187_v32  ;;  %6844 = vpow2.f32 %v5470_v3  ;;  %v5471_v48 = vmul.f32 -1.442695, %v8295_v27  ;;  %v8304_v21 = vadd.f32 %v8168_v24, %v2595_v11  ;;  %v6464_v11 = vpop.f32.mrf.mxu1 }
 0x327   : > { %v6823_v42 = vpop.eup %6822  ;;  %6846 = vrcp.f32 %v2753_v6  ;;  %v2756_v53 = vadd.f32 1.0, %v6821_v33  ;;  %v2600_v16 = vadd.f32 %v6490_v57, %v2210_v54  ;;  %v2531_v15 = vpop.f32.mrf.mxu0  ;;  %v2229_v54 = vadd.f32 %v6461_v47, %v8144_v29 }
 0x328   : > { %v6825_v17 = vpop.eup %6824  ;;  %v2874_v63 = vpack.c.bf16 %v2844_v34, %v2843_v23  ;;  %v2842_v59 = vmul.f32 %v6823_v42, %v8192_v40  ;;  %6848 = vpow2.f32 %v5468_v4  ;;  %v5469_v32 = vmul.f32 -1.442695, %v8304_v21 }
 0x329   : > { %v6827_v13 = vpop.eup %6826  ;;  %6850 = vrcp.f32 %v2756_v53  ;;  %v2754_v49 = vadd.f32 1.0, %v6825_v17  ;;  %v8310_v55 = vadd.f32 %v8168_v24, %v2600_v16  ;;  %v2598_v12 = vadd.f32 %v2531_v15, %v2202_v62  ;;  %v6491_v30 = vpop.f32.mrf.mxu0 }
 0x32a   : > { %v6829_v9 = vpop.eup %6828  ;;  %6852 = vpow2.f32 %v5471_v48  ;;  %v2601_v45 = vadd.f32 %v6491_v30, %v2213_v25  ;;  %v2873_v50 = vpack.c.bf16 %v2842_v59, %v2841_v43  ;;  %v2221_v62 = vadd.f32 %v2220_v56, %v8148_v58  ;;  %v2233_v15 = vpop.f32.mrf.mxu1 }
 0x32b   : > { %v6831_v20 = vpop.eup %6830  ;;  %6854 = vrcp.f32 %v2754_v49  ;;  %v2759_v40 = vadd.f32 1.0, %v6829_v9  ;;  %v5474_v3 = vmul.f32 -1.442695, %v8310_v55  ;;  %v8315_v5 = vadd.f32 %v8168_v24, %v2598_v12  ;;  %v2534_v51 = vpop.f32.mrf.mxu0 }
 0x32c   : > { %v6833_v4 = vpop.eup %6832  ;;  %6856 = vpow2.f32 %v5469_v32  ;;  %v8319_v31 = vadd.f32 %v8168_v24, %v2601_v45  ;;  %v2599_v29 = vadd.f32 %v2534_v51, %v2205_v2  ;;  %6516 = vmatprep.mubr.bf16.mxu1 %v2873_v50  ;;  %v2847_v47 = vmul.f32 %v6827_v13, %v8199_v22 }
 0x32d   : > { %v6835_v25 = vpop.eup %6834  ;;  %6858 = vrcp.f32 %v2759_v40  ;;  %v2757_v23 = vadd.f32 1.0, %v6833_v4  ;;  %v5472_v6 = vmul.f32 -1.442695, %v8315_v5  ;;  %v6494_v57 = vpop.f32.mrf.mxu0  ;;  %6517 = vmatmul.mubr.bf16.vlgmr.msra.gmra.mxu1 %v2874_v63  ;;  %v2845_v42 = vmul.f32 %v6831_v20, %v8204_v52 }
 0x32e   : > { %v6837_v33 = vpop.eup %6836  ;;  %v2848_v34 = vmul.f32 %v6835_v25, %v8211_v28  ;;  %6860 = vpow2.f32 %v5474_v3  ;;  %v5475_v58 = vmul.f32 -1.442695, %v8319_v31  ;;  %v8326_v48 = vadd.f32 %v8168_v24, %v2599_v29  ;;  %v6465_v40 = vpop.f32.mrf.mxu1 }
 0x32f   : > { %v6839_v2 = vpop.eup %6838  ;;  %6862 = vrcp.f32 %v2757_v23  ;;  %v2760_v22 = vadd.f32 1.0, %v6837_v33  ;;  %v2604_v43 = vadd.f32 %v6494_v57, %v8291_v35  ;;  %v2547_v53 = vpop.f32.mrf.mxu0  ;;  %v2242_v35 = vadd.f32 %v6464_v11, %v8152_v1 }
 0x330   : > { %v6841_v16 = vpop.eup %6840  ;;  %v2876_v17 = vpack.c.bf16 %v2848_v34, %v2847_v47  ;;  %v2846_v56 = vmul.f32 %v6839_v2, %v8217_v18  ;;  %6864 = vpow2.f32 %v5472_v6  ;;  %v5473_v28 = vmul.f32 -1.442695, %v8326_v48 }
 0x331   : > { %6866 = vrcp.f32 %v2760_v22  ;;  %v2758_v63 = vadd.f32 1.0, %v6841_v16  ;;  %v8333_v59 = vadd.f32 %v8168_v24, %v2604_v43  ;;  %v2602_v52 = vadd.f32 %v2547_v53, %v8298_v38  ;;  %v6495_v32 = vpop.f32.mrf.mxu0 }
 0x332   : > { %v6843_v13 = vpop.eup %6842  ;;  %6868 = vpow2.f32 %v5475_v58  ;;  %v2605_v49 = vadd.f32 %v6495_v32, %v2229_v54  ;;  %v2875_v12 = vpack.c.bf16 %v2846_v56, %v2845_v42  ;;  %v2234_v18 = vadd.f32 %v2233_v15, %v8154_v14 }
 0x333   : > { %v6845_v30 = vpop.eup %6844  ;;  %6870 = vrcp.f32 %v2758_v63  ;;  %v5478_v9 = vmul.f32 -1.442695, %v8333_v59  ;;  %v8340_v45 = vadd.f32 %v8168_v24, %v2602_v52  ;;  %v2550_v50 = vpop.f32.mrf.mxu0  ;;  %v2245_v51 = vadd.f32 %v6465_v40, %v8158_v10 }
 0x334   : > { %v6847_v20 = vpop.eup %6846  ;;  %v2763_v38 = vadd.f32 1.0, %v6845_v30  ;;  %6872 = vpow2.f32 %v5473_v28  ;;  %v8343_v3 = vadd.f32 %v8168_v24, %v2605_v49  ;;  %v2603_v1 = vadd.f32 %v2550_v50, %v2221_v62  ;;  %6520 = vmatprep.mubr.bf16.mxu1 %v2875_v12 }
 0x335   : > { %v6849_v54 = vpop.eup %6848  ;;  %v2851_v14 = vmul.f32 %v6843_v13, %v8223_v61  ;;  %6874 = vpow2.f32 %v5478_v9  ;;  %v5476_v4 = vmul.f32 -1.442695, %v8340_v45  ;;  %v6498_v11 = vpop.f32.mrf.mxu0  ;;  %6521 = vmatmul.mubr.bf16.gmra.mxu1 %v2876_v17  ;;  %v2849_v6 = vmul.f32 %v6847_v20, %v8231_v7 }
 0x336   : > { %v6851_v29 = vpop.eup %6850  ;;  %6876 = vrcp.f32 %v2763_v38  ;;  %v2761_v25 = vadd.f32 1.0, %v6849_v54  ;;  %v5479_v47 = vmul.f32 -1.442695, %v8343_v3  ;;  %v8350_v23 = vadd.f32 %v8168_v24, %v2603_v1 }
 0x337   : > { %v6853_v62 = vpop.eup %6852  ;;  %v2852_v10 = vmul.f32 %v6851_v29, %v8239_v36  ;;  %6878 = vpow2.f32 %v5476_v4  ;;  %v2608_v61 = vadd.f32 %v6498_v11, %v2242_v35  ;;  %v2563_v57 = vpop.f32.mrf.mxu0 }
 0x338   : > { %v6855_v33 = vpop.eup %6854  ;;  %6880 = vrcp.f32 %v2761_v25  ;;  %v2764_v34 = vadd.f32 1.0, %v6853_v62  ;;  %v5477_v58 = vmul.f32 -1.442695, %v8350_v23  ;;  %v2606_v2 = vadd.f32 %v2563_v57, %v2234_v18  ;;  %v2236_v36 = vpop.f32.mrf.mxu1 }
 0x339   : > { %v6857_v42 = vpop.eup %6856  ;;  %v2878_v22 = vpack.c.bf16 %v2852_v10, %v2851_v14  ;;  %v2850_v43 = vmul.f32 %v6855_v33, %v8242_v0  ;;  %6882 = vpow2.f32 %v5479_v47  ;;  %v8357_v53 = vadd.f32 %v8168_v24, %v2608_v61  ;;  %v6499_v7 = vpop.f32.mrf.mxu0 }
 0x33a   : > { %v6859_v16 = vpop.eup %6858  ;;  %6884 = vrcp.f32 %v2764_v34  ;;  %v2762_v15 = vadd.f32 1.0, %v6857_v42  ;;  %v8360_v17 = vadd.f32 %v8168_v24, %v2606_v2  ;;  %v2609_v56 = vadd.f32 %v6499_v7, %v2245_v51 }
 0x33b   : > { %v6861_v28 = vpop.eup %6860  ;;  %v2237_v63 = vadd.f32 %v2236_v36, %v8160_v39  ;;  %6886 = vpow2.f32 %v5477_v58  ;;  %v5482_v52 = vmul.f32 -1.442695, %v8357_v53  ;;  %v2566_v0 = vpop.f32.mrf.mxu0  ;;  %v2877_v32 = vpack.c.bf16 %v2850_v43, %v2849_v6 }
 0x33c   : > { %v6863_v13 = vpop.eup %6862  ;;  %6888 = vrcp.f32 %v2762_v15  ;;  %v2767_v35 = vadd.f32 1.0, %v6861_v28  ;;  %v5480_v49 = vmul.f32 -1.442695, %v8360_v17  ;;  %v8366_v12 = vadd.f32 %v8168_v24, %v2609_v56 }
 0x33d   : > { %v6865_v30 = vpop.eup %6864  ;;  %6890 = vpow2.f32 %v5482_v52  ;;  %v2607_v18 = vadd.f32 %v2566_v0, %v2237_v63  ;;  %6524 = vmatprep.mubr.bf16.mxu1 %v2877_v32  ;;  %v2855_v40 = vmul.f32 %v6859_v16, %v8251_v60  ;;  %v2853_v51 = vmul.f32 %v6863_v13, %v8257_v46 }
 0x33e   : > { %v6867_v9 = vpop.eup %6866  ;;  %6892 = vrcp.f32 %v2767_v35  ;;  %v2765_v39 = vadd.f32 1.0, %v6865_v30  ;;  %v5483_v50 = vmul.f32 -1.442695, %v8366_v12  ;;  %6525 = vmatmul.mubr.bf16.gmra.mxu1 %v2878_v22 }
 0x33f   : > { %v6869_v20 = vpop.eup %6868  ;;  %v2856_v38 = vmul.f32 %v6867_v9, %v8260_v26  ;;  %6894 = vpow2.f32 %v5480_v49  ;;  %v8372_v1 = vadd.f32 %v8168_v24, %v2607_v18 }
 0x340   : > { %v6871_v54 = vpop.eup %6870  ;;  %6896 = vrcp.f32 %v2765_v39  ;;  %v2768_v14 = vadd.f32 1.0, %v6869_v20 }
 0x341   : > { %v6873_v4 = vpop.eup %6872  ;;  %v2880_v11 = vpack.c.bf16 %v2856_v38, %v2855_v40  ;;  %v2854_v29 = vmul.f32 %v6871_v54, %v8269_v19  ;;  %6898 = vpow2.f32 %v5483_v50  ;;  %v5481_v25 = vmul.f32 -1.442695, %v8372_v1 }
 0x342   : > { %v6875_v47 = vpop.eup %6874  ;;  %6900 = vrcp.f32 %v2768_v14  ;;  %v2766_v60 = vadd.f32 1.0, %v6873_v4 }
 0x343   : > { %v6877_v26 = vpop.eup %6876  ;;  %v2771_v62 = vadd.f32 1.0, %v6875_v47  ;;  %6902 = vpow2.f32 %v5481_v25  ;;  %v2879_v24 = vpack.c.bf16 %v2854_v29, %v2853_v51 }
 0x344   : > { %v6879_v6 = vpop.eup %6878  ;;  %6904 = vrcp.f32 %v2766_v60  ;;  %v2859_v34 = vmul.f32 %v6877_v26, %v8281_v44  ;;  %v9266_v60 = vlaneseq }
 0x345   : > { %v6881_v10 = vpop.eup %6880  ;;  %v2769_v46 = vadd.f32 1.0, %v6879_v6  ;;  %6528 = vmatprep.mubr.bf16.mxu1 %v2879_v24  ;;  %6906 = vrcp.f32 %v2771_v62 }
 0x346   : > { %v6883_v61 = vpop.eup %6882  ;;  %6529 = vmatmul.mubr.bf16.gmra.mxu1 %v2880_v11  ;;  %v2857_v43 = vmul.f32 %v6881_v10, %v8286_v8  ;;  %v8399_v26 = vshrl.u32 %v9266_v60, 7 }
 0x347   : > { %v6885_v57 = vpop.eup %6884  ;;  %v2772_v19 = vadd.f32 1.0, %v6883_v61  ;;  %6908 = vrcp.f32 %v2769_v46 }
 0x348   : > { %v6887_v33 = vpop.eup %6886  ;;  %v2860_v58 = vmul.f32 %v6885_v57, %v8295_v27  ;;  %v8413_v24 = vadd.s32 8, %v8399_v26 }
 0x349   : > { %v6889_v2 = vpop.eup %6888  ;;  %6910 = vrcp.f32 %v2772_v19  ;;  %v2770_v42 = vadd.f32 1.0, %v6887_v33 }
 0x34a   : > { %v6891_v22 = vpop.eup %6890  ;;  %v2882_v7 = vpack.c.bf16 %v2860_v58, %v2859_v34  ;;  %v2858_v16 = vmul.f32 %v6889_v2, %v8304_v21  ;;  %v9267_v34 = vmov 1.0|1.0  }
 0x34b   : > { %v6893_v36 = vpop.eup %6892  ;;  %6912 = vrcp.f32 %v2770_v42  ;;  %v2775_v15 = vadd.f32 1.0, %v6891_v22 }
 0x34c   : > { %v6895_v56 = vpop.eup %6894  ;;  %v2881_v28 = vpack.c.bf16 %v2858_v16, %v2857_v43  ;;  %v2863_v13 = vmul.f32 %v6893_v36, %v8310_v55 }
 0x34d   : > { %v6897_v63 = vpop.eup %6896  ;;  %v2773_v52 = vadd.f32 1.0, %v6895_v56  ;;  %6914 = vrcp.f32 %v2775_v15 }
 0x34e   : > { %v6899_v44 = vpop.eup %6898  ;;  %6532 = vmatprep.mubr.bf16.mxu1 %v2881_v28  ;;  %v2861_v49 = vmul.f32 %v6897_v63, %v8315_v5 }
 0x34f   : > { %v6901_v27 = vpop.eup %6900  ;;  %v2776_v0 = vadd.f32 1.0, %v6899_v44  ;;  %6533 = vmatmul.mubr.bf16.gmra.mxu1 %v2882_v7  ;;  %6916 = vrcp.f32 %v2773_v52 }
 0x350   : > { %v6903_v32 = vpop.eup %6902  ;;  %v2864_v8 = vmul.f32 %v6901_v27, %v8319_v31 }
 0x351   : > { %v6905_v21 = vpop.eup %6904  ;;  %6918 = vrcp.f32 %v2776_v0  ;;  %v2774_v35 = vadd.f32 1.0, %v6903_v32 }
 0x352   : > { %v2884_v30 = vpack.c.bf16 %v2864_v8, %v2863_v13  ;;  %v2862_v18 = vmul.f32 %v6905_v21, %v8326_v48  ;;  %v6907_v9 = vpop.eup %6906 }
 0x353   : > { %6920 = vrcp.f32 %v2774_v35  ;;  %v2867_v40 = vmul.f32 %v6907_v9, %v8333_v59 }
 0x354   : > { %v2883_v39 = vpack.c.bf16 %v2862_v18, %v2861_v49  ;;  %v6909_v50 = vpop.eup %6908 }
 0x355   : > { %v2865_v38 = vmul.f32 %v6909_v50, %v8340_v45 }
 0x356   : > { %v6911_v20 = vpop.eup %6910  ;;  %6536 = vmatprep.mubr.bf16.mxu1 %v2883_v39 }
 0x357   : > { %v2868_v55 = vmul.f32 %v6911_v20, %v8343_v3  ;;  %6537 = vmatmul.mubr.bf16.gmra.mxu1 %v2884_v30 }
 0x358   : > { %v6913_v31 = vpop.eup %6912 }
 0x359   : > { %v2886_v54 = vpack.c.bf16 %v2868_v55, %v2867_v40  ;;  %v2866_v5 = vmul.f32 %v6913_v31, %v8350_v23  ;;  %v8396_v23 = vld [vmem:[%s9165_s10] ss:$0 sm:$0xff] }
 0x35a   : > { %v6915_v14 = vpop.eup %6914 }
 0x35b   : > { %v2885_v51 = vpack.c.bf16 %v2866_v5, %v2865_v38  ;;  %v2871_v11 = vmul.f32 %v6915_v14, %v8357_v53 }
 0x35c   : > { %v6917_v48 = vpop.eup %6916 }
 0x35d   : > { %6540 = vmatprep.mubr.bf16.mxu1 %v2885_v51  ;;  %v2869_v3 = vmul.f32 %v6917_v48, %v8360_v17  ;;  %v8410_v17 = vld [vmem:[%s564_s21] sm:$0x3] }
 0x35e   : > { %v6919_v4 = vpop.eup %6918 }
 0x35f   : > { %v2872_v29 = vmul.f32 %v6919_v4, %v8366_v12  ;;  %6541 = vmatmul.mubr.bf16.gmra.mxu1 %v2886_v54  ;;  %v3385_v12 = vsub.s32 1, %v8399_v26 }
 0x360   : > { %v6921_v59 = vpop.eup %6920 }
 0x361   : > { %v2888_v25 = vpack.c.bf16 %v2872_v29, %v2871_v11  ;;  %v2870_v45 = vmul.f32 %v6921_v59, %v8372_v1  ;;  %v8416_v6 = vrot.slane %v8410_v17, %v3385_v12 }
 0x363   : > { %v2887_v47 = vpack.c.bf16 %v2870_v45, %v2869_v3  ;;  %vm3388_vm1 = vcmp.eq.s32.totalorder %v8416_v6, %v8399_v26  ;;  %vm3390_vm11 = vcmp.eq.s32.totalorder %v8416_v6, %v8413_v24 }
 0x364   : > { %vm5589_vm2 = vmpackc.low %vm3390_vm11, %vm3388_vm1 }
 0x365   : > { %6544 = vmatprep.mubr.bf16.mxu1 %v2887_v47  ;;  %5590 = vmatprep.mubr.msk.bf16.mxu0 %vm5589_vm2, %v9267_v34 }
 0x367   : > { %6545 = vmatmul.mubr.bf16.gmra.mxu1 %v2888_v25 }
 0x3ed   : > { %v6518_v53 = vpop.f32.mrf.mxu1 }
 0x3ee   : > { %v8403_v62 = vadd.f32 %v6518_v53, %v8396_v23 }
 0x3ef   : > { %v2994_v1 = vpop.f32.mrf.mxu1 }
 0x3f0   : > { %v5495_v10 = vmul.f32 -1.442695, %v8403_v62  ;;  %v8420_v46 = vadd.f32 %v8396_v23, %v2994_v1 }
 0x3f1   : > { %v6519_v61 = vpop.f32.mrf.mxu1 }
 0x3f2   : > { %6922 = vpow2.f32 %v5495_v10  ;;  %v5493_v57 = vmul.f32 -1.442695, %v8420_v46  ;;  %v8428_v19 = vadd.f32 %v6519_v61, %v8396_v23 }
 0x3f3   : > { %v2997_v33 = vpop.f32.mrf.mxu1 }
 0x3f4   : > { %6924 = vpow2.f32 %v5493_v57  ;;  %v5496_v58 = vmul.f32 -1.442695, %v8428_v19  ;;  %v8433_v2 = vadd.f32 %v8396_v23, %v2997_v33 }
 0x3f5   : > { %v6522_v42 = vpop.f32.mrf.mxu1 }
 0x3f6   : > { %6926 = vpow2.f32 %v5496_v58  ;;  %v5494_v22 = vmul.f32 -1.442695, %v8433_v2  ;;  %v8437_v43 = vadd.f32 %v6522_v42, %v8396_v23 }
 0x3f7   : > { %v3010_v7 = vpop.f32.mrf.mxu1 }
 0x3f8   : > { %6928 = vpow2.f32 %v5494_v22  ;;  %v5499_v16 = vmul.f32 -1.442695, %v8437_v43  ;;  %v8441_v36 = vadd.f32 %v8396_v23, %v3010_v7 }
 0x3f9   : > { %v6523_v15 = vpop.f32.mrf.mxu1 }
 0x3fa   : > { %6930 = vpow2.f32 %v5499_v16  ;;  %v5497_v56 = vmul.f32 -1.442695, %v8441_v36  ;;  %v3022_v28 = vadd.f32 %v6523_v15, %v8396_v23 }
 0x3fb   : > { %v3013_v63 = vpop.f32.mrf.mxu1 }
 0x3fc   : > { %6932 = vpow2.f32 %v5497_v56  ;;  %v5500_v52 = vmul.f32 -1.442695, %v3022_v28  ;;  %v8446_v44 = vadd.f32 %v8396_v23, %v3013_v63 }
 0x3fe   : > { %6934 = vpow2.f32 %v5500_v52  ;;  %v5498_v27 = vmul.f32 -1.442695, %v8446_v44  ;;  %v6526_v0 = vpop.f32.mrf.mxu1 }
 0x3ff   : > { %v6923_v32 = vpop.eup %6922  ;;  %v8482_v56 = vadd.f32 %v6526_v0, %v8396_v23 }
 0x400   : > { %v3219_v13 = vadd.f32 1.0, %v6923_v32  ;;  %6936 = vpow2.f32 %v5498_v27  ;;  %v3026_v8 = vpop.f32.mrf.mxu1 }
 0x401   : > { %v6925_v21 = vpop.eup %6924 }
 0x402   : > { %v3217_v35 = vadd.f32 1.0, %v6925_v21  ;;  %v6527_v49 = vpop.f32.mrf.mxu1  ;;  %6938 = vrcp.f32 %v3219_v13 }
 0x403   : > { %v6927_v30 = vpop.eup %6926  ;;  %v8498_v32 = vadd.f32 %v6527_v49, %v8396_v23 }
 0x404   : > { %v3220_v18 = vadd.f32 1.0, %v6927_v30  ;;  %v3029_v9 = vpop.f32.mrf.mxu1  ;;  %6940 = vrcp.f32 %v3217_v35  ;;  %v5503_v35 = vmul.f32 -1.442695, %v8482_v56 }
 0x405   : > { %v6929_v39 = vpop.eup %6928 }
 0x406   : > { %6942 = vrcp.f32 %v3220_v18  ;;  %v3218_v50 = vadd.f32 1.0, %v6929_v39  ;;  %v6530_v20 = vpop.f32.mrf.mxu1  ;;  %v5504_v18 = vmul.f32 -1.442695, %v8498_v32 }
 0x407   : > { %v6931_v40 = vpop.eup %6930  ;;  %v8479_v15 = vadd.f32 %v6530_v20, %v8396_v23 }
 0x408   : > { %6944 = vrcp.f32 %v3218_v50  ;;  %v3223_v55 = vadd.f32 1.0, %v6931_v40  ;;  %v3042_v31 = vpop.f32.mrf.mxu1 }
 0x409   : > { %v6933_v38 = vpop.eup %6932  ;;  %v5507_v21 = vmul.f32 -1.442695, %v8479_v15 }
 0x40a   : > { %v3221_v54 = vadd.f32 1.0, %v6933_v38  ;;  %v6531_v5 = vpop.f32.mrf.mxu1  ;;  %6946 = vrcp.f32 %v3223_v55 }
 0x40b   : > { %v6935_v51 = vpop.eup %6934  ;;  %v8512_v49 = vadd.f32 %v6531_v5, %v8396_v23 }
 0x40c   : > { %v3224_v14 = vadd.f32 1.0, %v6935_v51  ;;  %v3045_v48 = vpop.f32.mrf.mxu1  ;;  %6948 = vrcp.f32 %v3221_v54 }
 0x40d   : > { %v6937_v4 = vpop.eup %6936  ;;  %v8516_v39 = vadd.f32 %v8396_v23, %v3045_v48 }
 0x40e   : > { %6950 = vrcp.f32 %v3224_v14  ;;  %v3222_v11 = vadd.f32 1.0, %v6937_v4 }
 0x40f   : > { %v6534_v29 = vpop.f32.mrf.mxu1  ;;  %v6939_v59 = vpop.eup %6938  ;;  %v5506_v54 = vmul.f32 -1.442695, %v8516_v39 }
 0x410   : > { %6952 = vrcp.f32 %v3222_v11  ;;  %v8452_v60 = vmul.f32 %v6939_v59, %v8403_v62  ;;  %v8520_v40 = vadd.f32 %v6534_v29, %v8396_v23 }
 0x411   : > { %v3058_v3 = vpop.f32.mrf.mxu1  ;;  %v6941_v25 = vpop.eup %6940  ;;  %6954 = vpow2.f32 %v5507_v21 }
 0x412   : > { %v8460_v10 = vmul.f32 %v6941_v25, %v8420_v46  ;;  %6956 = vpow2.f32 %v5503_v35  ;;  %v5511_v51 = vmul.f32 -1.442695, %v8520_v40  ;;  %v8536_v4 = vadd.f32 %v8396_v23, %v3058_v3 }
 0x413   : > { %v6943_v45 = vpop.eup %6942  ;;  %v8449_v47 = vpop.f32.mrf.mxu1 }
 0x414   : > { %v8455_v53 = vmul.f32 %v6943_v45, %v8428_v19  ;;  %v8557_v21 = vadd.f32 %v8449_v47, %v8396_v23 }
 0x415   : > { %v6945_v12 = vpop.eup %6944  ;;  %v8457_v1 = vpop.f32.mrf.mxu1 }
 0x416   : > { %v8465_v57 = vmul.f32 %v6945_v12, %v8433_v2 }
 0x417   : > { %v8467_v33 = vpop.f32.mrf.mxu1  ;;  %v6947_v58 = vpop.eup %6946 }
 0x418   : > { %v8474_v46 = vmul.f32 %v6947_v58, %v8437_v43  ;;  %v8570_v47 = vadd.f32 %v8467_v33, %v8396_v23 }
 0x419   : > { %v8471_v19 = vpop.f32.mrf.mxu1  ;;  %v6949_v42 = vpop.eup %6948 }
 0x41a   : > { %v8487_v52 = vmul.f32 %v6949_v42, %v8441_v36  ;;  %v8504_v36 = vadd.f32 %v8396_v23, %v3042_v31  ;;  %v5508_v31 = vmul.f32 -1.442695, %v8512_v49 }
 0x41b   : > { %v6951_v22 = vpop.eup %6950  ;;  %v6539_v7 = vpop.f32.mrf.mxu1 }
 0x41c   : > { %v8476_v16 = vmul.f32 %v6951_v22, %v3022_v28  ;;  %v8495_v28 = vadd.f32 %v8396_v23, %v3026_v8  ;;  %v5505_v20 = vmul.f32 -1.442695, %v8504_v36  ;;  %v5509_v22 = vmul.f32 -1.442695, %v8536_v4 }
 0x41d   : > { %v6953_v2 = vpop.eup %6952  ;;  %v8484_v63 = vpop.f32.mrf.mxu1 }
 0x41e   : > { %v8492_v43 = vmul.f32 %v6953_v2, %v8446_v44  ;;  %v8508_v44 = vadd.f32 %v8396_v23, %v3029_v9  ;;  %v5501_v8 = vmul.f32 -1.442695, %v8495_v28 }
 0x41f   : > { %v6542_v13 = vpop.f32.mrf.mxu1 }
 0x420   : > { %v5502_v9 = vmul.f32 -1.442695, %v8508_v44  ;;  %6958 = vpow2.f32 %v5501_v8  ;;  %v8530_v14 = vadd.f32 %v6542_v13, %v8396_v23 }
 0x421   : > { %v3090_v30 = vpop.f32.mrf.mxu1  ;;  %6960 = vpow2.f32 %v5504_v18  ;;  %v8564_v18 = vadd.f32 %v6539_v7, %v8396_v23  ;;  %v8576_v7 = vadd.f32 %v8396_v23, %v8457_v1 }
 0x422   : > { %6962 = vpow2.f32 %v5505_v20  ;;  %v5519_v58 = vmul.f32 -1.442695, %v8530_v14  ;;  %v8553_v2 = vadd.f32 %v8396_v23, %v3090_v30  ;;  %v6955_v20 = vpop.eup %6954 }
 0x423   : > { %v6543_v50 = vpop.f32.mrf.mxu1  ;;  %6964 = vpow2.f32 %v5502_v9 }
 0x424   : > { %v8525_v38 = vadd.f32 %v6543_v50, %v8396_v23  ;;  %6966 = vpow2.f32 %v5508_v31  ;;  %v5517_v9 = vmul.f32 -1.442695, %v8553_v2  ;;  %v5512_v31 = vmul.f32 -1.442695, %v8557_v21 }
 0x425   : > { %v3093_v55 = vpop.f32.mrf.mxu1  ;;  %6968 = vpow2.f32 %v5506_v54 }
 0x426   : > { %v5520_v29 = vmul.f32 -1.442695, %v8525_v38  ;;  %v8544_v45 = vadd.f32 %v8396_v23, %v3093_v55  ;;  %6970 = vpow2.f32 %v5511_v51  ;;  %v6957_v55 = vpop.eup %6956  ;;  %v8583_v51 = vadd.f32 %v8396_v23, %v8484_v63 }
 0x427   : > { %v6546_v5 = vpop.f32.mrf.mxu1 }
 0x428   : > { %v8533_v48 = vadd.f32 %v6546_v5, %v8396_v23  ;;  %v5518_v50 = vmul.f32 -1.442695, %v8544_v45  ;;  %v5516_v5 = vmul.f32 -1.442695, %v8564_v18  ;;  %v5514_v63 = vmul.f32 -1.442695, %v8583_v51 }
 0x429   : > { %v3106_v11 = vpop.f32.mrf.mxu1 }
 0x42a   : > { %v5523_v59 = vmul.f32 -1.442695, %v8533_v48  ;;  %v8541_v25 = vadd.f32 %v8396_v23, %v3106_v11  ;;  %v3231_v11 = vadd.f32 1.0, %v6955_v20 }
 0x42b   : > { %v6547_v12 = vpop.f32.mrf.mxu1 }
 0x42c   : > { %v5521_v3 = vmul.f32 -1.442695, %v8541_v25  ;;  %v8549_v42 = vadd.f32 %v6547_v12, %v8396_v23  ;;  %6972 = vpow2.f32 %v5523_v59  ;;  %v5515_v59 = vmul.f32 -1.442695, %v8570_v47 }
 0x42d   : > { %v3109_v13 = vpop.f32.mrf.mxu1  ;;  %6974 = vpow2.f32 %v5520_v29  ;;  %v8578_v54 = vpop.eup %6958  ;;  %v8588_v12 = vadd.f32 %v8396_v23, %v8471_v19 }
 0x42e   : > { %v5524_v35 = vmul.f32 -1.442695, %v8549_v42  ;;  %v8561_v8 = vadd.f32 %v8396_v23, %v3109_v13  ;;  %6976 = vpow2.f32 %v5521_v3  ;;  %v6961_v33 = vpop.eup %6960 }
 0x42f   : > { %6978 = vpow2.f32 %v5519_v58  ;;  %v6963_v29 = vpop.eup %6962  ;;  %v5510_v58 = vmul.f32 -1.442695, %v8576_v7 }
 0x430   : > { %v5522_v30 = vmul.f32 -1.442695, %v8561_v8  ;;  %6980 = vpow2.f32 %v5524_v35  ;;  %v6965_v1 = vpop.eup %6964  ;;  %v3229_v13 = vadd.f32 1.0, %v6963_v29 }
 0x431   : > { %6982 = vpow2.f32 %v5509_v22  ;;  %v6967_v3 = vpop.eup %6966 }
 0x432   : > { %6984 = vpow2.f32 %v5518_v50  ;;  %v6969_v22 = vpop.eup %6968  ;;  %v5513_v50 = vmul.f32 -1.442695, %v8588_v12  ;;  %v3232_v23 = vadd.f32 1.0, %v6967_v3 }
 0x433   : > { %6986 = vpow2.f32 %v5522_v30  ;;  %v8592_v35 = vpop.eup %6970 }
 0x434   : > { %6988 = vpow2.f32 %v5517_v9 }
 0x435   : > { %6990 = vpow2.f32 %v5512_v31  ;;  %v3230_v31 = vadd.f32 1.0, %v6969_v22 }
 0x436   : > { %6992 = vpow2.f32 %v5516_v5 }
 0x437   : > { %6994 = vrcp.f32 %v3231_v11 }
 0x438   : > { %6996 = vpow2.f32 %v5515_v59 }
 0x439   : > { %v6973_v30 = vpop.eup %6972  ;;  %6998 = vpow2.f32 %v5510_v58 }
 0x43a   : > { %v6975_v19 = vpop.eup %6974  ;;  %7000 = vpow2.f32 %v5514_v63  ;;  %v3247_v20 = vadd.f32 1.0, %v6973_v30  ;;  %v3228_v30 = vadd.f32 1.0, %v6961_v33  ;;  %v3225_v33 = vadd.f32 1.0, %v8578_v54 }
 0x43b   : > { %v6977_v9 = vpop.eup %6976  ;;  %7002 = vrcp.f32 %v3229_v13  ;;  %v3244_v61 = vadd.f32 1.0, %v6975_v19 }
 0x43c   : > { %v6979_v5 = vpop.eup %6978  ;;  %7004 = vpow2.f32 %v5513_v50  ;;  %v3245_v11 = vadd.f32 1.0, %v6977_v9 }
 0x43d   : > { %v6981_v62 = vpop.eup %6980  ;;  %7006 = vrcp.f32 %v3232_v23  ;;  %v3243_v58 = vadd.f32 1.0, %v6979_v5  ;;  %v3227_v23 = vadd.f32 1.0, %v6957_v55 }
 0x43e   : > { %v8595_v29 = vpop.eup %6982  ;;  %7008 = vrcp.f32 %v3247_v20  ;;  %v3248_v59 = vadd.f32 1.0, %v6981_v62  ;;  %v3226_v62 = vadd.f32 1.0, %v6965_v1 }
 0x43f   : > { %v6985_v0 = vpop.eup %6984  ;;  %7010 = vrcp.f32 %v3230_v31 }
 0x440   : > { %v6987_v3 = vpop.eup %6986  ;;  %7012 = vrcp.f32 %v3248_v59  ;;  %v3242_v50 = vadd.f32 1.0, %v6985_v0 }
 0x441   : > { %v6989_v63 = vpop.eup %6988  ;;  %7014 = vrcp.f32 %v3245_v11  ;;  %v3246_v13 = vadd.f32 1.0, %v6987_v3 }
 0x442   : > { %v6991_v22 = vpop.eup %6990  ;;  %7016 = vrcp.f32 %v3244_v61  ;;  %v3241_v19 = vadd.f32 1.0, %v6989_v63 }
 0x443   : > { %v6993_v27 = vpop.eup %6992  ;;  %7018 = vrcp.f32 %v3246_v13  ;;  %v3236_v13 = vadd.f32 1.0, %v6991_v22 }
 0x444   : > { %v6995_v9 = vpop.eup %6994  ;;  %7020 = vrcp.f32 %v3243_v58  ;;  %v3240_v37 = vadd.f32 1.0, %v6993_v27 }
 0x445   : > { %v6997_v20 = vpop.eup %6996  ;;  %7022 = vrcp.f32 %v3228_v30 }
 0x446   : > { %v6999_v31 = vpop.eup %6998  ;;  %7024 = vrcp.f32 %v3242_v50  ;;  %v3239_v59 = vadd.f32 1.0, %v6997_v20  ;;  %v3235_v20 = vadd.f32 1.0, %v8592_v35 }
 0x447   : > { %v7001_v5 = vpop.eup %7000  ;;  %7026 = vrcp.f32 %v3227_v23 }
 0x448   : > { %v7003_v11 = vpop.eup %7002  ;;  %7028 = vrcp.f32 %v3241_v19  ;;  %v3238_v55 = vadd.f32 1.0, %v7001_v5  ;;  %v3327_v19 = vmul.f32 %v6995_v9, %v8479_v15 }
 0x449   : > { %v7005_v61 = vpop.eup %7004  ;;  %7030 = vrcp.f32 %v3226_v62  ;;  %v3325_v9 = vmul.f32 %v7003_v11, %v8504_v36 }
 0x44a   : > { %v7007_v0 = vpop.eup %7006  ;;  %7032 = vrcp.f32 %v3240_v37  ;;  %v3237_v1 = vadd.f32 1.0, %v7005_v61 }
 0x44b   : > { %v7009_v3 = vpop.eup %7008  ;;  %7034 = vrcp.f32 %v3225_v33  ;;  %v3328_v27 = vmul.f32 %v7007_v0, %v8512_v49 }
 0x44c   : > { %v7011_v58 = vpop.eup %7010  ;;  %7036 = vrcp.f32 %v3239_v59  ;;  %v3343_v54 = vmul.f32 %v7009_v3, %v8533_v48  ;;  %v3234_v48 = vadd.f32 1.0, %v6999_v31 }
 0x44d   : > { %v7013_v63 = vpop.eup %7012  ;;  %7038 = vrcp.f32 %v3238_v55  ;;  %v3650_v33 = vpack.c.bf16 %v3328_v27, %v3327_v19  ;;  %v3326_v59 = vmul.f32 %v7011_v58, %v8516_v39  ;;  %v3233_v55 = vadd.f32 1.0, %v8595_v29 }
 0x44e   : > { %v7015_v30 = vpop.eup %7014  ;;  %v3344_v50 = vmul.f32 %v7013_v63, %v8549_v42  ;;  %7040 = vrcp.f32 %v3237_v1 }
 0x44f   : > { %v7017_v23 = vpop.eup %7016  ;;  %v3341_v49 = vmul.f32 %v7015_v30, %v8541_v25  ;;  %7042 = vrcp.f32 %v3236_v13  ;;  %v3649_v3 = vpack.c.bf16 %v3326_v59, %v3325_v9  ;;  %v3363_v9 = vadd.s32 136, %v8399_v26 }
 0x450   : > { %v7019_v37 = vpop.eup %7018  ;;  %v3658_v62 = vpack.c.bf16 %v3344_v50, %v3343_v54  ;;  %v3340_v42 = vmul.f32 %v7017_v23, %v8525_v38  ;;  %7044 = vrcp.f32 %v3235_v20 }
 0x451   : > { %v7021_v5 = vpop.eup %7020  ;;  %v3342_v22 = vmul.f32 %v7019_v37, %v8561_v8  ;;  %7046 = vrcp.f32 %v3234_v48  ;;  %v3360_v48 = vadd.s32 112, %v8399_v26 }
 0x452   : > { %v7023_v61 = vpop.eup %7022  ;;  %6186 = vmatprep.subr.bf16.mxu0 %v3658_v62  ;;  %v3339_v39 = vmul.f32 %v7021_v5, %v8530_v14  ;;  %7048 = vrcp.f32 %v3233_v55  ;;  %v3366_v55 = vadd.s32 160, %v8399_v26 }
 0x453   : > { %v7025_v15 = vpop.eup %7024  ;;  %6187 = vmatpush3.bf16.msra.mxu0 %v3650_v33  ;;  %v3657_v35 = vpack.c.bf16 %v3342_v22, %v3341_v49  ;;  %v3324_v8 = vmul.f32 %v7023_v61, %v8498_v32  ;;  %v9270_v22 = vpack.c.bf16 %v8455_v53, %v8452_v60  ;;  %v3350_v60 = vadd.s32 32, %v8399_v26 }
 0x454   : > { %v7027_v0 = vpop.eup %7026  ;;  %v3338_v38 = vmul.f32 %v7025_v15, %v8544_v45  ;;  %v3656_v58 = vpack.c.bf16 %v3340_v42, %v3339_v39  ;;  %v3351_v53 = vadd.s32 40, %v8399_v26  ;;  %v3359_v61 = vadd.s32 104, %v8399_v26 }
 0x455   : > { %v7029_v25 = vpop.eup %7028  ;;  %6188 = vmatprep.subr.bf16.mxu0 %v3657_v35  ;;  %v3323_v36 = vmul.f32 %v7027_v0, %v8482_v56  ;;  %vm3396_vm14 = vcmp.eq.s32.totalorder %v8416_v6, %v3350_v60  ;;  %v3361_v42 = vadd.s32 120, %v8399_v26  ;;  %v3362_v15 = vadd.s32 128, %v8399_v26 }
 0x456   : > { %v7031_v31 = vpop.eup %7030  ;;  %v3337_v29 = vmul.f32 %v7029_v25, %v8553_v2  ;;  %vm3398_vm5 = vcmp.eq.s32.totalorder %v8416_v6, %v3351_v53  ;;  %v3364_v35 = vadd.s32 144, %v8399_v26  ;;  %v3365_v0 = vadd.s32 152, %v8399_v26 }
 0x457   : > { %v7033_v1 = vpop.eup %7032  ;;  %6189 = vmatpush3.bf16.msra.mxu0 %v3649_v3  ;;  %v3648_v63 = vpack.c.bf16 %v3324_v8, %v3323_v36  ;;  %v3322_v32 = vmul.f32 %v7031_v31, %v8508_v44  ;;  %vm5597_vm8 = vmpackc.low %vm3398_vm5, %vm3396_vm14  ;;  %v3367_v39 = vadd.s32 168, %v8399_v26  ;;  %v3368_v25 = vadd.s32 176, %v8399_v26 }
 0x458   : > { %v7035_v11 = vpop.eup %7034  ;;  %6190 = vmatprep.subr.bf16.mxu0 %v3656_v58  ;;  %v3336_v27 = vmul.f32 %v7033_v1, %v8564_v18  ;;  %v3655_v30 = vpack.c.bf16 %v3338_v38, %v3337_v29  ;;  %v3369_v8 = vadd.s32 184, %v8399_v26  ;;  %v3370_v3 = vadd.s32 192, %v8399_v26 }
 0x459   : > { %v7037_v14 = vpop.eup %7036  ;;  %v3321_v45 = vmul.f32 %v7035_v11, %v8495_v28  ;;  %v9268_v28 = vpack.c.bf16 %v8476_v16, %v8474_v46  ;;  %v3348_v46 = vadd.s32 16, %v8399_v26  ;;  %v3349_v16 = vadd.s32 24, %v8399_v26 }
 0x45a   : > { %v7039_v13 = vpop.eup %7038  ;;  %v3335_v54 = vmul.f32 %v7037_v14, %v8570_v47  ;;  %v3371_v31 = vadd.s32 200, %v8399_v26  ;;  %v3372_v38 = vadd.s32 208, %v8399_v26  ;;  %v3373_v58 = vadd.s32 216, %v8399_v26  ;;  %v3611_v14 = vld [vmem:[#allocation2 + $0xb0] sm:$0xff] }
 0x45b   : > { %6191 = vmatpush3.bf16.msra.mxu0 %v3648_v63  ;;  %v7041_v56 = vpop.eup %7040  ;;  %v3647_v50 = vpack.c.bf16 %v3322_v32, %v3321_v45  ;;  %v3334_v23 = vmul.f32 %v7039_v13, %v8583_v51  ;;  %v3381_v51 = vsub.s32 0, %v8399_v26  ;;  %vm3392_vm12 = vcmp.eq.s32.totalorder %v8416_v6, %v3348_v46 }
 0x45c   : > { %6192 = vmatprep.subr.bf16.mxu0 %v3655_v30  ;;  %v3654_v2 = vpack.c.bf16 %v3336_v27, %v3335_v54  ;;  %v7043_v19 = vpop.eup %7042  ;;  %v3333_v37 = vmul.f32 %v7041_v56, %v8588_v12  ;;  %v9269_v12 = vpack.c.bf16 %v8492_v43, %v8487_v52  ;;  %vm3394_vm15 = vcmp.eq.s32.totalorder %v8416_v6, %v3349_v16 }
 0x45d   : > { %v7045_v44 = vpop.eup %7044  ;;  %v3332_v18 = vmul.f32 %v7043_v19, %v8557_v21  ;;  %v8632_v49 = vrot.slane %v8410_v17, %v3381_v51  ;;  %v9271_v17 = vpack.c.bf16 %v8465_v57, %v8460_v10  ;;  %vm5593_vm3 = vmpackc.low %vm3394_vm15, %vm3392_vm12  ;;  %v3353_v10 = vadd.s32 56, %v8399_v26 }
 0x45e   : > { %v3653_v20 = vpack.c.bf16 %v3334_v23, %v3333_v37  ;;  %v7047_v62 = vpop.eup %7046  ;;  %v3331_v47 = vmul.f32 %v7045_v44, %v8520_v40  ;;  %v3354_v57 = vadd.s32 64, %v8399_v26  ;;  %v3355_v52 = vadd.s32 72, %v8399_v26  ;;  %v3614_v44 = vld [vmem:[#allocation2 + $0x18] sm:$0xff] }
 0x45f   : > { %6193 = vmatpush3.bf16.msra.mxu0 %v3647_v50  ;;  %v7049_v5 = vpop.eup %7048  ;;  %v3330_v33 = vmul.f32 %v7047_v62, %v8576_v7  ;;  %vm3389_vm9 = vcmp.eq.s32.totalorder %v8632_v49, %v8413_v24  ;;  %vm3387_vm7 = vcmp.eq.s32.totalorder %v8632_v49, %v8399_v26  ;;  %vm3391_vm13 = vcmp.eq.s32.totalorder %v8632_v49, %v3348_v46  ;;  %v3613_v50 = vld [vmem:[#allocation2 + $0xd8] sm:$0xff] }
 0x460   : > { %6194 = vmatprep.subr.bf16.mxu0 %v3654_v2  ;;  %v3652_v59 = vpack.c.bf16 %v3332_v18, %v3331_v47  ;;  %v3329_v21 = vmul.f32 %v7049_v5, %v8536_v4  ;;  %vm5591_vm0 = vmpackc.low %vm3389_vm9, %vm3387_vm7  ;;  %vm3393_vm6 = vcmp.eq.s32.totalorder %v8632_v49, %v3349_v16  ;;  %v3352_v24 = vadd.s32 48, %v8399_v26  ;;  %v3617_v16 = vld [vmem:[#allocation2 + $0x30] sm:$0xff] }
 0x461   : > { %vm5595_vm4 = vmpackc.low %vm3393_vm6, %vm3391_vm13  ;;  %vm3395_vm10 = vcmp.eq.s32.totalorder %v8632_v49, %v3350_v60  ;;  %vm3397_vm1 = vcmp.eq.s32.totalorder %v8632_v49, %v3351_v53  ;;  %vm3402_vm2 = vcmp.eq.s32.totalorder %v8416_v6, %v3353_v10  ;;  %vm3401_vm15 = vcmp.eq.s32.totalorder %v8632_v49, %v3353_v10  ;;  %v3618_v53 = vld [vmem:[#allocation2 + $0x48] sm:$0xff] }
 0x462   : > { %v3651_v40 = vpack.c.bf16 %v3330_v33, %v3329_v21  ;;  %vm3400_vm11 = vcmp.eq.s32.totalorder %v8416_v6, %v3352_v24  ;;  %vm5599_vm9 = vmpackc.low %vm3397_vm1, %vm3395_vm10  ;;  %vm3399_vm12 = vcmp.eq.s32.totalorder %v8632_v49, %v3352_v24  ;;  %v3356_v43 = vadd.s32 80, %v8399_v26 }
 0x463   : > { %6195 = vmatpush3.bf16.msra.mxu0 %v9268_v28  ;;  %vm5601_vm7 = vmpackc.low %vm3402_vm2, %vm3400_vm11  ;;  %v3357_v4 = vadd.s32 88, %v8399_v26  ;;  %vm3403_vm14 = vcmp.eq.s32.totalorder %v8632_v49, %v3354_v57  ;;  %vm3405_vm5 = vcmp.eq.s32.totalorder %v8632_v49, %v3355_v52  ;;  %v3358_v7 = vadd.s32 96, %v8399_v26  ;;  %v3615_v28 = vld [vmem:[#allocation2 + $0x50] sm:$0xff] }
 0x464   : > { %6196 = vmatprep.subr.bf16.mxu0 %v3653_v20  ;;  %vm5603_vm13 = vmpackc.low %vm3401_vm15, %vm3399_vm12  ;;  %vm3407_vm11 = vcmp.eq.s32.totalorder %v8632_v49, %v3356_v43  ;;  %v3374_v1 = vadd.s32 224, %v8399_v26  ;;  %v3375_v36 = vadd.s32 232, %v8399_v26  ;;  %v3376_v11 = vadd.s32 240, %v8399_v26 }
 0x465   : > { %vm5607_vm10 = vmpackc.low %vm3405_vm5, %vm3403_vm14  ;;  %vm3409_vm2 = vcmp.eq.s32.totalorder %v8632_v49, %v3357_v4  ;;  %v3377_v29 = vadd.s32 248, %v8399_v26 }
 0x466   : > { %vm5611_vm12 = vmpackc.low %vm3409_vm2, %vm3407_vm11 }
 0x467   : > { %6197 = vmatpush3.bf16.msra.mxu0 %v9269_v12 }
 0x468   : > { %6198 = vmatprep.subr.bf16.mxu0 %v3652_v59  ;;  %v3616_v59 = vld [vmem:[#allocation2 + $0x68] sm:$0xff] }
 0x46b   : > { %6199 = vmatpush3.bf16.msra.mxu0 %v9270_v22 }
 0x46c   : > { %6200 = vmatprep.subr.bf16.mxu0 %v3651_v40 }
 0x46f   : > { %6201 = vmatpush3.bf16.msra.mxu0 %v9271_v17 }
 0x472   : > { %5592 = vmatmul.mubr.msk.bf16.vlgmr.msra.gmra.mxu0 %vm5591_vm0, %v9267_v34  ;;  %vm3404_vm0 = vcmp.eq.s32.totalorder %v8416_v6, %v3354_v57 }
 0x473   : > { %5594 = vmatprep.mubr.msk.bf16.mxu0 %vm5593_vm3, %v9267_v34  ;;  %vm3406_vm3 = vcmp.eq.s32.totalorder %v8416_v6, %v3355_v52 }
 0x474   : > { %vm5605_vm6 = vmpackc.low %vm3406_vm3, %vm3404_vm0  ;;  %vm3411_vm0 = vcmp.eq.s32.totalorder %v8632_v49, %v3358_v7  ;;  %vm3413_vm3 = vcmp.eq.s32.totalorder %v8632_v49, %v3359_v61 }
 0x475   : > { %vm5615_vm14 = vmpackc.low %vm3413_vm3, %vm3411_vm0 }
 0x47a   : > { %5596 = vmatmul.mubr.msk.bf16.gmra.mxu0 %vm5595_vm4, %v9267_v34  ;;  %vm3408_vm4 = vcmp.eq.s32.totalorder %v8416_v6, %v3356_v43  ;;  %v3619_v43 = vld [vmem:[#allocation2 + $0x80] sm:$0xff] }
 0x47b   : > { %5598 = vmatprep.mubr.msk.bf16.mxu0 %vm5597_vm8, %v9267_v34  ;;  %vm3410_vm8 = vcmp.eq.s32.totalorder %v8416_v6, %v3357_v4 }
 0x47c   : > { %vm5609_vm1 = vmpackc.low %vm3410_vm8, %vm3408_vm4  ;;  %vm3415_vm4 = vcmp.eq.s32.totalorder %v8632_v49, %v3360_v48  ;;  %vm3417_vm8 = vcmp.eq.s32.totalorder %v8632_v49, %v3361_v42 }
 0x47d   : > { %vm5619_vm11 = vmpackc.low %vm3417_vm8, %vm3415_vm4 }
 0x482   : > { %5600 = vmatmul.mubr.msk.bf16.gmra.mxu0 %vm5599_vm9, %v9267_v34  ;;  %vm3412_vm9 = vcmp.eq.s32.totalorder %v8416_v6, %v3358_v7 }
 0x483   : > { %5602 = vmatprep.mubr.msk.bf16.mxu0 %vm5601_vm7, %v9267_v34  ;;  %vm3414_vm7 = vcmp.eq.s32.totalorder %v8416_v6, %v3359_v61 }
 0x484   : > { %vm5613_vm15 = vmpackc.low %vm3414_vm7, %vm3412_vm9  ;;  %vm3419_vm9 = vcmp.eq.s32.totalorder %v8632_v49, %v3362_v15  ;;  %vm3421_vm7 = vcmp.eq.s32.totalorder %v8632_v49, %v3363_v9 }
 0x485   : > { %vm5623_vm0 = vmpackc.low %vm3421_vm7, %vm3419_vm9 }
 0x48a   : > { %5604 = vmatmul.mubr.msk.bf16.gmra.mxu0 %vm5603_vm13, %v9267_v34  ;;  %vm3416_vm13 = vcmp.eq.s32.totalorder %v8416_v6, %v3360_v48 }
 0x48b   : > { %5606 = vmatprep.mubr.msk.bf16.mxu0 %vm5605_vm6, %v9267_v34  ;;  %vm3418_vm6 = vcmp.eq.s32.totalorder %v8416_v6, %v3361_v42  ;;  %v3620_v42 = vld [vmem:[#allocation2 + $0x88] sm:$0xff] }
 0x48c   : > { %vm5617_vm5 = vmpackc.low %vm3418_vm6, %vm3416_vm13  ;;  %vm3423_vm13 = vcmp.eq.s32.totalorder %v8632_v49, %v3364_v35  ;;  %vm3425_vm6 = vcmp.eq.s32.totalorder %v8632_v49, %v3365_v0 }
 0x48d   : > { %vm5627_vm4 = vmpackc.low %vm3425_vm6, %vm3423_vm13 }
 0x492   : > { %5608 = vmatmul.mubr.msk.bf16.gmra.mxu0 %vm5607_vm10, %v9267_v34  ;;  %vm3420_vm10 = vcmp.eq.s32.totalorder %v8416_v6, %v3362_v15 }
 0x493   : > { %5610 = vmatprep.mubr.msk.bf16.mxu0 %vm5609_vm1, %v9267_v34  ;;  %vm3422_vm1 = vcmp.eq.s32.totalorder %v8416_v6, %v3363_v9 }
 0x494   : > { %vm5621_vm2 = vmpackc.low %vm3422_vm1, %vm3420_vm10  ;;  %vm3427_vm10 = vcmp.eq.s32.totalorder %v8632_v49, %v3366_v55  ;;  %vm3429_vm1 = vcmp.eq.s32.totalorder %v8632_v49, %v3367_v39 }
 0x495   : > { %vm5631_vm9 = vmpackc.low %vm3429_vm1, %vm3427_vm10 }
 0x49a   : > { %5612 = vmatmul.mubr.msk.bf16.gmra.mxu0 %vm5611_vm12, %v9267_v34  ;;  %vm3424_vm12 = vcmp.eq.s32.totalorder %v8416_v6, %v3364_v35 }
 0x49b   : > { %5614 = vmatprep.mubr.msk.bf16.mxu0 %vm5613_vm15, %v9267_v34  ;;  %vm3426_vm15 = vcmp.eq.s32.totalorder %v8416_v6, %v3365_v0 }
 0x49c   : > { %vm5625_vm3 = vmpackc.low %vm3426_vm15, %vm3424_vm12  ;;  %vm3431_vm12 = vcmp.eq.s32.totalorder %v8632_v49, %v3368_v25  ;;  %vm3433_vm15 = vcmp.eq.s32.totalorder %v8632_v49, %v3369_v8 }
 0x49d   : > { %vm5635_vm13 = vmpackc.low %vm3433_vm15, %vm3431_vm12 }
 0x4a2   : > { %5616 = vmatmul.mubr.msk.bf16.gmra.mxu0 %vm5615_vm14, %v9267_v34  ;;  %vm3428_vm14 = vcmp.eq.s32.totalorder %v8416_v6, %v3366_v55  ;;  %v3621_v55 = vld [vmem:[#allocation2 + $0xe8] sm:$0xff] }
 0x4a3   : > { %5618 = vmatprep.mubr.msk.bf16.mxu0 %vm5617_vm5, %v9267_v34  ;;  %vm3430_vm5 = vcmp.eq.s32.totalorder %v8416_v6, %v3367_v39 }
 0x4a4   : > { %vm5629_vm8 = vmpackc.low %vm3430_vm5, %vm3428_vm14  ;;  %vm3435_vm14 = vcmp.eq.s32.totalorder %v8632_v49, %v3370_v3  ;;  %vm3437_vm5 = vcmp.eq.s32.totalorder %v8632_v49, %v3371_v31 }
 0x4a5   : > { %vm5639_vm10 = vmpackc.low %vm3437_vm5, %vm3435_vm14 }
 0x4aa   : > { %5620 = vmatmul.mubr.msk.bf16.gmra.mxu0 %vm5619_vm11, %v9267_v34  ;;  %vm3432_vm11 = vcmp.eq.s32.totalorder %v8416_v6, %v3368_v25 }
 0x4ab   : > { %5622 = vmatprep.mubr.msk.bf16.mxu0 %vm5621_vm2, %v9267_v34  ;;  %vm3434_vm2 = vcmp.eq.s32.totalorder %v8416_v6, %v3369_v8 }
 0x4ac   : > { %vm5633_vm7 = vmpackc.low %vm3434_vm2, %vm3432_vm11  ;;  %vm3439_vm11 = vcmp.eq.s32.totalorder %v8632_v49, %v3372_v38  ;;  %vm3441_vm2 = vcmp.eq.s32.totalorder %v8632_v49, %v3373_v58 }
 0x4ad   : > { %vm5643_vm12 = vmpackc.low %vm3441_vm2, %vm3439_vm11 }
 0x4b2   : > { %5624 = vmatmul.mubr.msk.bf16.gmra.mxu0 %vm5623_vm0, %v9267_v34  ;;  %vm3436_vm0 = vcmp.eq.s32.totalorder %v8416_v6, %v3370_v3 }
 0x4b3   : > { %5626 = vmatprep.mubr.msk.bf16.mxu0 %vm5625_vm3, %v9267_v34  ;;  %vm3438_vm3 = vcmp.eq.s32.totalorder %v8416_v6, %v3371_v31  ;;  %v3622_v31 = vld [vmem:[#allocation2 + $0xb8] sm:$0xff] }
 0x4b4   : > { %vm5637_vm6 = vmpackc.low %vm3438_vm3, %vm3436_vm0  ;;  %vm3443_vm0 = vcmp.eq.s32.totalorder %v8632_v49, %v3374_v1  ;;  %vm3445_vm3 = vcmp.eq.s32.totalorder %v8632_v49, %v3375_v36 }
 0x4b5   : > { %vm5647_vm14 = vmpackc.low %vm3445_vm3, %vm3443_vm0 }
 0x4ba   : > { %5628 = vmatmul.mubr.msk.bf16.gmra.mxu0 %vm5627_vm4, %v9267_v34  ;;  %vm3440_vm4 = vcmp.eq.s32.totalorder %v8416_v6, %v3372_v38 }
 0x4bb   : > { %5630 = vmatprep.mubr.msk.bf16.mxu0 %vm5629_vm8, %v9267_v34  ;;  %vm3442_vm8 = vcmp.eq.s32.totalorder %v8416_v6, %v3373_v58 }
 0x4bc   : > { %vm5641_vm1 = vmpackc.low %vm3442_vm8, %vm3440_vm4  ;;  %vm3447_vm4 = vcmp.eq.s32.totalorder %v8632_v49, %v3376_v11  ;;  %vm3449_vm8 = vcmp.eq.s32.totalorder %v8632_v49, %v3377_v29 }
 0x4c2   : > { %5632 = vmatmul.mubr.msk.bf16.gmra.mxu0 %vm5631_vm9, %v9267_v34  ;;  %vm3444_vm9 = vcmp.eq.s32.totalorder %v8416_v6, %v3374_v1 }
 0x4c3   : > { %5634 = vmatprep.mubr.msk.bf16.mxu0 %vm5633_vm7, %v9267_v34  ;;  %vm3446_vm7 = vcmp.eq.s32.totalorder %v8416_v6, %v3375_v36 }
 0x4c4   : > { %vm5645_vm15 = vmpackc.low %vm3446_vm7, %vm3444_vm9 }
 0x4ca   : > { %5636 = vmatmul.mubr.msk.bf16.gmra.mxu0 %vm5635_vm13, %v9267_v34  ;;  %vm3448_vm13 = vcmp.eq.s32.totalorder %v8416_v6, %v3376_v11  ;;  %v3623_v11 = vld [vmem:[#allocation2 + $0x60] sm:$0xff] }
 0x4cb   : > { %5638 = vmatprep.mubr.msk.bf16.mxu0 %vm5637_vm6, %v9267_v34  ;;  %vm3450_vm6 = vcmp.eq.s32.totalorder %v8416_v6, %v3377_v29  ;;  %v3612_v6 = vld [vmem:[#allocation2] sm:$0xff] }
 0x4cc   : > { %vm5649_vm5 = vmpackc.low %vm3450_vm6, %vm3448_vm13 }
 0x4d2   : > { %5640 = vmatmul.mubr.msk.bf16.gmra.mxu0 %vm5639_vm10, %v9267_v34  ;;  %vm5651_vm10 = vmpackc.low %vm3449_vm8, %vm3447_vm4 }
 0x4d3   : > { %5642 = vmatprep.mubr.msk.bf16.mxu0 %vm5641_vm1, %v9267_v34 }
 0x4da   : > { %5644 = vmatmul.mubr.msk.bf16.gmra.mxu0 %vm5643_vm12, %v9267_v34 }
 0x4db   : > { %5646 = vmatprep.mubr.msk.bf16.mxu0 %vm5645_vm15, %v9267_v34 }
 0x4e2   : > { %5648 = vmatmul.mubr.msk.bf16.gmra.mxu0 %vm5647_vm14, %v9267_v34 }
 0x4e3   : > { %5650 = vmatprep.mubr.msk.bf16.mxu0 %vm5649_vm5, %v9267_v34 }
 0x4ea   : > { %5652 = vmatmul.mubr.msk.bf16.gmra.mxu0 %vm5651_vm10, %v9267_v34 }
 0x532   : > { %v6202_v26 = vpop.f32.mrf.mxu0 }
 0x534   : > { %v6203_v63 = vpop.f32.mrf.mxu0 }
 0x535   : > { %v6204_v32 = vadd.f32 %v6203_v63, %v6202_v26 }
 0x536   : > { %v6205_v27 = vpop.f32.mrf.mxu0 }
 0x537   : > { %v3820_v30 = vadd.f32 %v6204_v32, %v3611_v14  ;;  %v3624_v32 = vld [vmem:[#allocation2 + $0xf0] sm:$0xff] }
 0x538   : > { %v6206_v13 = vpop.f32.mrf.mxu0 }
 0x539   : > { %3852 = vst [vmem:[#allocation2 + $0xb0] sm:$0xff] %v3820_v30  ;;  %v6207_v45 = vadd.f32 %v6206_v13, %v6205_v27 }
 0x53a   : > { %v6208_v54 = vpop.f32.mrf.mxu0 }
 0x53b   : > { %v3821_v56 = vadd.f32 %v6207_v45, %v3612_v6  ;;  %v3625_v45 = vld [vmem:[#allocation2 + $0x8] sm:$0xff] }
 0x53c   : > { %v6209_v23 = vpop.f32.mrf.mxu0 }
 0x53d   : > { %3853 = vst [vmem:[#allocation2] sm:$0xff] %v3821_v56  ;;  %v6210_v2 = vadd.f32 %v6209_v23, %v6208_v54 }
 0x53e   : > { %v6211_v19 = vpop.f32.mrf.mxu0 }
 0x53f   : > { %v3822_v37 = vadd.f32 %v6210_v2, %v3613_v50  ;;  %v3626_v2 = vld [vmem:[#allocation2 + $0x78] sm:$0xff] }
 0x540   : > { %v6212_v34 = vpop.f32.mrf.mxu0 }
 0x541   : > { %3854 = vst [vmem:[#allocation2 + $0xd8] sm:$0xff] %v3822_v37  ;;  %v6213_v18 = vadd.f32 %v6212_v34, %v6211_v19 }
 0x542   : > { %v6214_v20 = vpop.f32.mrf.mxu0 }
 0x543   : > { %v3823_v62 = vadd.f32 %v6213_v18, %v3614_v44  ;;  %v3627_v18 = vld [vmem:[#allocation2 + $0x38] sm:$0xff] }
 0x544   : > { %v6215_v47 = vpop.f32.mrf.mxu0 }
 0x545   : > { %3855 = vst [vmem:[#allocation2 + $0x18] sm:$0xff] %v3823_v62  ;;  %v6216_v51 = vadd.f32 %v6215_v47, %v6214_v20 }
 0x546   : > { %v6217_v5 = vpop.f32.mrf.mxu0 }
 0x547   : > { %v3824_v33 = vadd.f32 %v6216_v51, %v3615_v28  ;;  %v3628_v51 = vld [vmem:[#allocation2 + $0x58] sm:$0xff] }
 0x548   : > { %v6218_v12 = vpop.f32.mrf.mxu0 }
 0x549   : > { %3856 = vst [vmem:[#allocation2 + $0x50] sm:$0xff] %v3824_v33  ;;  %v6219_v21 = vadd.f32 %v6218_v12, %v6217_v5 }
 0x54a   : > { %v6220_v49 = vpop.f32.mrf.mxu0 }
 0x54b   : > { %v3825_v46 = vadd.f32 %v6219_v21, %v3616_v59  ;;  %v3629_v21 = vld [vmem:[#allocation2 + $0x40] sm:$0xff] }
 0x54c   : > { %v6221_v40 = vpop.f32.mrf.mxu0 }
 0x54d   : > { %3857 = vst [vmem:[#allocation2 + $0x68] sm:$0xff] %v3825_v46  ;;  %v6222_v22 = vadd.f32 %v6221_v40, %v6220_v49 }
 0x54e   : > { %v6223_v17 = vpop.f32.mrf.mxu0 }
 0x54f   : > { %v3826_v60 = vadd.f32 %v6222_v22, %v3617_v16  ;;  %v3630_v22 = vld [vmem:[#allocation2 + $0xc8] sm:$0xff] }
 0x550   : > { %v6224_v24 = vpop.f32.mrf.mxu0 }
 0x551   : > { %3858 = vst [vmem:[#allocation2 + $0x30] sm:$0xff] %v3826_v60  ;;  %v6225_v10 = vadd.f32 %v6224_v24, %v6223_v17 }
 0x552   : > { %v6226_v57 = vpop.f32.mrf.mxu0 }
 0x553   : > { %v3827_v52 = vadd.f32 %v6225_v10, %v3618_v53  ;;  %v3631_v10 = vld [vmem:[#allocation2 + $0xe0] sm:$0xff] }
 0x554   : > { %v6227_v4 = vpop.f32.mrf.mxu0 }
 0x555   : > { %3859 = vst [vmem:[#allocation2 + $0x48] sm:$0xff] %v3827_v52  ;;  %v6228_v7 = vadd.f32 %v6227_v4, %v6226_v57 }
 0x556   : > { %v6229_v61 = vpop.f32.mrf.mxu0 }
 0x557   : > { %v3828_v48 = vadd.f32 %v6228_v7, %v3619_v43  ;;  %v3632_v7 = vld [vmem:[#allocation2 + $0x90] sm:$0xff] }
 0x558   : > { %v6230_v15 = vpop.f32.mrf.mxu0 }
 0x559   : > { %3860 = vst [vmem:[#allocation2 + $0x80] sm:$0xff] %v3828_v48  ;;  %v6231_v9 = vadd.f32 %v6230_v15, %v6229_v61 }
 0x55a   : > { %v6232_v35 = vpop.f32.mrf.mxu0 }
 0x55b   : > { %v3829_v0 = vadd.f32 %v6231_v9, %v3620_v42  ;;  %v3633_v9 = vld [vmem:[#allocation2 + $0x70] sm:$0xff] }
 0x55c   : > { %v6233_v39 = vpop.f32.mrf.mxu0 }
 0x55d   : > { %3861 = vst [vmem:[#allocation2 + $0x88] sm:$0xff] %v3829_v0  ;;  %v6234_v25 = vadd.f32 %v6233_v39, %v6232_v35 }
 0x55e   : > { %v6235_v8 = vpop.f32.mrf.mxu0 }
 0x55f   : > { %v3830_v3 = vadd.f32 %v6234_v25, %v3621_v55  ;;  %v3634_v25 = vld [vmem:[#allocation2 + $0xc0] sm:$0xff] }
 0x560   : > { %v6236_v38 = vpop.f32.mrf.mxu0 }
 0x561   : > { %3862 = vst [vmem:[#allocation2 + $0xe8] sm:$0xff] %v3830_v3  ;;  %v6237_v58 = vadd.f32 %v6236_v38, %v6235_v8 }
 0x562   : > { %v6238_v1 = vpop.f32.mrf.mxu0 }
 0x563   : > { %v3831_v36 = vadd.f32 %v6237_v58, %v3622_v31  ;;  %v3635_v58 = vld [vmem:[#allocation2 + $0xa8] sm:$0xff] }
 0x564   : > { %v6239_v29 = vpop.f32.mrf.mxu0 }
 0x565   : > { %3863 = vst [vmem:[#allocation2 + $0xb8] sm:$0xff] %v3831_v36  ;;  %v6240_v26 = vadd.f32 %v6239_v29, %v6238_v1 }
 0x566   : > { %v6241_v14 = vpop.f32.mrf.mxu0 }
 0x567   : > { %v3832_v63 = vadd.f32 %v6240_v26, %v3623_v11  ;;  %v3636_v26 = vld [vmem:[#allocation2 + $0xd0] sm:$0xff] }
 0x568   : > { %v6242_v27 = vpop.f32.mrf.mxu0 }
 0x569   : > { %3864 = vst [vmem:[#allocation2 + $0x60] sm:$0xff] %v3832_v63  ;;  %v6243_v30 = vadd.f32 %v6242_v27, %v6241_v14 }
 0x56a   : > { %v6244_v6 = vpop.f32.mrf.mxu0 }
 0x56b   : > { %v3833_v13 = vadd.f32 %v6243_v30, %v3624_v32  ;;  %v3637_v30 = vld [vmem:[#allocation2 + $0x10] sm:$0xff] }
 0x56c   : > { %v6245_v54 = vpop.f32.mrf.mxu0 }
 0x56d   : > { %3865 = vst [vmem:[#allocation2 + $0xf0] sm:$0xff] %v3833_v13  ;;  %v6246_v56 = vadd.f32 %v6245_v54, %v6244_v6 }
 0x56e   : > { %v6247_v50 = vpop.f32.mrf.mxu0 }
 0x56f   : > { %v3834_v23 = vadd.f32 %v6246_v56, %v3625_v45  ;;  %v3638_v56 = vld [vmem:[#allocation2 + $0x28] sm:$0xff] }
 0x570   : > { %v6248_v19 = vpop.f32.mrf.mxu0 }
 0x571   : > { %3866 = vst [vmem:[#allocation2 + $0x8] sm:$0xff] %v3834_v23  ;;  %v6249_v37 = vadd.f32 %v6248_v19, %v6247_v50 }
 0x572   : > { %v6250_v44 = vpop.f32.mrf.mxu0 }
 0x573   : > { %v3835_v34 = vadd.f32 %v6249_v37, %v3626_v2  ;;  %v3639_v37 = vld [vmem:[#allocation2 + $0xa0] sm:$0xff] }
 0x574   : > { %v6251_v20 = vpop.f32.mrf.mxu0 }
 0x575   : > { %3867 = vst [vmem:[#allocation2 + $0x78] sm:$0xff] %v3835_v34  ;;  %v6252_v62 = vadd.f32 %v6251_v20, %v6250_v44 }
 0x576   : > { %v6253_v28 = vpop.f32.mrf.mxu0 }
 0x577   : > { %v3836_v47 = vadd.f32 %v6252_v62, %v3627_v18  ;;  %v3640_v62 = vld [vmem:[#allocation2 + $0xf8] sm:$0xff] }
 0x578   : > { %v6254_v5 = vpop.f32.mrf.mxu0 }
 0x579   : > { %3868 = vst [vmem:[#allocation2 + $0x38] sm:$0xff] %v3836_v47  ;;  %v6255_v33 = vadd.f32 %v6254_v5, %v6253_v28 }
 0x57a   : > { %v6256_v59 = vpop.f32.mrf.mxu0 }
 0x57b   : > { %v3837_v12 = vadd.f32 %v6255_v33, %v3628_v51  ;;  %v3641_v33 = vld [vmem:[#allocation2 + $0x20] sm:$0xff] }
 0x57c   : > { %v6257_v49 = vpop.f32.mrf.mxu0 }
 0x57d   : > { %3869 = vst [vmem:[#allocation2 + $0x58] sm:$0xff] %v3837_v12  ;;  %v6258_v46 = vadd.f32 %v6257_v49, %v6256_v59 }
 0x57e   : > { %v6259_v16 = vpop.f32.mrf.mxu0 }
 0x57f   : > { %v3838_v40 = vadd.f32 %v6258_v46, %v3629_v21  ;;  %v3642_v46 = vld [vmem:[#allocation2 + $0x98] sm:$0xff] }
 0x580   : > { %v6260_v17 = vpop.f32.mrf.mxu0 }
 0x581   : > { %3870 = vst [vmem:[#allocation2 + $0x40] sm:$0xff] %v3838_v40  ;;  %v6261_v60 = vadd.f32 %v6260_v17, %v6259_v16 }
 0x582   : > { %v6262_v53 = vpop.f32.mrf.mxu0 }
 0x583   : > { %v3839_v24 = vadd.f32 %v6261_v60, %v3630_v22 }
 0x584   : > { %v6263_v57 = vpop.f32.mrf.mxu0 }
 0x585   : > { %3871 = vst [vmem:[#allocation2 + $0xc8] sm:$0xff] %v3839_v24  ;;  %v6264_v52 = vadd.f32 %v6263_v57, %v6262_v53 }
 0x586   : > { %v6265_v43 = vpop.f32.mrf.mxu0 }
 0x587   : > { %v3840_v4 = vadd.f32 %v6264_v52, %v3631_v10 }
 0x588   : > { %v6266_v61 = vpop.f32.mrf.mxu0 }
 0x589   : > { %3872 = vst [vmem:[#allocation2 + $0xe0] sm:$0xff] %v3840_v4  ;;  %v6267_v48 = vadd.f32 %v6266_v61, %v6265_v43 }
 0x58a   : > { %v6268_v42 = vpop.f32.mrf.mxu0 }
 0x58b   : > { %v3841_v15 = vadd.f32 %v6267_v48, %v3632_v7 }
 0x58c   : > { %v6269_v35 = vpop.f32.mrf.mxu0 }
 0x58d   : > { %3873 = vst [vmem:[#allocation2 + $0x90] sm:$0xff] %v3841_v15  ;;  %v6270_v0 = vadd.f32 %v6269_v35, %v6268_v42 }
 0x58e   : > { %v6271_v55 = vpop.f32.mrf.mxu0 }
 0x58f   : > { %v3842_v39 = vadd.f32 %v6270_v0, %v3633_v9 }
 0x590   : > { %v6272_v8 = vpop.f32.mrf.mxu0 }
 0x591   : > { %3874 = vst [vmem:[#allocation2 + $0x70] sm:$0xff] %v3842_v39  ;;  %v6273_v3 = vadd.f32 %v6272_v8, %v6271_v55 }
 0x592   : > { %v6274_v31 = vpop.f32.mrf.mxu0 }
 0x593   : > { %v3843_v38 = vadd.f32 %v6273_v3, %v3634_v25 }
 0x594   : > { %v6275_v1 = vpop.f32.mrf.mxu0 }
 0x595   : > { %3875 = vst [vmem:[#allocation2 + $0xc0] sm:$0xff] %v3843_v38  ;;  %v6276_v36 = vadd.f32 %v6275_v1, %v6274_v31 }
 0x596   : > { %v6277_v11 = vpop.f32.mrf.mxu0 }
 0x597   : > { %v3844_v29 = vadd.f32 %v6276_v36, %v3635_v58 }
 0x598   : > { %v6278_v14 = vpop.f32.mrf.mxu0 }
 0x599   : > { %3876 = vst [vmem:[#allocation2 + $0xa8] sm:$0xff] %v3844_v29  ;;  %v6279_v63 = vadd.f32 %v6278_v14, %v6277_v11 }
 0x59a   : > { %v6280_v32 = vpop.f32.mrf.mxu0 }
 0x59b   : > { %v3845_v27 = vadd.f32 %v6279_v63, %v3636_v26 }
 0x59c   : > { %v6281_v6 = vpop.f32.mrf.mxu0 }
 0x59d   : > { %3877 = vst [vmem:[#allocation2 + $0xd0] sm:$0xff] %v3845_v27  ;;  %v6282_v13 = vadd.f32 %v6281_v6, %v6280_v32 }
 0x59e   : > { %v6283_v45 = vpop.f32.mrf.mxu0 }
 0x59f   : > { %v3846_v54 = vadd.f32 %v6282_v13, %v3637_v30 }
 0x5a0   : > { %v6284_v50 = vpop.f32.mrf.mxu0 }
 0x5a1   : > { %3878 = vst [vmem:[#allocation2 + $0x10] sm:$0xff] %v3846_v54  ;;  %v6285_v23 = vadd.f32 %v6284_v50, %v6283_v45 }
 0x5a2   : > { %v6286_v2 = vpop.f32.mrf.mxu0 }
 0x5a3   : > { %v3847_v19 = vadd.f32 %v6285_v23, %v3638_v56 }
 0x5a4   : > { %v6287_v44 = vpop.f32.mrf.mxu0 }
 0x5a5   : > { %3879 = vst [vmem:[#allocation2 + $0x28] sm:$0xff] %v3847_v19  ;;  %v6288_v34 = vadd.f32 %v6287_v44, %v6286_v2 }
 0x5a6   : > { %v6289_v18 = vpop.f32.mrf.mxu0 }
 0x5a7   : > { %v3848_v20 = vadd.f32 %v6288_v34, %v3639_v37 }
 0x5a8   : > { %v6290_v28 = vpop.f32.mrf.mxu0 }
 0x5a9   : > { %3880 = vst [vmem:[#allocation2 + $0xa0] sm:$0xff] %v3848_v20  ;;  %v6291_v47 = vadd.f32 %v6290_v28, %v6289_v18 }
 0x5aa   : > { %v6292_v51 = vpop.f32.mrf.mxu0 }
 0x5ab   : > { %v3849_v5 = vadd.f32 %v6291_v47, %v3640_v62 }
 0x5ac   : > { %v6293_v59 = vpop.f32.mrf.mxu0 }
 0x5ad   : > { %3881 = vst [vmem:[#allocation2 + $0xf8] sm:$0xff] %v3849_v5  ;;  %v6294_v12 = vadd.f32 %v6293_v59, %v6292_v51 }
 0x5ae   : > { %v6295_v21 = vpop.f32.mrf.mxu0 }
 0x5af   : > { %v3850_v49 = vadd.f32 %v6294_v12, %v3641_v33 }
 0x5b0   : > { %v6296_v16 = vpop.f32.mrf.mxu0 }
 0x5b1   : > { %3882 = vst [vmem:[#allocation2 + $0x20] sm:$0xff] %v3850_v49  ;;  %v6297_v40 = vadd.f32 %v6296_v16, %v6295_v21  ;;  %3887 = sbr.rel (%p5653_p6) target bundleno = 2029 (0x7ed), region = 92 }
 0x5b3   : > { %v3851_v22 = vadd.f32 %v6297_v40, %v3642_v46 }
 0x5b5   : > { %3883 = vst [vmem:[#allocation2 + $0x98] sm:$0xff] %v3851_v22 }
 0x5b6   : > { %v7050_v17 = vld [vmem:[%s9167_s12 + $0x38] sm:$0xff]   ;;  %v7051_v60 = vld [vmem:[%s9167_s12 + $0x30] sm:$0xff]   ;;  %v7052_v53 = vld [vmem:[%s9167_s12 + $0x28] sm:$0xff]  }
 0x5b7   : > { %6708 = vmatprep.subr.bf16.mxu1 %v7050_v17  ;;  %6548 = vmatprep.subr.bf16.mxu0 %v7050_v17  ;;  %v7053_v24 = vld [vmem:[%s9167_s12 + $0x20] sm:$0xff]   ;;  %v3920_v10 = vld [vmem:[#allocation2 + $0x38] sm:$0xff]  ;;  %v7055_v4 = vld [vmem:[%s9167_s12 + $0x10] sm:$0xff]  }
 0x5b8   : > { %6716 = vmatpush3.bf16.msra.mxu1 %v7050_v17  ;;  %6549 = vmatpush3.bf16.msra.mxu0 %v7050_v17  ;;  %v3921_v57 = vld [vmem:[#allocation2 + $0x58] sm:$0xff]  ;;  %v7056_v7 = vld [vmem:[%s9167_s12 + $0x8] sm:$0xff]   ;;  %v3904_v61 = vld [vmem:[#allocation2 + $0xb0] sm:$0xff] }
 0x5b9   : > { %6709 = vmatprep.subr.bf16.mxu1 %v7051_v60  ;;  %6550 = vmatprep.subr.bf16.mxu0 %v7051_v60  ;;  %v3944_v52 = vpack.c.bf16 %v3921_v57, %v3920_v10  ;;  %v7054_v43 = vld [vmem:[%s9167_s12 + $0x18] sm:$0xff]   ;;  %v3905_v48 = vld [vmem:[#allocation2] sm:$0xff]  ;;  %v3923_v35 = vld [vmem:[#allocation2 + $0xc8] sm:$0xff] }
 0x5ba   : > { %v3936_v42 = vpack.c.bf16 %v3905_v48, %v3904_v61  ;;  %v7057_v15 = vld [vmem:[%s9167_s12] sm:$0xff]   ;;  %v7058_v0 = vld [vmem:[%s9166_s11 + $0x38] sm:$0xff]   ;;  %v3925_v39 = vld [vmem:[#allocation2 + $0x90] sm:$0xff] }
 0x5bb   : > { %6580 = vmatprep.mubr.bf16.mxu1 %v3944_v52  ;;  %v3922_v9 = vld [vmem:[#allocation2 + $0x40] sm:$0xff]  ;;  %v3906_v25 = vld [vmem:[#allocation2 + $0xd8] sm:$0xff]  ;;  %v3908_v3 = vld [vmem:[#allocation2 + $0x50] sm:$0xff] }
 0x5bc   : > { %6717 = vmatpush3.bf16.msra.mxu1 %v7051_v60  ;;  %6551 = vmatpush3.bf16.msra.mxu0 %v7051_v60  ;;  %v3924_v55 = vld [vmem:[#allocation2 + $0xe0] sm:$0xff]  ;;  %v3907_v8 = vld [vmem:[#allocation2 + $0x18] sm:$0xff]  ;;  %v3909_v31 = vld [vmem:[#allocation2 + $0x68] sm:$0xff]  ;;  %v3945_v38 = vpack.c.bf16 %v3923_v35, %v3922_v9 }
 0x5bd   : > { %6710 = vmatprep.subr.bf16.mxu1 %v7052_v53  ;;  %6552 = vmatprep.subr.bf16.mxu0 %v7052_v53  ;;  %v3946_v58 = vpack.c.bf16 %v3925_v39, %v3924_v55  ;;  %v7059_v1 = vld [vmem:[%s9166_s11 + $0x30] sm:$0xff]   ;;  %v3937_v36 = vpack.c.bf16 %v3907_v8, %v3906_v25  ;;  %v3938_v11 = vpack.c.bf16 %v3909_v31, %v3908_v3  ;;  %v3927_v26 = vld [vmem:[#allocation2 + $0xc0] sm:$0xff]  ;;  %v7060_v14 = vld [vmem:[%s9166_s11 + $0x28] sm:$0xff]  }
 0x5be   : > { %6564 = vmatprep.mubr.bf16.mxu0 %v3936_v42  ;;  %v3926_v29 = vld [vmem:[#allocation2 + $0x70] sm:$0xff]  ;;  %v3928_v63 = vld [vmem:[#allocation2 + $0xa8] sm:$0xff]  ;;  %v3912_v13 = vld [vmem:[#allocation2 + $0x80] sm:$0xff] }
 0x5bf   : > { %v3929_v32 = vld [vmem:[#allocation2 + $0xd0] sm:$0xff]  ;;  %v3911_v30 = vld [vmem:[#allocation2 + $0x48] sm:$0xff]  ;;  %v3947_v6 = vpack.c.bf16 %v3927_v26, %v3926_v29  ;;  %v7061_v56 = vld [vmem:[%s9166_s11 + $0x20] sm:$0xff]  }
 0x5c0   : > { %6718 = vmatpush3.bf16.msra.mxu1 %v7052_v53  ;;  %6553 = vmatpush3.bf16.msra.mxu0 %v7052_v53  ;;  %v3910_v27 = vld [vmem:[#allocation2 + $0x30] sm:$0xff]  ;;  %v3913_v45 = vld [vmem:[#allocation2 + $0x88] sm:$0xff]  ;;  %v3948_v54 = vpack.c.bf16 %v3929_v32, %v3928_v63  ;;  %v7062_v37 = vld [vmem:[%s9166_s11 + $0x18] sm:$0xff]  }
 0x5c1   : > { %6711 = vmatprep.subr.bf16.mxu1 %v7053_v24  ;;  %6554 = vmatprep.subr.bf16.mxu0 %v7053_v24  ;;  %v3939_v50 = vpack.c.bf16 %v3911_v30, %v3910_v27  ;;  %v3940_v23 = vpack.c.bf16 %v3913_v45, %v3912_v13  ;;  %v3930_v2 = vld [vmem:[#allocation2 + $0x10] sm:$0xff]  ;;  %v3931_v19 = vld [vmem:[#allocation2 + $0x28] sm:$0xff]  ;;  %v3932_v44 = vld [vmem:[#allocation2 + $0xa0] sm:$0xff] }
 0x5c2   : > { %v3933_v34 = vld [vmem:[#allocation2 + $0xf8] sm:$0xff]  ;;  %v3914_v18 = vld [vmem:[#allocation2 + $0xe8] sm:$0xff]  ;;  %v3949_v62 = vpack.c.bf16 %v3931_v19, %v3930_v2  ;;  %v3916_v28 = vld [vmem:[#allocation2 + $0x60] sm:$0xff] }
 0x5c3   : > { %v3915_v20 = vld [vmem:[#allocation2 + $0xb8] sm:$0xff]  ;;  %v3917_v47 = vld [vmem:[#allocation2 + $0xf0] sm:$0xff]  ;;  %v3950_v51 = vpack.c.bf16 %v3933_v34, %v3932_v44  ;;  %v3934_v12 = vld [vmem:[#allocation2 + $0x20] sm:$0xff] }
 0x5c4   : > { %6719 = vmatpush3.bf16.msra.mxu1 %v7053_v24  ;;  %6555 = vmatpush3.bf16.msra.mxu0 %v7053_v24  ;;  %v7063_v5 = vld [vmem:[%s9166_s11 + $0x10] sm:$0xff]   ;;  %v3941_v33 = vpack.c.bf16 %v3915_v20, %v3914_v18  ;;  %v3942_v59 = vpack.c.bf16 %v3917_v47, %v3916_v28  ;;  %v3935_v21 = vld [vmem:[#allocation2 + $0x98] sm:$0xff]  ;;  %v7064_v49 = vld [vmem:[%s9166_s11 + $0x8] sm:$0xff]  }
 0x5c5   : > { %6712 = vmatprep.subr.bf16.mxu1 %v7054_v43  ;;  %6556 = vmatprep.subr.bf16.mxu0 %v7054_v43  ;;  %v3918_v46 = vld [vmem:[#allocation2 + $0x8] sm:$0xff]  ;;  %v3919_v16 = vld [vmem:[#allocation2 + $0x78] sm:$0xff]  ;;  %v3951_v40 = vpack.c.bf16 %v3935_v21, %v3934_v12  ;;  %v7065_v22 = vld [vmem:[%s9166_s11] sm:$0xff]  }
 0x5c6   : > { %v3943_v17 = vpack.c.bf16 %v3919_v16, %v3918_v46  ;;  %v9272_v60 = vld [vmem:[#allocation17_spill] sm:$0xff]  ;;  %v9273_v53 = vld [vmem:[#allocation15_spill] sm:$0xff]  ;;  %v9282_v61 = vld [vmem:[#allocation12_spill] sm:$0xff] }
 0x5c7   : > { %v9274_v24 = vld [vmem:[#allocation13_spill] sm:$0xff]  ;;  %v9275_v10 = vld [vmem:[#allocation11_spill] sm:$0xff]  ;;  %v9283_v48 = vld [vmem:[#allocation10_spill] sm:$0xff] }
 0x5c8   : > { %6720 = vmatpush3.bf16.msra.mxu1 %v7054_v43  ;;  %6557 = vmatpush3.bf16.msra.mxu0 %v7054_v43  ;;  %v9276_v57 = vld [vmem:[#allocation9_spill] sm:$0xff]  ;;  %v9277_v52 = vld [vmem:[#allocation7_spill] sm:$0xff]  ;;  %v9284_v42 = vld [vmem:[#allocation8_spill] sm:$0xff] }
 0x5c9   : > { %6713 = vmatprep.subr.bf16.mxu1 %v7055_v4  ;;  %6558 = vmatprep.subr.bf16.mxu0 %v7055_v4  ;;  %v9278_v43 = vld [vmem:[#allocation5_spill] sm:$0xff]  ;;  %v9286_v9 = vld [vmem:[#allocation4_spill] sm:$0xff]  ;;  %v7066_v35 = vld [vmem:[%s9169_s14 + $0x38] sm:$0xff]  }
 0x5ca   : > { %v7068_v55 = vld [vmem:[%s9169_s14 + $0x28] sm:$0xff]   ;;  %v7069_v39 = vld [vmem:[%s9169_s14 + $0x20] sm:$0xff]   ;;  %v7070_v25 = vld [vmem:[%s9169_s14 + $0x18] sm:$0xff]  }
 0x5cb   : > { %v7071_v8 = vld [vmem:[%s9169_s14 + $0x10] sm:$0xff]   ;;  %v7072_v3 = vld [vmem:[%s9169_s14 + $0x8] sm:$0xff]   ;;  %v7073_v31 = vld [vmem:[%s9169_s14] sm:$0xff]  }
 0x5cc   : > { %6721 = vmatpush3.bf16.msra.mxu1 %v7055_v4  ;;  %6559 = vmatpush3.bf16.msra.mxu0 %v7055_v4  ;;  %v9279_v4 = vld [vmem:[#allocation18_spill] sm:$0xff]  ;;  %v8889_v20 = vld [vmem:[%s9287_s25] ss:$0 sm:$0xff] }
 0x5cd   : > { %6714 = vmatprep.subr.bf16.mxu1 %v7056_v7  ;;  %6560 = vmatprep.subr.bf16.mxu0 %v7056_v7 }
 0x5d0   : > { %6722 = vmatpush3.bf16.msra.mxu1 %v7056_v7  ;;  %6561 = vmatpush3.bf16.msra.mxu0 %v7056_v7  ;;  %v9281_v7 = vld [vmem:[#allocation14_spill] sm:$0xff] }
 0x5d1   : > { %6715 = vmatprep.subr.bf16.mxu1 %v7057_v15  ;;  %6562 = vmatprep.subr.bf16.mxu0 %v7057_v15 }
 0x5d4   : > { %6723 = vmatpush3.bf16.msra.mxu1 %v7057_v15  ;;  %6563 = vmatpush3.bf16.msra.mxu0 %v7057_v15  ;;  %v9285_v15 = vld [vmem:[#allocation6_spill] sm:$0xff] }
 0x5d5   : > { %6596 = vmatprep.subr.bf16.mxu1 %v7058_v0  ;;  %6644 = vmatprep.subr.bf16.mxu0 %v7066_v35 }
 0x5d7   : > { %6581 = vmatmul.mubr.bf16.vlgmr.msra.gmra.mxu1 %v3945_v38  ;;  %6565 = vmatmul.mubr.bf16.vlgmr.msra.gmra.mxu0 %v3937_v36 }
 0x5d8   : > { %6597 = vmatpush3.bf16.msra.mxu1 %v7058_v0  ;;  %6584 = vmatprep.mubr.bf16.mxu1 %v3946_v58  ;;  %v7067_v0 = vld [vmem:[%s9169_s14 + $0x30] sm:$0xff]  }
 0x5d9   : > { %6598 = vmatprep.subr.bf16.mxu1 %v7059_v1  ;;  %6568 = vmatprep.mubr.bf16.mxu0 %v3938_v11 }
 0x5da   : > { %6645 = vmatpush3.bf16.msra.mxu0 %v7066_v35 }
 0x5db   : > { %6646 = vmatprep.subr.bf16.mxu0 %v7067_v0 }
 0x5dc   : > { %6599 = vmatpush3.bf16.msra.mxu1 %v7059_v1 }
 0x5dd   : > { %6600 = vmatprep.subr.bf16.mxu1 %v7060_v14 }
 0x5de   : > { %6647 = vmatpush3.bf16.msra.mxu0 %v7067_v0 }
 0x5df   : > { %6585 = vmatmul.mubr.bf16.gmra.mxu1 %v3947_v6  ;;  %6569 = vmatmul.mubr.bf16.gmra.mxu0 %v3939_v50 }
 0x5e0   : > { %6601 = vmatpush3.bf16.msra.mxu1 %v7060_v14  ;;  %6588 = vmatprep.mubr.bf16.mxu1 %v3948_v54 }
 0x5e1   : > { %6602 = vmatprep.subr.bf16.mxu1 %v7061_v56  ;;  %6572 = vmatprep.mubr.bf16.mxu0 %v3940_v23 }
 0x5e2   : > { %6648 = vmatprep.subr.bf16.mxu0 %v7068_v55 }
 0x5e3   : > { %6649 = vmatpush3.bf16.msra.mxu0 %v7068_v55 }
 0x5e4   : > { %6603 = vmatpush3.bf16.msra.mxu1 %v7061_v56  ;;  %6650 = vmatprep.subr.bf16.mxu0 %v7069_v39 }
 0x5e5   : > { %6604 = vmatprep.subr.bf16.mxu1 %v7062_v37 }
 0x5e7   : > { %6589 = vmatmul.mubr.bf16.gmra.mxu1 %v3949_v62  ;;  %6573 = vmatmul.mubr.bf16.gmra.mxu0 %v3941_v33 }
 0x5e8   : > { %6605 = vmatpush3.bf16.msra.mxu1 %v7062_v37  ;;  %6592 = vmatprep.mubr.bf16.mxu1 %v3950_v51 }
 0x5e9   : > { %6606 = vmatprep.subr.bf16.mxu1 %v7063_v5  ;;  %6576 = vmatprep.mubr.bf16.mxu0 %v3942_v59 }
 0x5ea   : > { %6651 = vmatpush3.bf16.msra.mxu0 %v7069_v39 }
 0x5eb   : > { %6652 = vmatprep.subr.bf16.mxu0 %v7070_v25 }
 0x5ec   : > { %6607 = vmatpush3.bf16.msra.mxu1 %v7063_v5 }
 0x5ed   : > { %6608 = vmatprep.subr.bf16.mxu1 %v7064_v49 }
 0x5ee   : > { %6653 = vmatpush3.bf16.msra.mxu0 %v7070_v25 }
 0x5ef   : > { %6593 = vmatmul.mubr.bf16.gmra.mxu1 %v3951_v40  ;;  %6577 = vmatmul.mubr.bf16.gmra.mxu0 %v3943_v17 }
 0x5f0   : > { %6609 = vmatpush3.bf16.msra.mxu1 %v7064_v49  ;;  %6612 = vmatprep.mubr.bf16.mxu1 %v7459_v41  ;;  %v9280_v41 = vld [vmem:[#allocation16_spill] sm:$0xff] }
 0x5f1   : > { %6610 = vmatprep.subr.bf16.mxu1 %v7065_v22  ;;  %6654 = vmatprep.subr.bf16.mxu0 %v7071_v8 }
 0x5f2   : > { %6655 = vmatpush3.bf16.msra.mxu0 %v7071_v8 }
 0x5f3   : > { %6656 = vmatprep.subr.bf16.mxu0 %v7072_v3 }
 0x5f4   : > { %6611 = vmatpush3.bf16.msra.mxu1 %v7065_v22 }
 0x5f6   : > { %6657 = vmatpush3.bf16.msra.mxu0 %v7072_v3 }
 0x5f7   : > { %6613 = vmatmul.mubr.bf16.vlgmr.msra.gmra.mxu1 %v9272_v60  ;;  %6658 = vmatprep.subr.bf16.mxu0 %v7073_v31 }
 0x5f8   : > { %6616 = vmatprep.mubr.bf16.mxu1 %v9273_v53 }
 0x5fa   : > { %6659 = vmatpush3.bf16.msra.mxu0 %v7073_v31 }
 0x5ff   : > { %6617 = vmatmul.mubr.bf16.gmra.mxu1 %v9274_v24 }
 0x600   : > { %6620 = vmatprep.mubr.bf16.mxu1 %v9275_v10 }
 0x607   : > { %6621 = vmatmul.mubr.bf16.gmra.mxu1 %v9276_v57 }
 0x608   : > { %6624 = vmatprep.mubr.bf16.mxu1 %v9277_v52 }
 0x60f   : > { %6625 = vmatmul.mubr.bf16.gmra.mxu1 %v9278_v43 }
 0x610   : > { %6628 = vmatprep.mubr.bf16.mxu1 %v9279_v4 }
 0x617   : > { %6629 = vmatmul.mubr.bf16.gmra.mxu1 %v9280_v41 }
 0x618   : > { %6632 = vmatprep.mubr.bf16.mxu1 %v9281_v7 }
 0x61f   : > { %6633 = vmatmul.mubr.bf16.gmra.mxu1 %v9282_v61 }
 0x620   : > { %6636 = vmatprep.mubr.bf16.mxu1 %v9283_v48 }
 0x627   : > { %6637 = vmatmul.mubr.bf16.gmra.mxu1 %v9284_v42 }
 0x628   : > { %6640 = vmatprep.mubr.bf16.mxu1 %v9285_v15 }
 0x62f   : > { %6641 = vmatmul.mubr.bf16.gmra.mxu1 %v9286_v9 }
 0x697   : > { %v8854_v38 = vpop.f32.mrf.mxu1  ;;  %v6566_v1 = vpop.f32.mrf.mxu0 }
 0x699   : > { %v8856_v58 = vpop.f32.mrf.mxu1  ;;  %v4050_v29 = vpop.f32.mrf.mxu0 }
 0x69b   : > { %v8858_v36 = vpop.f32.mrf.mxu1  ;;  %v6567_v63 = vpop.f32.mrf.mxu0 }
 0x69d   : > { %v8860_v11 = vpop.f32.mrf.mxu1  ;;  %v4053_v30 = vpop.f32.mrf.mxu0 }
 0x69f   : > { %v8862_v26 = vpop.f32.mrf.mxu1  ;;  %v6570_v45 = vpop.f32.mrf.mxu0 }
 0x6a1   : > { %v8864_v14 = vpop.f32.mrf.mxu1  ;;  %v4066_v50 = vpop.f32.mrf.mxu0 }
 0x6a3   : > { %v8866_v32 = vpop.f32.mrf.mxu1  ;;  %v6571_v19 = vpop.f32.mrf.mxu0 }
 0x6a5   : > { %v8868_v27 = vpop.f32.mrf.mxu1  ;;  %v4069_v34 = vpop.f32.mrf.mxu0 }
 0x6a7   : > { %v8870_v6 = vpop.f32.mrf.mxu1  ;;  %v6574_v47 = vpop.f32.mrf.mxu0 }
 0x6a9   : > { %v8872_v13 = vpop.f32.mrf.mxu1  ;;  %v4082_v46 = vpop.f32.mrf.mxu0 }
 0x6ab   : > { %v8874_v54 = vpop.f32.mrf.mxu1  ;;  %v6575_v57 = vpop.f32.mrf.mxu0 }
 0x6ad   : > { %v8876_v56 = vpop.f32.mrf.mxu1  ;;  %v4085_v15 = vpop.f32.mrf.mxu0 }
 0x6af   : > { %v8878_v23 = vpop.f32.mrf.mxu1  ;;  %v6578_v31 = vpop.f32.mrf.mxu0 }
 0x6b1   : > { %v8880_v2 = vpop.f32.mrf.mxu1 }
 0x6b3   : > { %v8882_v37 = vpop.f32.mrf.mxu1 }
 0x6b5   : > { %v8884_v44 = vpop.f32.mrf.mxu1 }
 0x6b7   : > { %v6614_v18 = vpop.f32.mrf.mxu1 }
 0x6b8   : > { %v4268_v62 = vadd.f32 %v6614_v18, %v6566_v1 }
 0x6b9   : > { %v4259_v28 = vpop.f32.mrf.mxu1 }
 0x6ba   : > { %v8892_v51 = vadd.f32 %v8889_v20, %v4268_v62  ;;  %v4260_v5 = vadd.f32 %v4259_v28, %v4050_v29  ;;  %v4098_v28 = vpop.f32.mrf.mxu0 }
 0x6bb   : > { %v6615_v33 = vpop.f32.mrf.mxu1 }
 0x6bc   : > { %v5673_v59 = vmul.f32 -1.442695, %v8892_v51  ;;  %v8896_v12 = vadd.f32 %v8889_v20, %v4260_v5  ;;  %v4271_v21 = vadd.f32 %v6615_v33, %v6567_v63 }
 0x6bd   : > { %v4262_v49 = vpop.f32.mrf.mxu1 }
 0x6be   : > { %7074 = vpow2.f32 %v5673_v59  ;;  %v5671_v16 = vmul.f32 -1.442695, %v8896_v12  ;;  %v8900_v40 = vadd.f32 %v8889_v20, %v4271_v21  ;;  %v4263_v22 = vadd.f32 %v4262_v49, %v4053_v30 }
 0x6bf   : > { %v6618_v17 = vpop.f32.mrf.mxu1 }
 0x6c0   : > { %7076 = vpow2.f32 %v5671_v16  ;;  %v5674_v60 = vmul.f32 -1.442695, %v8900_v40  ;;  %v8904_v53 = vadd.f32 %v8889_v20, %v4263_v22  ;;  %v4284_v24 = vadd.f32 %v6618_v17, %v6570_v45 }
 0x6c1   : > { %v4275_v10 = vpop.f32.mrf.mxu1 }
 0x6c2   : > { %7078 = vpow2.f32 %v5674_v60  ;;  %v5672_v52 = vmul.f32 -1.442695, %v8904_v53  ;;  %v8908_v43 = vadd.f32 %v8889_v20, %v4284_v24  ;;  %v4276_v4 = vadd.f32 %v4275_v10, %v4066_v50  ;;  %v6579_v10 = vpop.f32.mrf.mxu0 }
 0x6c3   : > { %v6619_v41 = vpop.f32.mrf.mxu1 }
 0x6c4   : > { %7080 = vpow2.f32 %v5672_v52  ;;  %v5677_v7 = vmul.f32 -1.442695, %v8908_v43  ;;  %v8912_v61 = vadd.f32 %v8889_v20, %v4276_v4  ;;  %v4287_v48 = vadd.f32 %v6619_v41, %v6571_v19 }
 0x6c5   : > { %v4278_v42 = vpop.f32.mrf.mxu1 }
 0x6c6   : > { %7082 = vpow2.f32 %v5677_v7  ;;  %v5675_v9 = vmul.f32 -1.442695, %v8912_v61  ;;  %v8916_v35 = vadd.f32 %v8889_v20, %v4287_v48  ;;  %v4279_v0 = vadd.f32 %v4278_v42, %v4069_v34 }
 0x6c7   : > { %v6622_v55 = vpop.f32.mrf.mxu1 }
 0x6c8   : > { %7084 = vpow2.f32 %v5675_v9  ;;  %v5678_v39 = vmul.f32 -1.442695, %v8916_v35  ;;  %v8920_v25 = vadd.f32 %v8889_v20, %v4279_v0  ;;  %v4300_v8 = vadd.f32 %v6622_v55, %v6574_v47 }
 0x6c9   : > { %v4291_v3 = vpop.f32.mrf.mxu1 }
 0x6ca   : > { %7086 = vpow2.f32 %v5678_v39  ;;  %v5676_v1 = vmul.f32 -1.442695, %v8920_v25  ;;  %v8924_v29 = vadd.f32 %v8889_v20, %v4300_v8  ;;  %v4292_v63 = vadd.f32 %v4291_v3, %v4082_v46  ;;  %v4101_v39 = vpop.f32.mrf.mxu0 }
 0x6cb   : > { %v7075_v30 = vpop.eup %7074  ;;  %v6623_v45 = vpop.f32.mrf.mxu1 }
 0x6cc   : > { %v4523_v50 = vadd.f32 1.0, %v7075_v30  ;;  %7088 = vpow2.f32 %v5676_v1  ;;  %v5681_v19 = vmul.f32 -1.442695, %v8924_v29  ;;  %v8928_v34 = vadd.f32 %v8889_v20, %v4292_v63 }
 0x6cd   : > { %v7077_v18 = vpop.eup %7076  ;;  %v4303_v62 = vadd.f32 %v6623_v45, %v6575_v57  ;;  %v4294_v47 = vpop.f32.mrf.mxu1 }
 0x6ce   : > { %7090 = vrcp.f32 %v4523_v50  ;;  %v4521_v5 = vadd.f32 1.0, %v7077_v18  ;;  %v5679_v33 = vmul.f32 -1.442695, %v8928_v34  ;;  %v4295_v59 = vadd.f32 %v4294_v47, %v4085_v15 }
 0x6cf   : > { %v7079_v21 = vpop.eup %7078  ;;  %7092 = vpow2.f32 %v5681_v19  ;;  %v8932_v49 = vadd.f32 %v8889_v20, %v4303_v62  ;;  %v6626_v46 = vpop.f32.mrf.mxu1 }
 0x6d0   : > { %7094 = vrcp.f32 %v4521_v5  ;;  %v4524_v16 = vadd.f32 1.0, %v7079_v21  ;;  %v8935_v22 = vadd.f32 %v8889_v20, %v4295_v59  ;;  %v4316_v17 = vadd.f32 %v6626_v46, %v6578_v31 }
 0x6d1   : > { %v7081_v60 = vpop.eup %7080  ;;  %7096 = vpow2.f32 %v5679_v33  ;;  %v5682_v24 = vmul.f32 -1.442695, %v8932_v49  ;;  %v4307_v57 = vpop.f32.mrf.mxu1 }
 0x6d2   : > { %7098 = vrcp.f32 %v4524_v16  ;;  %v4522_v52 = vadd.f32 1.0, %v7081_v60  ;;  %v5680_v4 = vmul.f32 -1.442695, %v8935_v22  ;;  %v8940_v41 = vadd.f32 %v8889_v20, %v4316_v17 }
 0x6d3   : > { %v7083_v7 = vpop.eup %7082  ;;  %7100 = vpow2.f32 %v5682_v24  ;;  %v4308_v48 = vadd.f32 %v4307_v57, %v4098_v28  ;;  %v6627_v42 = vpop.f32.mrf.mxu1 }
 0x6d4   : > { %7102 = vrcp.f32 %v4522_v52  ;;  %v4527_v15 = vadd.f32 1.0, %v7083_v7  ;;  %v5685_v9 = vmul.f32 -1.442695, %v8940_v41  ;;  %v4319_v0 = vadd.f32 %v6627_v42, %v6579_v10 }
 0x6d5   : > { %v7085_v55 = vpop.eup %7084  ;;  %7104 = vpow2.f32 %v5680_v4  ;;  %v8944_v8 = vadd.f32 %v8889_v20, %v4308_v48  ;;  %v4310_v3 = vpop.f32.mrf.mxu1 }
 0x6d6   : > { %7106 = vrcp.f32 %v4527_v15  ;;  %v4525_v31 = vadd.f32 1.0, %v7085_v55  ;;  %v8947_v1 = vadd.f32 %v8889_v20, %v4319_v0  ;;  %v4311_v63 = vadd.f32 %v4310_v3, %v4101_v39 }
 0x6d7   : > { %v7087_v30 = vpop.eup %7086  ;;  %7108 = vpow2.f32 %v5685_v9  ;;  %v5683_v45 = vmul.f32 -1.442695, %v8944_v8  ;;  %v6630_v50 = vpop.f32.mrf.mxu1 }
 0x6d8   : > { %7110 = vrcp.f32 %v4525_v31  ;;  %v4528_v19 = vadd.f32 1.0, %v7087_v30  ;;  %v5686_v18 = vmul.f32 -1.442695, %v8947_v1  ;;  %v8952_v62 = vadd.f32 %v8889_v20, %v4311_v63 }
 0x6d9   : > { %v7089_v28 = vpop.eup %7088  ;;  %7112 = vpow2.f32 %v5683_v45  ;;  %v4332_v47 = vadd.f32 %v6630_v50, %v8854_v38  ;;  %v4323_v5 = vpop.f32.mrf.mxu1 }
 0x6da   : > { %7114 = vrcp.f32 %v4528_v19  ;;  %v4526_v33 = vadd.f32 1.0, %v7089_v28  ;;  %v5684_v59 = vmul.f32 -1.442695, %v8952_v62  ;;  %v4324_v21 = vadd.f32 %v4323_v5, %v8856_v58 }
 0x6db   : > { %v7091_v46 = vpop.eup %7090  ;;  %7116 = vpow2.f32 %v5686_v18  ;;  %v8958_v16 = vadd.f32 %v8889_v20, %v4332_v47  ;;  %v6631_v17 = vpop.f32.mrf.mxu1 }
 0x6dc   : > { %v7093_v60 = vpop.eup %7092  ;;  %7118 = vrcp.f32 %v4526_v33  ;;  %v8961_v24 = vadd.f32 %v8889_v20, %v4324_v21  ;;  %v4335_v38 = vadd.f32 %v6631_v17, %v8858_v36  ;;  %v4619_v63 = vmul.f32 %v7091_v46, %v8892_v51 }
 0x6dd   : > { %v7095_v10 = vpop.eup %7094  ;;  %v4531_v57 = vadd.f32 1.0, %v7093_v60  ;;  %7120 = vpow2.f32 %v5684_v59  ;;  %v5689_v52 = vmul.f32 -1.442695, %v8958_v16  ;;  %v4326_v4 = vpop.f32.mrf.mxu1 }
 0x6de   : > { %v7097_v58 = vpop.eup %7096  ;;  %v5687_v7 = vmul.f32 -1.442695, %v8961_v24  ;;  %v8967_v48 = vadd.f32 %v8889_v20, %v4335_v38  ;;  %v4327_v42 = vadd.f32 %v4326_v4, %v8860_v11  ;;  %v4617_v19 = vmul.f32 %v7095_v10, %v8896_v12 }
 0x6df   : > { %v7099_v15 = vpop.eup %7098  ;;  %7122 = vrcp.f32 %v4531_v57  ;;  %v4529_v9 = vadd.f32 1.0, %v7097_v58  ;;  %v6634_v0 = vpop.f32.mrf.mxu1 }
 0x6e0   : > { %v7101_v55 = vpop.eup %7100  ;;  %v4620_v36 = vmul.f32 %v7099_v15, %v8900_v40  ;;  %7124 = vpow2.f32 %v5689_v52  ;;  %v5690_v39 = vmul.f32 -1.442695, %v8967_v48  ;;  %v8973_v3 = vadd.f32 %v8889_v20, %v4327_v42 }
 0x6e1   : > { %v7103_v31 = vpop.eup %7102  ;;  %7126 = vrcp.f32 %v4529_v9  ;;  %v4532_v30 = vadd.f32 1.0, %v7101_v55  ;;  %v4348_v11 = vadd.f32 %v6634_v0, %v8862_v26  ;;  %v4339_v45 = vpop.f32.mrf.mxu1 }
 0x6e2   : > { %v7105_v50 = vpop.eup %7104  ;;  %v4618_v18 = vmul.f32 %v7103_v31, %v8904_v53  ;;  %7128 = vpow2.f32 %v5687_v7  ;;  %v5688_v40 = vmul.f32 -1.442695, %v8973_v3  ;;  %v4340_v51 = vadd.f32 %v4339_v45, %v8864_v14 }
 0x6e3   : > { %v7107_v28 = vpop.eup %7106  ;;  %7130 = vrcp.f32 %v4532_v30  ;;  %v4530_v47 = vadd.f32 1.0, %v7105_v50  ;;  %v8981_v5 = vadd.f32 %v8889_v20, %v4348_v11  ;;  %v6635_v33 = vpop.f32.mrf.mxu1  ;;  %v4650_v26 = vpack.c.bf16 %v4620_v36, %v4619_v63 }
 0x6e4   : > { %v7109_v59 = vpop.eup %7108  ;;  %7132 = vpow2.f32 %v5690_v39  ;;  %v4351_v21 = vadd.f32 %v6635_v33, %v8866_v32  ;;  %v4649_v12 = vpack.c.bf16 %v4618_v18, %v4617_v19  ;;  %v8987_v60 = vadd.f32 %v8889_v20, %v4340_v51 }
 0x6e5   : > { %v7111_v46 = vpop.eup %7110  ;;  %7134 = vrcp.f32 %v4530_v47  ;;  %v4535_v53 = vadd.f32 1.0, %v7109_v59  ;;  %v5693_v17 = vmul.f32 -1.442695, %v8981_v5  ;;  %v4342_v38 = vpop.f32.mrf.mxu1  ;;  %v4623_v11 = vmul.f32 %v7107_v28, %v8908_v43 }
 0x6e6   : > { %v7113_v10 = vpop.eup %7112  ;;  %7136 = vpow2.f32 %v5688_v40  ;;  %v8990_v14 = vadd.f32 %v8889_v20, %v4351_v21  ;;  %v4343_v57 = vadd.f32 %v4342_v38, %v8868_v27  ;;  %6660 = vmatprep.mubr.bf16.mxu0 %v4649_v12  ;;  %v5691_v4 = vmul.f32 -1.442695, %v8987_v60 }
 0x6e7   : > { %v7115_v52 = vpop.eup %7114  ;;  %7138 = vrcp.f32 %v4535_v53  ;;  %v4533_v32 = vadd.f32 1.0, %v7113_v10  ;;  %v6638_v58 = vpop.f32.mrf.mxu1  ;;  %6661 = vmatmul.mubr.bf16.vlgmr.msra.gmra.mxu0 %v4650_v26  ;;  %v4621_v42 = vmul.f32 %v7111_v46, %v8912_v61 }
 0x6e8   : > { %v7117_v7 = vpop.eup %7116  ;;  %7140 = vpow2.f32 %v5693_v17  ;;  %v5694_v15 = vmul.f32 -1.442695, %v8990_v14  ;;  %v8997_v9 = vadd.f32 %v8889_v20, %v4343_v57  ;;  %v4624_v27 = vmul.f32 %v7115_v52, %v8916_v35 }
 0x6e9   : > { %v7119_v0 = vpop.eup %7118  ;;  %7142 = vrcp.f32 %v4533_v32  ;;  %v4536_v55 = vadd.f32 1.0, %v7117_v7  ;;  %v4364_v36 = vadd.f32 %v6638_v58, %v8870_v6  ;;  %v4355_v39 = vpop.f32.mrf.mxu1 }
 0x6ea   : > { %v7121_v31 = vpop.eup %7120  ;;  %v4622_v63 = vmul.f32 %v7119_v0, %v8920_v25  ;;  %7144 = vpow2.f32 %v5691_v4  ;;  %v5692_v61 = vmul.f32 -1.442695, %v8997_v9  ;;  %v4356_v30 = vadd.f32 %v4355_v39, %v8872_v13 }
 0x6eb   : > { %7146 = vrcp.f32 %v4536_v55  ;;  %v4534_v45 = vadd.f32 1.0, %v7121_v31  ;;  %v9006_v50 = vadd.f32 %v8889_v20, %v4364_v36  ;;  %v6639_v35 = vpop.f32.mrf.mxu1  ;;  %v4652_v43 = vpack.c.bf16 %v4624_v27, %v4623_v11 }
 0x6ec   : > { %v7123_v19 = vpop.eup %7122  ;;  %7148 = vpow2.f32 %v5694_v15  ;;  %v9009_v6 = vadd.f32 %v8889_v20, %v4356_v30  ;;  %v4367_v25 = vadd.f32 %v6639_v35, %v8874_v54  ;;  %v4651_v18 = vpack.c.bf16 %v4622_v63, %v4621_v42 }
 0x6ed   : > { %v7125_v40 = vpop.eup %7124  ;;  %7150 = vrcp.f32 %v4534_v45  ;;  %v5697_v13 = vmul.f32 -1.442695, %v9006_v50  ;;  %v4358_v47 = vpop.f32.mrf.mxu1  ;;  %v4627_v10 = vmul.f32 %v7123_v19, %v8924_v29 }
 0x6ee   : > { %v7127_v28 = vpop.eup %7126  ;;  %v4539_v51 = vadd.f32 1.0, %v7125_v40  ;;  %7152 = vpow2.f32 %v5692_v61  ;;  %v5695_v33 = vmul.f32 -1.442695, %v9009_v6  ;;  %v9015_v59 = vadd.f32 %v8889_v20, %v4367_v25  ;;  %6664 = vmatprep.mubr.bf16.mxu0 %v4651_v18 }
 0x6ef   : > { %v7129_v26 = vpop.eup %7128  ;;  %7154 = vpow2.f32 %v5697_v13  ;;  %v4359_v54 = vadd.f32 %v4358_v47, %v8876_v56  ;;  %v6642_v21 = vpop.f32.mrf.mxu1  ;;  %6665 = vmatmul.mubr.bf16.gmra.mxu0 %v4652_v43 }
 0x6f0   : > { %v7131_v12 = vpop.eup %7130  ;;  %7156 = vrcp.f32 %v4539_v51  ;;  %v4537_v46 = vadd.f32 1.0, %v7129_v26  ;;  %v5698_v53 = vmul.f32 -1.442695, %v9015_v59  ;;  %v4380_v17 = vadd.f32 %v6642_v21, %v8878_v23 }
 0x6f1   : > { %v7133_v38 = vpop.eup %7132  ;;  %v4628_v57 = vmul.f32 %v7131_v12, %v8932_v49  ;;  %7158 = vpow2.f32 %v5695_v33  ;;  %v9023_v52 = vadd.f32 %v8889_v20, %v4359_v54  ;;  %v4371_v32 = vpop.f32.mrf.mxu1  ;;  %v4625_v23 = vmul.f32 %v7127_v28, %v8928_v34 }
 0x6f2   : > { %v7135_v56 = vpop.eup %7134  ;;  %7160 = vrcp.f32 %v4537_v46  ;;  %v4540_v4 = vadd.f32 1.0, %v7133_v38  ;;  %v9026_v58 = vadd.f32 %v8889_v20, %v4380_v17  ;;  %v4372_v7 = vadd.f32 %v4371_v32, %v8880_v2 }
 0x6f3   : > { %v7137_v42 = vpop.eup %7136  ;;  %v4626_v29 = vmul.f32 %v7135_v56, %v8935_v22  ;;  %7162 = vpow2.f32 %v5698_v53  ;;  %v5696_v49 = vmul.f32 -1.442695, %v9023_v52  ;;  %v6643_v15 = vpop.f32.mrf.mxu1  ;;  %v4654_v63 = vpack.c.bf16 %v4628_v57, %v4627_v10 }
 0x6f4   : > { %v7139_v0 = vpop.eup %7138  ;;  %7164 = vrcp.f32 %v4540_v4  ;;  %v4538_v27 = vadd.f32 1.0, %v7137_v42  ;;  %v5701_v55 = vmul.f32 -1.442695, %v9026_v58  ;;  %v9034_v36 = vadd.f32 %v8889_v20, %v4372_v7 }
 0x6f5   : > { %v7141_v39 = vpop.eup %7140  ;;  %7166 = vpow2.f32 %v5696_v49  ;;  %v4383_v2 = vadd.f32 %v6643_v15, %v8882_v37  ;;  %v4374_v31 = vpop.f32.mrf.mxu1  ;;  %v4653_v34 = vpack.c.bf16 %v4626_v29, %v4625_v23  ;;  %v4631_v26 = vmul.f32 %v7139_v0, %v8940_v41 }
 0x6f6   : > { %v7143_v22 = vpop.eup %7142  ;;  %7168 = vrcp.f32 %v4538_v27  ;;  %v4543_v61 = vadd.f32 1.0, %v7141_v39  ;;  %v5699_v30 = vmul.f32 -1.442695, %v9034_v36  ;;  %v4375_v11 = vadd.f32 %v4374_v31, %v8884_v44 }
 0x6f7   : > { %v7145_v45 = vpop.eup %7144  ;;  %7170 = vpow2.f32 %v5701_v55  ;;  %v9040_v35 = vadd.f32 %v8889_v20, %v4383_v2  ;;  %6668 = vmatprep.mubr.bf16.mxu0 %v4653_v34  ;;  %v4629_v51 = vmul.f32 %v7143_v22, %v8944_v8 }
 0x6f8   : > { %v7147_v19 = vpop.eup %7146  ;;  %7172 = vrcp.f32 %v4543_v61  ;;  %v4541_v25 = vadd.f32 1.0, %v7145_v45  ;;  %v9043_v37 = vadd.f32 %v8889_v20, %v4375_v11  ;;  %6669 = vmatmul.mubr.bf16.gmra.mxu0 %v4654_v63 }
 0x6f9   : > { %v7149_v18 = vpop.eup %7148  ;;  %7174 = vpow2.f32 %v5699_v30  ;;  %v5702_v40 = vmul.f32 -1.442695, %v9040_v35  ;;  %v4632_v44 = vmul.f32 %v7147_v19, %v8947_v1 }
 0x6fa   : > { %v7151_v13 = vpop.eup %7150  ;;  %7176 = vrcp.f32 %v4541_v25  ;;  %v4544_v47 = vadd.f32 1.0, %v7149_v18  ;;  %v5700_v43 = vmul.f32 -1.442695, %v9043_v37 }
 0x6fb   : > { %v7153_v28 = vpop.eup %7152  ;;  %v4630_v33 = vmul.f32 %v7151_v13, %v8952_v62  ;;  %7178 = vpow2.f32 %v5702_v40  ;;  %v4656_v53 = vpack.c.bf16 %v4632_v44, %v4631_v26  ;;  %v9070_v26 = vld [vmem:[%s9288_s13] ss:$0 sm:$0xff] }
 0x6fc   : > { %v7155_v20 = vpop.eup %7154  ;;  %7180 = vrcp.f32 %v4544_v47  ;;  %v4542_v54 = vadd.f32 1.0, %v7153_v28 }
 0x6fd   : > { %v7157_v21 = vpop.eup %7156  ;;  %v4547_v12 = vadd.f32 1.0, %v7155_v20  ;;  %7182 = vpow2.f32 %v5700_v43  ;;  %v4655_v46 = vpack.c.bf16 %v4630_v33, %v4629_v51 }
 0x6fe   : > { %v7159_v1 = vpop.eup %7158  ;;  %7184 = vrcp.f32 %v4542_v54  ;;  %v4635_v41 = vmul.f32 %v7157_v21, %v8958_v16 }
 0x6ff   : > { %v7161_v17 = vpop.eup %7160  ;;  %v4545_v38 = vadd.f32 1.0, %v7159_v1  ;;  %6672 = vmatprep.mubr.bf16.mxu0 %v4655_v46  ;;  %7186 = vrcp.f32 %v4547_v12 }
 0x700   : > { %v7163_v10 = vpop.eup %7162  ;;  %6673 = vmatmul.mubr.bf16.gmra.mxu0 %v4656_v53  ;;  %v4633_v42 = vmul.f32 %v7161_v17, %v8961_v24 }
 0x701   : > { %v7165_v8 = vpop.eup %7164  ;;  %v4548_v62 = vadd.f32 1.0, %v7163_v10  ;;  %7188 = vrcp.f32 %v4545_v38 }
 0x702   : > { %v7167_v57 = vpop.eup %7166  ;;  %v4636_v32 = vmul.f32 %v7165_v8, %v8967_v48 }
 0x703   : > { %v7169_v56 = vpop.eup %7168  ;;  %7190 = vrcp.f32 %v4548_v62  ;;  %v4546_v4 = vadd.f32 1.0, %v7167_v57 }
 0x704   : > { %v7171_v7 = vpop.eup %7170  ;;  %v4634_v23 = vmul.f32 %v7169_v56, %v8973_v3  ;;  %v4658_v29 = vpack.c.bf16 %v4636_v32, %v4635_v41 }
 0x705   : > { %v7173_v49 = vpop.eup %7172  ;;  %7192 = vrcp.f32 %v4546_v4  ;;  %v4551_v15 = vadd.f32 1.0, %v7171_v7 }
 0x706   : > { %v7175_v0 = vpop.eup %7174  ;;  %v4657_v27 = vpack.c.bf16 %v4634_v23, %v4633_v42  ;;  %v4639_v34 = vmul.f32 %v7173_v49, %v8981_v5 }
 0x707   : > { %v7177_v55 = vpop.eup %7176  ;;  %v4549_v39 = vadd.f32 1.0, %v7175_v0  ;;  %7194 = vrcp.f32 %v4551_v15 }
 0x708   : > { %v7179_v16 = vpop.eup %7178  ;;  %6676 = vmatprep.mubr.bf16.mxu0 %v4657_v27  ;;  %v4637_v22 = vmul.f32 %v7177_v55, %v8987_v60 }
 0x709   : > { %v7181_v48 = vpop.eup %7180  ;;  %v4552_v2 = vadd.f32 1.0, %v7179_v16  ;;  %6677 = vmatmul.mubr.bf16.gmra.mxu0 %v4658_v29  ;;  %7196 = vrcp.f32 %v4549_v39 }
 0x70a   : > { %v7183_v31 = vpop.eup %7182  ;;  %v4640_v24 = vmul.f32 %v7181_v48, %v8990_v14 }
 0x70b   : > { %v7185_v3 = vpop.eup %7184  ;;  %7198 = vrcp.f32 %v4552_v2  ;;  %v4550_v63 = vadd.f32 1.0, %v7183_v31 }
 0x70c   : > { %v4638_v61 = vmul.f32 %v7185_v3, %v8997_v9  ;;  %v4660_v30 = vpack.c.bf16 %v4640_v24, %v4639_v34  ;;  %v7187_v11 = vpop.eup %7186 }
 0x70d   : > { %7200 = vrcp.f32 %v4550_v63  ;;  %v4643_v18 = vmul.f32 %v7187_v11, %v9006_v50 }
 0x70e   : > { %v4659_v45 = vpack.c.bf16 %v4638_v61, %v4637_v22  ;;  %v7189_v19 = vpop.eup %7188 }
 0x70f   : > { %v4641_v40 = vmul.f32 %v7189_v19, %v9009_v6 }
 0x710   : > { %v7191_v25 = vpop.eup %7190  ;;  %6680 = vmatprep.mubr.bf16.mxu0 %v4659_v45 }
 0x711   : > { %v4644_v5 = vmul.f32 %v7191_v25, %v9015_v59  ;;  %6681 = vmatmul.mubr.bf16.gmra.mxu0 %v4660_v30 }
 0x712   : > { %v7193_v14 = vpop.eup %7192 }
 0x713   : > { %v4642_v13 = vmul.f32 %v7193_v14, %v9023_v52  ;;  %v4662_v60 = vpack.c.bf16 %v4644_v5, %v4643_v18 }
 0x714   : > { %v7195_v9 = vpop.eup %7194 }
 0x715   : > { %v4661_v44 = vpack.c.bf16 %v4642_v13, %v4641_v40  ;;  %v4647_v28 = vmul.f32 %v7195_v9, %v9026_v58 }
 0x716   : > { %v7197_v47 = vpop.eup %7196 }
 0x717   : > { %6684 = vmatprep.mubr.bf16.mxu0 %v4661_v44  ;;  %v4645_v59 = vmul.f32 %v7197_v47, %v9034_v36 }
 0x718   : > { %v7199_v43 = vpop.eup %7198 }
 0x719   : > { %v4648_v51 = vmul.f32 %v7199_v43, %v9040_v35  ;;  %6685 = vmatmul.mubr.bf16.gmra.mxu0 %v4662_v60 }
 0x71a   : > { %v7201_v50 = vpop.eup %7200 }
 0x71b   : > { %v4646_v33 = vmul.f32 %v7201_v50, %v9043_v37  ;;  %v4664_v20 = vpack.c.bf16 %v4648_v51, %v4647_v28 }
 0x71d   : > { %v4663_v6 = vpack.c.bf16 %v4646_v33, %v4645_v59 }
 0x71f   : > { %6688 = vmatprep.mubr.bf16.mxu0 %v4663_v6 }
 0x721   : > { %6689 = vmatmul.mubr.bf16.gmra.mxu0 %v4664_v20 }
 0x7a7   : > { %v6662_v52 = vpop.f32.mrf.mxu0 }
 0x7a8   : > { %v4779_v35 = vadd.f32 %v6662_v52, %v9070_v26 }
 0x7a9   : > { %v4770_v54 = vpop.f32.mrf.mxu0 }
 0x7aa   : > { %v4771_v36 = vadd.f32 %v9070_v26, %v4770_v54 }
 0x7ab   : > { %v6663_v58 = vpop.f32.mrf.mxu0 }
 0x7ac   : > { %v4782_v21 = vadd.f32 %v6663_v58, %v9070_v26 }
 0x7ad   : > { %v4773_v12 = vpop.f32.mrf.mxu0 }
 0x7ae   : > { %v5786_v37 = vpack.c.bf16 %v4782_v21, %v4779_v35  ;;  %v4774_v46 = vadd.f32 %v9070_v26, %v4773_v12 }
 0x7af   : > { %v6666_v1 = vpop.f32.mrf.mxu0 }
 0x7b0   : > { %5858 = vst [vmem:[%s9289_s28 + $0x8] sm:$0xff] %v5786_v37   ;;  %v5781_v53 = vpack.c.bf16 %v4774_v46, %v4771_v36  ;;  %v4795_v10 = vadd.f32 %v6666_v1, %v9070_v26 }
 0x7b1   : > { %v4786_v17 = vpop.f32.mrf.mxu0 }
 0x7b2   : > { %5782 = vst [vmem:[%s9289_s28] sm:$0xff] %v5781_v53   ;;  %v4787_v57 = vadd.f32 %v9070_v26, %v4786_v17 }
 0x7b3   : > { %v6667_v38 = vpop.f32.mrf.mxu0 }
 0x7b4   : > { %v4798_v8 = vadd.f32 %v6667_v38, %v9070_v26 }
 0x7b5   : > { %v4789_v62 = vpop.f32.mrf.mxu0 }
 0x7b6   : > { %v5796_v41 = vpack.c.bf16 %v4798_v8, %v4795_v10  ;;  %v4790_v32 = vadd.f32 %v9070_v26, %v4789_v62 }
 0x7b8   : > { %5860 = vst [vmem:[%s9289_s28 + $0x18] sm:$0xff] %v5796_v41   ;;  %v5791_v56 = vpack.c.bf16 %v4790_v32, %v4787_v57  ;;  %v6670_v4 = vpop.f32.mrf.mxu0 }
 0x7b9   : > { %v4811_v23 = vadd.f32 %v6670_v4, %v9070_v26 }
 0x7ba   : > { %5859 = vst [vmem:[%s9289_s28 + $0x10] sm:$0xff] %v5791_v56   ;;  %v4802_v7 = vpop.f32.mrf.mxu0 }
 0x7bb   : > { %v4803_v15 = vadd.f32 %v9070_v26, %v4802_v7 }
 0x7bc   : > { %v6671_v42 = vpop.f32.mrf.mxu0 }
 0x7bd   : > { %v4814_v29 = vadd.f32 %v6671_v42, %v9070_v26 }
 0x7be   : > { %v4805_v49 = vpop.f32.mrf.mxu0 }
 0x7bf   : > { %v5806_v0 = vpack.c.bf16 %v4814_v29, %v4811_v23  ;;  %v4806_v27 = vadd.f32 %v9070_v26, %v4805_v49 }
 0x7c0   : > { %v6674_v55 = vpop.f32.mrf.mxu0 }
 0x7c1   : > { %5862 = vst [vmem:[%s9289_s28 + $0x28] sm:$0xff] %v5806_v0   ;;  %v5801_v39 = vpack.c.bf16 %v4806_v27, %v4803_v15  ;;  %v4827_v2 = vadd.f32 %v6674_v55, %v9070_v26 }
 0x7c2   : > { %v4818_v16 = vpop.f32.mrf.mxu0 }
 0x7c3   : > { %5861 = vst [vmem:[%s9289_s28 + $0x20] sm:$0xff] %v5801_v39   ;;  %v4819_v24 = vadd.f32 %v9070_v26, %v4818_v16 }
 0x7c4   : > { %v6675_v48 = vpop.f32.mrf.mxu0 }
 0x7c5   : > { %v4830_v31 = vadd.f32 %v6675_v48, %v9070_v26 }
 0x7c6   : > { %v4821_v34 = vpop.f32.mrf.mxu0 }
 0x7c7   : > { %v5816_v3 = vpack.c.bf16 %v4830_v31, %v4827_v2  ;;  %v4822_v63 = vadd.f32 %v9070_v26, %v4821_v34 }
 0x7c9   : > { %5864 = vst [vmem:[%s9289_s28 + $0x38] sm:$0xff] %v5816_v3   ;;  %v5811_v22 = vpack.c.bf16 %v4822_v63, %v4819_v24  ;;  %v6678_v61 = vpop.f32.mrf.mxu0 }
 0x7ca   : > { %v4843_v45 = vadd.f32 %v6678_v61, %v9070_v26 }
 0x7cb   : > { %5863 = vst [vmem:[%s9289_s28 + $0x30] sm:$0xff] %v5811_v22   ;;  %v4834_v30 = vpop.f32.mrf.mxu0 }
 0x7cc   : > { %v4835_v18 = vadd.f32 %v9070_v26, %v4834_v30 }
 0x7cd   : > { %v6679_v11 = vpop.f32.mrf.mxu0 }
 0x7ce   : > { %v4846_v19 = vadd.f32 %v6679_v11, %v9070_v26 }
 0x7cf   : > { %v4837_v25 = vpop.f32.mrf.mxu0 }
 0x7d0   : > { %v5826_v5 = vpack.c.bf16 %v4846_v19, %v4843_v45  ;;  %v4838_v14 = vadd.f32 %v9070_v26, %v4837_v25 }
 0x7d1   : > { %v6682_v40 = vpop.f32.mrf.mxu0 }
 0x7d2   : > { %5866 = vst [vmem:[%s9289_s28 + $0x48] sm:$0xff] %v5826_v5   ;;  %v5821_v13 = vpack.c.bf16 %v4838_v14, %v4835_v18  ;;  %v4859_v9 = vadd.f32 %v6682_v40, %v9070_v26 }
 0x7d3   : > { %v4850_v60 = vpop.f32.mrf.mxu0 }
 0x7d4   : > { %5865 = vst [vmem:[%s9289_s28 + $0x40] sm:$0xff] %v5821_v13   ;;  %v4851_v28 = vadd.f32 %v9070_v26, %v4850_v60 }
 0x7d5   : > { %v6683_v44 = vpop.f32.mrf.mxu0 }
 0x7d6   : > { %v4862_v47 = vadd.f32 %v6683_v44, %v9070_v26 }
 0x7d7   : > { %v4853_v43 = vpop.f32.mrf.mxu0 }
 0x7d8   : > { %v5836_v51 = vpack.c.bf16 %v4862_v47, %v4859_v9  ;;  %v4854_v50 = vadd.f32 %v9070_v26, %v4853_v43 }
 0x7d9   : > { %v6686_v59 = vpop.f32.mrf.mxu0 }
 0x7da   : > { %5868 = vst [vmem:[%s9289_s28 + $0x58] sm:$0xff] %v5836_v51   ;;  %v5831_v33 = vpack.c.bf16 %v4854_v50, %v4851_v28  ;;  %v4875_v52 = vadd.f32 %v6686_v59, %v9070_v26 }
 0x7db   : > { %v4866_v20 = vpop.f32.mrf.mxu0 }
 0x7dc   : > { %5867 = vst [vmem:[%s9289_s28 + $0x50] sm:$0xff] %v5831_v33   ;;  %v4867_v35 = vadd.f32 %v9070_v26, %v4866_v20 }
 0x7dd   : > { %v6687_v6 = vpop.f32.mrf.mxu0 }
 0x7de   : > { %v4878_v54 = vadd.f32 %v6687_v6, %v9070_v26 }
 0x7df   : > { %v4869_v58 = vpop.f32.mrf.mxu0 }
 0x7e0   : > { %v5846_v21 = vpack.c.bf16 %v4878_v54, %v4875_v52  ;;  %v4870_v12 = vadd.f32 %v9070_v26, %v4869_v58 }
 0x7e1   : > { %v6690_v36 = vpop.f32.mrf.mxu0 }
 0x7e2   : > { %5870 = vst [vmem:[%s9289_s28 + $0x68] sm:$0xff] %v5846_v21   ;;  %v5841_v37 = vpack.c.bf16 %v4870_v12, %v4867_v35  ;;  %v4891_v53 = vadd.f32 %v6690_v36, %v9070_v26 }
 0x7e3   : > { %v4882_v46 = vpop.f32.mrf.mxu0 }
 0x7e4   : > { %5869 = vst [vmem:[%s9289_s28 + $0x60] sm:$0xff] %v5841_v37   ;;  %v4883_v10 = vadd.f32 %v9070_v26, %v4882_v46 }
 0x7e5   : > { %v6691_v1 = vpop.f32.mrf.mxu0 }
 0x7e6   : > { %v4894_v17 = vadd.f32 %v6691_v1, %v9070_v26 }
 0x7e7   : > { %v4885_v38 = vpop.f32.mrf.mxu0 }
 0x7e8   : > { %v5856_v8 = vpack.c.bf16 %v4894_v17, %v4891_v53  ;;  %v4886_v62 = vadd.f32 %v9070_v26, %v4885_v38 }
 0x7ea   : > { %5872 = vst [vmem:[%s9289_s28 + $0x78] sm:$0xff] %v5856_v8   ;;  %v5851_v57 = vpack.c.bf16 %v4886_v62, %v4883_v10 }
 0x7ec   : > { %5871 = vst [vmem:[%s9289_s28 + $0x70] sm:$0xff] %v5851_v57  }
 0x7ed PF: > { %s9290_s27 = sld [smem:[#allocation3_spill]] }
 0x7f3   : > { %s26_s21 = sadd.s32 1, %s9290_s27  }
 0x7f4   : > { %p23_p7 = scmp.ge.s32.totalorder %s26_s21, 4  }
 0x7f6   :  { %25 = sbr.rel (!%p23_p7) target bundleno = 5 (0x5), region = 127 }

</bundles_post_ra>
